<compile_context>
chip_gen: v5e
topology: v5e:2x2
jax: 0.10.0
libtpu: 0.0.40
codegen_flags: <defaults>
</compile_context>

<pallas_src>
import functools

import jax
import jax.numpy as jnp
from jax.experimental import pallas as pl
from jax.experimental.pallas import tpu as pltpu


# ----------------------------------------------------------------------------
# Pallas kernels
# ----------------------------------------------------------------------------
def _lstm_mean_kernel(x_ref, wih_ref, whh_ref, b_ref, o_ref):
    """TapNet LSTM quirk: nn.LSTM(ts_length, H) applied to x of shape (N, C, T)
    with batch_first=False => sequence axis is N, "batch" axis is C.
    Output row t = mean over channels of h_t (the .mean(1) in forward).

    x_ref:  (N*C, T)  bf16 (row-major: sample-major, channel-minor)
    wih:    (T, 4H)   bf16   whh: (H, 4H) bf16   b: (1, 4H) f32
    Gate order along the 4H axis: [i, f, g, o].
    """
    N, H = o_ref.shape
    C = x_ref.shape[0] // N

    # Hoisted input projection for ALL timesteps: a single MXU matmul.
    xp = jnp.dot(x_ref[...], wih_ref[...],
                 preferred_element_type=jnp.float32) + b_ref[...]    # (N*C, 4H) f32
    whh = whh_ref[...]                                               # (H, 4H) bf16

    h = jnp.zeros((C, H), jnp.float32)
    c = jnp.zeros((C, H), jnp.float32)
    means = []
    for t in range(N):                       # static, fully unrolled recurrence
        g = xp[t * C:(t + 1) * C, :] + jnp.dot(
            h.astype(jnp.bfloat16), whh, preferred_element_type=jnp.float32)
        i_g = jax.nn.sigmoid(g[:, 0:H])
        f_g = jax.nn.sigmoid(g[:, H:2 * H])
        g_g = jnp.tanh(g[:, 2 * H:3 * H])
        o_g = jax.nn.sigmoid(g[:, 3 * H:4 * H])
        c = f_g * c + i_g * g_g
        h = o_g * jnp.tanh(c)
        means.append(jnp.mean(h, axis=0, keepdims=True))
    o_ref[...] = jnp.concatenate(means, axis=0)                      # (N, H), single store


def _conv_bn_lrelu_kernel(p_ref, w_ref, b_ref, g_ref, be_ref, o_ref, *, eps, slope):
    """Per-group fused: im2col-matmul conv + training-mode BatchNorm1d + LeakyReLU."""
    y = jnp.dot(p_ref[0], w_ref[0], preferred_element_type=jnp.float32) + b_ref[0]
    mu = jnp.mean(y, axis=0, keepdims=True)
    var = jnp.mean(jnp.square(y - mu), axis=0, keepdims=True)        # biased (training)
    z = (y - mu) * jax.lax.rsqrt(var + eps) * g_ref[0] + be_ref[0]
    o_ref[0] = jnp.where(z >= 0, z, slope * z)


def _conv_bn_lrelu_mean_kernel(p_ref, w_ref, b_ref, g_ref, be_ref, avg_ref, o_ref,
                               *, eps, slope):
    """Same as above, plus the temporal mean (torch.mean(x_conv, 2)) fused as a
    tiny in-kernel averaging matmul avg(N, N*L3) @ z(N*L3, F) -> (N, F)."""
    y = jnp.dot(p_ref[0], w_ref[0], preferred_element_type=jnp.float32) + b_ref[0]
    mu = jnp.mean(y, axis=0, keepdims=True)
    var = jnp.mean(jnp.square(y - mu), axis=0, keepdims=True)
    z = (y - mu) * jax.lax.rsqrt(var + eps) * g_ref[0] + be_ref[0]
    z = jnp.where(z >= 0, z, slope * z)
    o_ref[0] = jnp.dot(avg_ref[...], z, preferred_element_type=jnp.float32)


def _head_kernel(feat_ref, w0_ref, b0_ref, g0_ref, be0_ref, w1_ref, b1_ref,
                 mask_ref, aw1_ref, ab1_ref, aw2_ref, ab2_ref, o_ref,
                 *, nclass, eps=1e-5, slope=0.01):
    """Fused head: mapping MLP (fc0 -> BN -> LeakyReLU -> fc1), per-class
    masked-attention prototypes, and exp(-0.5 * squared euclidean distance).
    Prototypes stay in VMEM/vregs; output is (N, nclass)."""
    bf16 = jnp.bfloat16
    f = feat_ref[...]                                                # (N, fc_in) f32
    h = jnp.dot(f.astype(bf16), w0_ref[...],
                preferred_element_type=jnp.float32) + b0_ref[...]
    mu = jnp.mean(h, axis=0, keepdims=True)
    var = jnp.mean(jnp.square(h - mu), axis=0, keepdims=True)
    h = (h - mu) * jax.lax.rsqrt(var + eps) * g0_ref[...] + be0_ref[...]
    h = jnp.where(h >= 0, h, slope * h)
    x = jnp.dot(h.astype(bf16), w1_ref[...],
                preferred_element_type=jnp.float32) + b1_ref[...]    # (N, D) embeddings
    x_bf = x.astype(bf16)

    cols = []
    for k in range(nclass):                                          # static loop, small nclass
        ah = jnp.tanh(jnp.dot(x_bf, aw1_ref[k],
                              preferred_element_type=jnp.float32) + ab1_ref[k])  # (N, A)
        s = jnp.sum(ah * aw2_ref[k], axis=1, keepdims=True) + ab2_ref[k]          # (N, 1)
        m = mask_ref[:, k:k + 1]                                     # (N, 1) one-hot class mask
        sm = jnp.where(m > 0, s, jnp.float32(-1e30))
        e = jnp.exp(sm - jnp.max(sm, axis=0, keepdims=True)) * m
        denom = jnp.maximum(jnp.sum(e, axis=0, keepdims=True), jnp.float32(1e-30))
        a = e / denom                                                # masked softmax weights
        proto = jnp.sum(a * x, axis=0, keepdims=True)                # (1, D) class prototype
        d = jnp.sum(jnp.square(x - proto), axis=1, keepdims=True)    # squared euclidean
        cols.append(jnp.exp(-0.5 * d))
    o_ref[...] = jnp.concatenate(cols, axis=1)                       # (N, nclass)


# ----------------------------------------------------------------------------
# pallas_call wrappers
# ----------------------------------------------------------------------------
def pallas_lstm_mean(x_flat_bf16, w_ih, w_hh, b, N, H):
    return pl.pallas_call(
        _lstm_mean_kernel,
        out_shape=jax.ShapeDtypeStruct((N, H), jnp.float32),
    )(x_flat_bf16, w_ih, w_hh, b)


def _group_idx(gdim, G):
    return (lambda g: (g, 0, 0)) if gdim == G else (lambda g: (0, 0, 0))


def pallas_conv_bn_lrelu(patches, w, b, gamma, beta, eps=1e-5, slope=0.01):
    """patches: (G, M, K) bf16; w: (Gw, K, F) bf16 (Gw in {1, G}); b/gamma/beta: (Gb,1,F) f32."""
    G, M, K = patches.shape
    F = w.shape[-1]
    return pl.pallas_call(
        functools.partial(_conv_bn_lrelu_kernel, eps=eps, slope=slope),
        out_shape=jax.ShapeDtypeStruct((G, M, F), jnp.float32),
        grid=(G,),
        in_specs=[
            pl.BlockSpec((1, M, K), lambda g: (g, 0, 0)),
            pl.BlockSpec((1, K, F), _group_idx(w.shape[0], G)),
            pl.BlockSpec((1, 1, F), _group_idx(b.shape[0], G)),
            pl.BlockSpec((1, 1, F), _group_idx(gamma.shape[0], G)),
            pl.BlockSpec((1, 1, F), _group_idx(beta.shape[0], G)),
        ],
        out_specs=pl.BlockSpec((1, M, F), lambda g: (g, 0, 0)),
        compiler_params=pltpu.CompilerParams(dimension_semantics=("parallel",)),
    )(patches, w, b, gamma, beta)


def pallas_conv_bn_lrelu_mean(patches, w, b, gamma, beta, avg, eps=1e-5, slope=0.01):
    """Last conv stage: also fuses the temporal mean.  avg: (N, M) f32 averaging matrix."""
    G, M, K = patches.shape
    F = w.shape[-1]
    N = avg.shape[0]
    return pl.pallas_call(
        functools.partial(_conv_bn_lrelu_mean_kernel, eps=eps, slope=slope),
        out_shape=jax.ShapeDtypeStruct((G, N, F), jnp.float32),
        grid=(G,),
        in_specs=[
            pl.BlockSpec((1, M, K), lambda g: (g, 0, 0)),
            pl.BlockSpec((1, K, F), _group_idx(w.shape[0], G)),
            pl.BlockSpec((1, 1, F), _group_idx(b.shape[0], G)),
            pl.BlockSpec((1, 1, F), _group_idx(gamma.shape[0], G)),
            pl.BlockSpec((1, 1, F), _group_idx(beta.shape[0], G)),
            pl.BlockSpec((N, M), lambda g: (0, 0)),
        ],
        out_specs=pl.BlockSpec((1, N, F), lambda g: (g, 0, 0)),
        compiler_params=pltpu.CompilerParams(dimension_semantics=("parallel",)),
    )(patches, w, b, gamma, beta, avg)


# ----------------------------------------------------------------------------
# Plain-JAX glue
# ----------------------------------------------------------------------------
def im2col1d(x_lc, ksize, dilation=1):
    """x_lc: (..., L, C) channel-last -> (..., L_out, C*ksize).
    (c, k) flattened c-major, matching torch Conv1d weight.reshape(O, C*K)."""
    L = x_lc.shape[-2]
    L_out = L - dilation * (ksize - 1)
    cols = [x_lc[..., k * dilation:k * dilation + L_out, :] for k in range(ksize)]
    st = jnp.stack(cols, axis=-1)                           # (..., L_out, C, K)
    return st.reshape(st.shape[:-2] + (st.shape[-2] * st.shape[-1],))


def init_params(key, *, C_in, T, nclass, filters, kernels, dilation,
                rp_group, rp_dim, lstm_dim, layers, att_dim=128):
    ks = iter(jax.random.split(key, 48))
    bf16 = jnp.bfloat16

    def nrm(shape, scale=0.1, dtype=jnp.float32):
        return (scale * jax.random.normal(next(ks), shape, jnp.float32)).astype(dtype)

    f0, f1, f2 = filters
    k0, k1, k2 = kernels
    p = {}

    # deterministic random-projection channel index sets (np.random.permutation analogue)
    p["idx"] = jnp.stack(
        [jax.random.permutation(next(ks), C_in)[:rp_dim] for _ in range(rp_group)], 0
    ).astype(jnp.int32)                                               # (G, rp_dim)

    # Conv weights stored pre-reshaped for the im2col matmul: (C*K, O), (c,k) c-major (bf16).
    w1 = nrm((rp_group, f0, rp_dim, k0))
    p["conv1_w"] = jnp.transpose(w1.reshape(rp_group, f0, rp_dim * k0), (0, 2, 1)).astype(bf16)
    p["conv1_b"] = nrm((rp_group, 1, f0))
    w2 = nrm((f1, f0, k1))
    p["conv2_w"] = jnp.transpose(w2.reshape(f1, f0 * k1), (1, 0))[None].astype(bf16)
    p["conv2_b"] = nrm((1, 1, f1))
    w3 = nrm((f2, f1, k2))
    p["conv3_w"] = jnp.transpose(w3.reshape(f2, f1 * k2), (1, 0))[None].astype(bf16)
    p["conv3_b"] = nrm((1, 1, f2))

    # BatchNorm affine params (shared across rp groups, like the single BN modules)
    p["bn1_g"] = 1.0 + nrm((1, 1, f0)); p["bn1_b"] = nrm((1, 1, f0))
    p["bn2_g"] = 1.0 + nrm((1, 1, f1)); p["bn2_b"] = nrm((1, 1, f1))
    p["bn3_g"] = 1.0 + nrm((1, 1, f2)); p["bn3_b"] = nrm((1, 1, f2))

    # LSTM(input=T, hidden=lstm_dim); gates [i, f, g, o] concatenated along the last axis.
    p["lstm_wih"] = nrm((T, 4 * lstm_dim), dtype=bf16)
    p["lstm_whh"] = nrm((lstm_dim, 4 * lstm_dim), dtype=bf16)
    p["lstm_b"] = nrm((1, 4 * lstm_dim))

    # mapping MLP: layers = [fc_input] + layers ; fc_input = rp_group*f2 + lstm_dim
    fc_in = rp_group * f2 + lstm_dim
    dims = [fc_in] + list(layers)
    p["fc0_w"] = nrm((dims[0], dims[1]), dtype=bf16); p["fc0_b"] = nrm((1, dims[1]))
    p["bn_map_g"] = 1.0 + nrm((1, dims[1])); p["bn_map_b"] = nrm((1, dims[1]))
    p["fc1_w"] = nrm((dims[1], dims[2]), dtype=bf16); p["fc1_b"] = nrm((1, dims[2]))

    # per-class attention heads: Linear(D, att_dim) -> Tanh -> Linear(att_dim, 1)
    D = dims[-1]
    p["att_w1"] = nrm((nclass, D, att_dim), dtype=bf16); p["att_b1"] = nrm((nclass, 1, att_dim))
    p["att_w2"] = nrm((nclass, 1, att_dim)); p["att_b2"] = nrm((nclass, 1, 1))
    return p


def tapnet_forward(cfg, p, x, labels):
    """x: (N, C, T) float32, labels: (N,) int32.  Returns (N, nclass) float32."""
    N, C_in, T = x.shape
    G, rp_dim = cfg["rp_group"], cfg["rp_dim"]
    f0, f1, f2 = cfg["filters"]
    k0, k1, k2 = cfg["kernels"]
    dil = cfg["dilation"]
    nclass = cfg["nclass"]
    H = cfg["lstm_dim"]
    bf16 = jnp.bfloat16

    # ---- LSTM branch (1 fused kernel) ----
    x_lstm = pallas_lstm_mean(x.reshape(N * C_in, T).astype(bf16),
                              p["lstm_wih"], p["lstm_whh"], p["lstm_b"], N, H)   # (N, H)

    # ---- CNN branch with random-projection groups (3 fused kernels) ----
    x_sel = jnp.take(x, p["idx"].reshape(-1), axis=1).reshape(N, G, rp_dim, T)
    x_sel = jnp.transpose(x_sel, (1, 0, 3, 2))                                   # (G, N, T, rp_dim)

    L1 = T - dil * (k0 - 1)
    patches = im2col1d(x_sel, k0, dil).reshape(G, N * L1, rp_dim * k0).astype(bf16)
    y = pallas_conv_bn_lrelu(patches, p["conv1_w"], p["conv1_b"], p["bn1_g"], p["bn1_b"])

    L2 = L1 - (k1 - 1)
    patches = im2col1d(y.reshape(G, N, L1, f0), k1, 1).reshape(G, N * L2, f0 * k1).astype(bf16)
    y = pallas_conv_bn_lrelu(patches, p["conv2_w"], p["conv2_b"], p["bn2_g"], p["bn2_b"])

    L3 = L2 - (k2 - 1)
    patches = im2col1d(y.reshape(G, N, L2, f1), k2, 1).reshape(G, N * L3, f1 * k2).astype(bf16)
    # per-sample temporal averaging matrix (N, N*L3), consumed inside the fused conv3 kernel
    avg = jnp.repeat(jnp.eye(N, dtype=jnp.float32), L3, axis=1) / float(L3)
    yc = pallas_conv_bn_lrelu_mean(patches, p["conv3_w"], p["conv3_b"],
                                   p["bn3_g"], p["bn3_b"], avg)                  # (G, N, f2)
    x_conv = jnp.transpose(yc, (1, 0, 2)).reshape(N, G * f2)                     # cat over groups

    # ---- fused head: mapping MLP + attention prototypes + exp(-0.5 * dist^2) ----
    feat = jnp.concatenate([x_conv, x_lstm], axis=1)                             # (N, G*f2 + H)
    mask = (labels[:, None] == jnp.arange(nclass, dtype=labels.dtype)[None, :]
            ).astype(jnp.float32)                                                # (N, nclass)
    out = pl.pallas_call(
        functools.partial(_head_kernel, nclass=nclass),
        out_shape=jax.ShapeDtypeStruct((N, nclass), jnp.float32),
    )(feat, p["fc0_w"], p["fc0_b"], p["bn_map_g"], p["bn_map_b"],
      p["fc1_w"], p["fc1_b"], mask,
      p["att_w1"], p["att_b1"], p["att_w2"], p["att_b2"])
    return out


if __name__ == "__main__":
    key = jax.random.PRNGKey(0)
    k_param, k_x = jax.random.split(key)

    # Small TapNet hyperparameters (consistent with the module's __init__):
    N, C_in, T = 8, 12, 32
    num_classes = 3
    cfg = dict(rp_group=3, rp_dim=6, filters=[16, 16, 8], kernels=[5, 3, 3],
               dilation=2, nclass=num_classes, lstm_dim=32)
    layers = [64, 32]

    params = init_params(
        k_param, C_in=C_in, T=T, nclass=num_classes, filters=cfg["filters"],
        kernels=cfg["kernels"], dilation=cfg["dilation"], rp_group=cfg["rp_group"],
        rp_dim=cfg["rp_dim"], lstm_dim=cfg["lstm_dim"], layers=layers, att_dim=128)

    x = jax.random.normal(k_x, (N, C_in, T), dtype=jnp.float32)
    labels = jnp.array([0, 1, 2, 0, 1, 2, 0, 1], dtype=jnp.int32)   # every class present

    fwd = jax.jit(functools.partial(tapnet_forward, cfg))
    out = jax.block_until_ready(fwd(params, x, labels))
    assert out.shape == (N, num_classes) and out.dtype == jnp.float32
    assert bool(jnp.all(jnp.isfinite(out)))
    print("KERNEL_OK")
</pallas_src>

<mosaic_0001>
module attributes {stable_mosaic.version = 11 : i64} {
  func.func @_conv_bn_lrelu_kernel(%arg0: i32, %arg1: memref<1x192x30xbf16, #tpu.memory_space<vmem>>, %arg2: memref<1x30x16xbf16, #tpu.memory_space<vmem>>, %arg3: memref<1x1x16xf32, #tpu.memory_space<vmem>>, %arg4: memref<1x1x16xf32, #tpu.memory_space<vmem>>, %arg5: memref<1x1x16xf32, #tpu.memory_space<vmem>>, %arg6: memref<1x192x16xf32, #tpu.memory_space<vmem>>) attributes {dimension_semantics = [#tpu.dimension_semantics<parallel>], iteration_bounds = array<i64: 3>, scalar_prefetch = 0 : i64, scratch_operands = 0 : i64, tpu.core_type = #tpu.core_type<tc>, window_params = [{transform_indices = @transform_0, window_bounds = array<i64: 1, 192, 30>}, {transform_indices = @transform_1, window_bounds = array<i64: 1, 30, 16>}, {transform_indices = @transform_2, window_bounds = array<i64: 1, 1, 16>}, {pipeline_mode = #tpu.pipeline_mode<synchronous>, transform_indices = @transform_3, window_bounds = array<i64: 1, 1, 16>}, {pipeline_mode = #tpu.pipeline_mode<synchronous>, transform_indices = @transform_4, window_bounds = array<i64: 1, 1, 16>}, {transform_indices = @transform_5, window_bounds = array<i64: 1, 192, 16>}]} {
    %c0 = arith.constant 0 : index
    %c0_0 = arith.constant 0 : index
    %c0_1 = arith.constant 0 : index
    %0 = vector.load %arg1[%c0, %c0_0, %c0_1] : memref<1x192x30xbf16, #tpu.memory_space<vmem>>, vector<1x192x30xbf16>
    %1 = vector.shape_cast %0 : vector<1x192x30xbf16> to vector<192x30xbf16>
    %c0_2 = arith.constant 0 : index
    %c0_3 = arith.constant 0 : index
    %c0_4 = arith.constant 0 : index
    %2 = vector.load %arg2[%c0_2, %c0_3, %c0_4] : memref<1x30x16xbf16, #tpu.memory_space<vmem>>, vector<1x30x16xbf16>
    %3 = vector.shape_cast %2 : vector<1x30x16xbf16> to vector<30x16xbf16>
    %cst = arith.constant dense<0.000000e+00> : vector<192x16xf32>
    %4 = tpu.matmul %1, %3, %cst {dimension_numbers = #tpu.dot_dimension_numbers<[1], [0], [0], [1], [0, 0, 1, 1], [], []>} : vector<192x30xbf16>, vector<30x16xbf16>, vector<192x16xf32> -> vector<192x16xf32>
    %c0_5 = arith.constant 0 : index
    %c0_6 = arith.constant 0 : index
    %c0_7 = arith.constant 0 : index
    %5 = vector.load %arg3[%c0_5, %c0_6, %c0_7] : memref<1x1x16xf32, #tpu.memory_space<vmem>>, vector<1x1x16xf32>
    %6 = vector.shape_cast %5 : vector<1x1x16xf32> to vector<1x16xf32>
    %7 = vector.broadcast %6 : vector<1x16xf32> to vector<192x16xf32>
    %8 = arith.addf %4, %7 : vector<192x16xf32>
    %cst_8 = arith.constant dense<0.000000e+00> : vector<16xf32>
    %9 = vector.multi_reduction <add>, %8, %cst_8 [0] : vector<192x16xf32> to vector<16xf32>
    %10 = vector.shape_cast %9 : vector<16xf32> to vector<1x16xf32>
    %cst_9 = arith.constant 1.920000e+02 : f32
    %11 = vector.broadcast %cst_9 : f32 to vector<1x16xf32>
    %12 = arith.divf %10, %11 : vector<1x16xf32>
    %13 = vector.broadcast %12 : vector<1x16xf32> to vector<192x16xf32>
    %14 = arith.subf %8, %13 : vector<192x16xf32>
    %15 = arith.mulf %14, %14 : vector<192x16xf32>
    %cst_10 = arith.constant dense<0.000000e+00> : vector<16xf32>
    %16 = vector.multi_reduction <add>, %15, %cst_10 [0] : vector<192x16xf32> to vector<16xf32>
    %17 = vector.shape_cast %16 : vector<16xf32> to vector<1x16xf32>
    %cst_11 = arith.constant 1.920000e+02 : f32
    %18 = vector.broadcast %cst_11 : f32 to vector<1x16xf32>
    %19 = arith.divf %17, %18 : vector<1x16xf32>
    %20 = vector.broadcast %12 : vector<1x16xf32> to vector<192x16xf32>
    %21 = arith.subf %8, %20 : vector<192x16xf32>
    %cst_12 = arith.constant 9.99999974E-6 : f32
    %22 = vector.broadcast %cst_12 : f32 to vector<1x16xf32>
    %23 = arith.addf %19, %22 : vector<1x16xf32>
    %24 = math.rsqrt %23 : vector<1x16xf32>
    %25 = vector.broadcast %24 : vector<1x16xf32> to vector<192x16xf32>
    %26 = arith.mulf %21, %25 : vector<192x16xf32>
    %c0_13 = arith.constant 0 : index
    %c0_14 = arith.constant 0 : index
    %c0_15 = arith.constant 0 : index
    %27 = vector.load %arg4[%c0_13, %c0_14, %c0_15] : memref<1x1x16xf32, #tpu.memory_space<vmem>>, vector<1x1x16xf32>
    %28 = vector.shape_cast %27 : vector<1x1x16xf32> to vector<1x16xf32>
    %29 = vector.broadcast %28 : vector<1x16xf32> to vector<192x16xf32>
    %30 = arith.mulf %26, %29 : vector<192x16xf32>
    %c0_16 = arith.constant 0 : index
    %c0_17 = arith.constant 0 : index
    %c0_18 = arith.constant 0 : index
    %31 = vector.load %arg5[%c0_16, %c0_17, %c0_18] : memref<1x1x16xf32, #tpu.memory_space<vmem>>, vector<1x1x16xf32>
    %32 = vector.shape_cast %31 : vector<1x1x16xf32> to vector<1x16xf32>
    %33 = vector.broadcast %32 : vector<1x16xf32> to vector<192x16xf32>
    %34 = arith.addf %30, %33 : vector<192x16xf32>
    %cst_19 = arith.constant 0.000000e+00 : f32
    %35 = vector.broadcast %cst_19 : f32 to vector<192x16xf32>
    %36 = arith.cmpf oge, %34, %35 : vector<192x16xf32>
    %cst_20 = arith.constant 0.00999999977 : f32
    %37 = vector.broadcast %cst_20 : f32 to vector<192x16xf32>
    %38 = arith.mulf %37, %34 : vector<192x16xf32>
    %39 = arith.select %36, %34, %38 : vector<192x16xi1>, vector<192x16xf32>
    %c0_21 = arith.constant 0 : index
    %c0_22 = arith.constant 0 : index
    %c0_23 = arith.constant 0 : index
    %40 = vector.load %arg6[%c0_21, %c0_22, %c0_23] : memref<1x192x16xf32, #tpu.memory_space<vmem>>, vector<1x192x16xf32>
    %41 = vector.shape_cast %40 : vector<1x192x16xf32> to vector<192x16xf32>
    %42 = vector.shape_cast %39 : vector<192x16xf32> to vector<1x192x16xf32>
    tpu.vector_store %arg6[%c0_21, %c0_22, %c0_23], %42 {strides = array<i32>} : memref<1x192x16xf32, #tpu.memory_space<vmem>>, vector<1x192x16xf32>,
    return
  }
  func.func @transform_0(%arg0: i32) -> (i32, i32, i32) {
    %c0_i32 = arith.constant 0 : i32
    %c0_i32_0 = arith.constant 0 : i32
    %c0_i32_1 = arith.constant 0 : i32
    return %arg0, %c0_i32, %c0_i32_0 : i32, i32, i32
  }
  func.func @transform_1(%arg0: i32) -> (i32, i32, i32) {
    %c0_i32 = arith.constant 0 : i32
    %c0_i32_0 = arith.constant 0 : i32
    %c0_i32_1 = arith.constant 0 : i32
    return %arg0, %c0_i32, %c0_i32_0 : i32, i32, i32
  }
  func.func @transform_2(%arg0: i32) -> (i32, i32, i32) {
    %c0_i32 = arith.constant 0 : i32
    %c0_i32_0 = arith.constant 0 : i32
    %c0_i32_1 = arith.constant 0 : i32
    return %arg0, %c0_i32, %c0_i32_0 : i32, i32, i32
  }
  func.func @transform_3(%arg0: i32) -> (i32, i32, i32) {
    %c0_i32 = arith.constant 0 : i32
    %c0_i32_0 = arith.constant 0 : i32
    %c0_i32_1 = arith.constant 0 : i32
    %c0_i32_2 = arith.constant 0 : i32
    return %c0_i32, %c0_i32_0, %c0_i32_1 : i32, i32, i32
  }
  func.func @transform_4(%arg0: i32) -> (i32, i32, i32) {
    %c0_i32 = arith.constant 0 : i32
    %c0_i32_0 = arith.constant 0 : i32
    %c0_i32_1 = arith.constant 0 : i32
    %c0_i32_2 = arith.constant 0 : i32
    return %c0_i32, %c0_i32_0, %c0_i32_1 : i32, i32, i32
  }
  func.func @transform_5(%arg0: i32) -> (i32, i32, i32) {
    %c0_i32 = arith.constant 0 : i32
    %c0_i32_0 = arith.constant 0 : i32
    %c0_i32_1 = arith.constant 0 : i32
    return %arg0, %c0_i32, %c0_i32_0 : i32, i32, i32
  }
}

module attributes {stable_mosaic.version = 11 : i64} {
  func.func @_conv_bn_lrelu_kernel(%arg0: i32, %arg1: memref<1x176x48xbf16, #tpu.memory_space<vmem>>, %arg2: memref<1x48x16xbf16, #tpu.memory_space<vmem>>, %arg3: memref<1x1x16xf32, #tpu.memory_space<vmem>>, %arg4: memref<1x1x16xf32, #tpu.memory_space<vmem>>, %arg5: memref<1x1x16xf32, #tpu.memory_space<vmem>>, %arg6: memref<1x176x16xf32, #tpu.memory_space<vmem>>) attributes {dimension_semantics = [#tpu.dimension_semantics<parallel>], iteration_bounds = array<i64: 3>, scalar_prefetch = 0 : i64, scratch_operands = 0 : i64, tpu.core_type = #tpu.core_type<tc>, window_params = [{transform_indices = @transform_0, window_bounds = array<i64: 1, 176, 48>}, {pipeline_mode = #tpu.pipeline_mode<synchronous>, transform_indices = @transform_1, window_bounds = array<i64: 1, 48, 16>}, {pipeline_mode = #tpu.pipeline_mode<synchronous>, transform_indices = @transform_2, window_bounds = array<i64: 1, 1, 16>}, {pipeline_mode = #tpu.pipeline_mode<synchronous>, transform_indices = @transform_3, window_bounds = array<i64: 1, 1, 16>}, {pipeline_mode = #tpu.pipeline_mode<synchronous>, transform_indices = @transform_4, window_bounds = array<i64: 1, 1, 16>}, {transform_indices = @transform_5, window_bounds = array<i64: 1, 176, 16>}]} {
    %c0 = arith.constant 0 : index
    %c0_0 = arith.constant 0 : index
    %c0_1 = arith.constant 0 : index
    %0 = vector.load %arg1[%c0, %c0_0, %c0_1] : memref<1x176x48xbf16, #tpu.memory_space<vmem>>, vector<1x176x48xbf16>
    %1 = vector.shape_cast %0 : vector<1x176x48xbf16> to vector<176x48xbf16>
    %c0_2 = arith.constant 0 : index
    %c0_3 = arith.constant 0 : index
    %c0_4 = arith.constant 0 : index
    %2 = vector.load %arg2[%c0_2, %c0_3, %c0_4] : memref<1x48x16xbf16, #tpu.memory_space<vmem>>, vector<1x48x16xbf16>
    %3 = vector.shape_cast %2 : vector<1x48x16xbf16> to vector<48x16xbf16>
    %cst = arith.constant dense<0.000000e+00> : vector<176x16xf32>
    %4 = tpu.matmul %1, %3, %cst {dimension_numbers = #tpu.dot_dimension_numbers<[1], [0], [0], [1], [0, 0, 1, 1], [], []>} : vector<176x48xbf16>, vector<48x16xbf16>, vector<176x16xf32> -> vector<176x16xf32>
    %c0_5 = arith.constant 0 : index
    %c0_6 = arith.constant 0 : index
    %c0_7 = arith.constant 0 : index
    %5 = vector.load %arg3[%c0_5, %c0_6, %c0_7] : memref<1x1x16xf32, #tpu.memory_space<vmem>>, vector<1x1x16xf32>
    %6 = vector.shape_cast %5 : vector<1x1x16xf32> to vector<1x16xf32>
    %7 = vector.broadcast %6 : vector<1x16xf32> to vector<176x16xf32>
    %8 = arith.addf %4, %7 : vector<176x16xf32>
    %cst_8 = arith.constant dense<0.000000e+00> : vector<16xf32>
    %9 = vector.multi_reduction <add>, %8, %cst_8 [0] : vector<176x16xf32> to vector<16xf32>
    %10 = vector.shape_cast %9 : vector<16xf32> to vector<1x16xf32>
    %cst_9 = arith.constant 1.760000e+02 : f32
    %11 = vector.broadcast %cst_9 : f32 to vector<1x16xf32>
    %12 = arith.divf %10, %11 : vector<1x16xf32>
    %13 = vector.broadcast %12 : vector<1x16xf32> to vector<176x16xf32>
    %14 = arith.subf %8, %13 : vector<176x16xf32>
    %15 = arith.mulf %14, %14 : vector<176x16xf32>
    %cst_10 = arith.constant dense<0.000000e+00> : vector<16xf32>
    %16 = vector.multi_reduction <add>, %15, %cst_10 [0] : vector<176x16xf32> to vector<16xf32>
    %17 = vector.shape_cast %16 : vector<16xf32> to vector<1x16xf32>
    %cst_11 = arith.constant 1.760000e+02 : f32
    %18 = vector.broadcast %cst_11 : f32 to vector<1x16xf32>
    %19 = arith.divf %17, %18 : vector<1x16xf32>
    %20 = vector.broadcast %12 : vector<1x16xf32> to vector<176x16xf32>
    %21 = arith.subf %8, %20 : vector<176x16xf32>
    %cst_12 = arith.constant 9.99999974E-6 : f32
    %22 = vector.broadcast %cst_12 : f32 to vector<1x16xf32>
    %23 = arith.addf %19, %22 : vector<1x16xf32>
    %24 = math.rsqrt %23 : vector<1x16xf32>
    %25 = vector.broadcast %24 : vector<1x16xf32> to vector<176x16xf32>
    %26 = arith.mulf %21, %25 : vector<176x16xf32>
    %c0_13 = arith.constant 0 : index
    %c0_14 = arith.constant 0 : index
    %c0_15 = arith.constant 0 : index
    %27 = vector.load %arg4[%c0_13, %c0_14, %c0_15] : memref<1x1x16xf32, #tpu.memory_space<vmem>>, vector<1x1x16xf32>
    %28 = vector.shape_cast %27 : vector<1x1x16xf32> to vector<1x16xf32>
    %29 = vector.broadcast %28 : vector<1x16xf32> to vector<176x16xf32>
    %30 = arith.mulf %26, %29 : vector<176x16xf32>
    %c0_16 = arith.constant 0 : index
    %c0_17 = arith.constant 0 : index
    %c0_18 = arith.constant 0 : index
    %31 = vector.load %arg5[%c0_16, %c0_17, %c0_18] : memref<1x1x16xf32, #tpu.memory_space<vmem>>, vector<1x1x16xf32>
    %32 = vector.shape_cast %31 : vector<1x1x16xf32> to vector<1x16xf32>
    %33 = vector.broadcast %32 : vector<1x16xf32> to vector<176x16xf32>
    %34 = arith.addf %30, %33 : vector<176x16xf32>
    %cst_19 = arith.constant 0.000000e+00 : f32
    %35 = vector.broadcast %cst_19 : f32 to vector<176x16xf32>
    %36 = arith.cmpf oge, %34, %35 : vector<176x16xf32>
    %cst_20 = arith.constant 0.00999999977 : f32
    %37 = vector.broadcast %cst_20 : f32 to vector<176x16xf32>
    %38 = arith.mulf %37, %34 : vector<176x16xf32>
    %39 = arith.select %36, %34, %38 : vector<176x16xi1>, vector<176x16xf32>
    %c0_21 = arith.constant 0 : index
    %c0_22 = arith.constant 0 : index
    %c0_23 = arith.constant 0 : index
    %40 = vector.load %arg6[%c0_21, %c0_22, %c0_23] : memref<1x176x16xf32, #tpu.memory_space<vmem>>, vector<1x176x16xf32>
    %41 = vector.shape_cast %40 : vector<1x176x16xf32> to vector<176x16xf32>
    %42 = vector.shape_cast %39 : vector<176x16xf32> to vector<1x176x16xf32>
    tpu.vector_store %arg6[%c0_21, %c0_22, %c0_23], %42 {strides = array<i32>} : memref<1x176x16xf32, #tpu.memory_space<vmem>>, vector<1x176x16xf32>,
    return
  }
  func.func @transform_0(%arg0: i32) -> (i32, i32, i32) {
    %c0_i32 = arith.constant 0 : i32
    %c0_i32_0 = arith.constant 0 : i32
    %c0_i32_1 = arith.constant 0 : i32
    return %arg0, %c0_i32, %c0_i32_0 : i32, i32, i32
  }
  func.func @transform_1(%arg0: i32) -> (i32, i32, i32) {
    %c0_i32 = arith.constant 0 : i32
    %c0_i32_0 = arith.constant 0 : i32
    %c0_i32_1 = arith.constant 0 : i32
    %c0_i32_2 = arith.constant 0 : i32
    return %c0_i32, %c0_i32_0, %c0_i32_1 : i32, i32, i32
  }
  func.func @transform_2(%arg0: i32) -> (i32, i32, i32) {
    %c0_i32 = arith.constant 0 : i32
    %c0_i32_0 = arith.constant 0 : i32
    %c0_i32_1 = arith.constant 0 : i32
    %c0_i32_2 = arith.constant 0 : i32
    return %c0_i32, %c0_i32_0, %c0_i32_1 : i32, i32, i32
  }
  func.func @transform_3(%arg0: i32) -> (i32, i32, i32) {
    %c0_i32 = arith.constant 0 : i32
    %c0_i32_0 = arith.constant 0 : i32
    %c0_i32_1 = arith.constant 0 : i32
    %c0_i32_2 = arith.constant 0 : i32
    return %c0_i32, %c0_i32_0, %c0_i32_1 : i32, i32, i32
  }
  func.func @transform_4(%arg0: i32) -> (i32, i32, i32) {
    %c0_i32 = arith.constant 0 : i32
    %c0_i32_0 = arith.constant 0 : i32
    %c0_i32_1 = arith.constant 0 : i32
    %c0_i32_2 = arith.constant 0 : i32
    return %c0_i32, %c0_i32_0, %c0_i32_1 : i32, i32, i32
  }
  func.func @transform_5(%arg0: i32) -> (i32, i32, i32) {
    %c0_i32 = arith.constant 0 : i32
    %c0_i32_0 = arith.constant 0 : i32
    %c0_i32_1 = arith.constant 0 : i32
    return %arg0, %c0_i32, %c0_i32_0 : i32, i32, i32
  }
}

module attributes {stable_mosaic.version = 11 : i64} {
  func.func @_conv_bn_lrelu_mean_kernel(%arg0: i32, %arg1: memref<1x160x48xbf16, #tpu.memory_space<vmem>>, %arg2: memref<1x48x8xbf16, #tpu.memory_space<vmem>>, %arg3: memref<1x1x8xf32, #tpu.memory_space<vmem>>, %arg4: memref<1x1x8xf32, #tpu.memory_space<vmem>>, %arg5: memref<1x1x8xf32, #tpu.memory_space<vmem>>, %arg6: memref<8x160xf32, #tpu.memory_space<vmem>>, %arg7: memref<1x8x8xf32, #tpu.memory_space<vmem>>) attributes {dimension_semantics = [#tpu.dimension_semantics<parallel>], iteration_bounds = array<i64: 3>, scalar_prefetch = 0 : i64, scratch_operands = 0 : i64, tpu.core_type = #tpu.core_type<tc>, window_params = [{transform_indices = @transform_0, window_bounds = array<i64: 1, 160, 48>}, {pipeline_mode = #tpu.pipeline_mode<synchronous>, transform_indices = @transform_1, window_bounds = array<i64: 1, 48, 8>}, {pipeline_mode = #tpu.pipeline_mode<synchronous>, transform_indices = @transform_2, window_bounds = array<i64: 1, 1, 8>}, {pipeline_mode = #tpu.pipeline_mode<synchronous>, transform_indices = @transform_3, window_bounds = array<i64: 1, 1, 8>}, {pipeline_mode = #tpu.pipeline_mode<synchronous>, transform_indices = @transform_4, window_bounds = array<i64: 1, 1, 8>}, {pipeline_mode = #tpu.pipeline_mode<synchronous>, transform_indices = @transform_5, window_bounds = array<i64: 8, 160>}, {transform_indices = @transform_6, window_bounds = array<i64: 1, 8, 8>}]} {
    %c0 = arith.constant 0 : index
    %c0_0 = arith.constant 0 : index
    %c0_1 = arith.constant 0 : index
    %0 = vector.load %arg1[%c0, %c0_0, %c0_1] : memref<1x160x48xbf16, #tpu.memory_space<vmem>>, vector<1x160x48xbf16>
    %1 = vector.shape_cast %0 : vector<1x160x48xbf16> to vector<160x48xbf16>
    %c0_2 = arith.constant 0 : index
    %c0_3 = arith.constant 0 : index
    %c0_4 = arith.constant 0 : index
    %2 = vector.load %arg2[%c0_2, %c0_3, %c0_4] : memref<1x48x8xbf16, #tpu.memory_space<vmem>>, vector<1x48x8xbf16>
    %3 = vector.shape_cast %2 : vector<1x48x8xbf16> to vector<48x8xbf16>
    %cst = arith.constant dense<0.000000e+00> : vector<160x8xf32>
    %4 = tpu.matmul %1, %3, %cst {dimension_numbers = #tpu.dot_dimension_numbers<[1], [0], [0], [1], [0, 0, 1, 1], [], []>} : vector<160x48xbf16>, vector<48x8xbf16>, vector<160x8xf32> -> vector<160x8xf32>
    %c0_5 = arith.constant 0 : index
    %c0_6 = arith.constant 0 : index
    %c0_7 = arith.constant 0 : index
    %5 = vector.load %arg3[%c0_5, %c0_6, %c0_7] : memref<1x1x8xf32, #tpu.memory_space<vmem>>, vector<1x1x8xf32>
    %6 = vector.shape_cast %5 : vector<1x1x8xf32> to vector<1x8xf32>
    %7 = vector.broadcast %6 : vector<1x8xf32> to vector<160x8xf32>
    %8 = arith.addf %4, %7 : vector<160x8xf32>
    %cst_8 = arith.constant dense<0.000000e+00> : vector<8xf32>
    %9 = vector.multi_reduction <add>, %8, %cst_8 [0] : vector<160x8xf32> to vector<8xf32>
    %10 = vector.shape_cast %9 : vector<8xf32> to vector<1x8xf32>
    %cst_9 = arith.constant 1.600000e+02 : f32
    %11 = vector.broadcast %cst_9 : f32 to vector<1x8xf32>
    %12 = arith.divf %10, %11 : vector<1x8xf32>
    %13 = vector.broadcast %12 : vector<1x8xf32> to vector<160x8xf32>
    %14 = arith.subf %8, %13 : vector<160x8xf32>
    %15 = arith.mulf %14, %14 : vector<160x8xf32>
    %cst_10 = arith.constant dense<0.000000e+00> : vector<8xf32>
    %16 = vector.multi_reduction <add>, %15, %cst_10 [0] : vector<160x8xf32> to vector<8xf32>
    %17 = vector.shape_cast %16 : vector<8xf32> to vector<1x8xf32>
    %cst_11 = arith.constant 1.600000e+02 : f32
    %18 = vector.broadcast %cst_11 : f32 to vector<1x8xf32>
    %19 = arith.divf %17, %18 : vector<1x8xf32>
    %20 = vector.broadcast %12 : vector<1x8xf32> to vector<160x8xf32>
    %21 = arith.subf %8, %20 : vector<160x8xf32>
    %cst_12 = arith.constant 9.99999974E-6 : f32
    %22 = vector.broadcast %cst_12 : f32 to vector<1x8xf32>
    %23 = arith.addf %19, %22 : vector<1x8xf32>
    %24 = math.rsqrt %23 : vector<1x8xf32>
    %25 = vector.broadcast %24 : vector<1x8xf32> to vector<160x8xf32>
    %26 = arith.mulf %21, %25 : vector<160x8xf32>
    %c0_13 = arith.constant 0 : index
    %c0_14 = arith.constant 0 : index
    %c0_15 = arith.constant 0 : index
    %27 = vector.load %arg4[%c0_13, %c0_14, %c0_15] : memref<1x1x8xf32, #tpu.memory_space<vmem>>, vector<1x1x8xf32>
    %28 = vector.shape_cast %27 : vector<1x1x8xf32> to vector<1x8xf32>
    %29 = vector.broadcast %28 : vector<1x8xf32> to vector<160x8xf32>
    %30 = arith.mulf %26, %29 : vector<160x8xf32>
    %c0_16 = arith.constant 0 : index
    %c0_17 = arith.constant 0 : index
    %c0_18 = arith.constant 0 : index
    %31 = vector.load %arg5[%c0_16, %c0_17, %c0_18] : memref<1x1x8xf32, #tpu.memory_space<vmem>>, vector<1x1x8xf32>
    %32 = vector.shape_cast %31 : vector<1x1x8xf32> to vector<1x8xf32>
    %33 = vector.broadcast %32 : vector<1x8xf32> to vector<160x8xf32>
    %34 = arith.addf %30, %33 : vector<160x8xf32>
    %cst_19 = arith.constant 0.000000e+00 : f32
    %35 = vector.broadcast %cst_19 : f32 to vector<160x8xf32>
    %36 = arith.cmpf oge, %34, %35 : vector<160x8xf32>
    %cst_20 = arith.constant 0.00999999977 : f32
    %37 = vector.broadcast %cst_20 : f32 to vector<160x8xf32>
    %38 = arith.mulf %37, %34 : vector<160x8xf32>
    %39 = arith.select %36, %34, %38 : vector<160x8xi1>, vector<160x8xf32>
    %c0_21 = arith.constant 0 : index
    %c0_22 = arith.constant 0 : index
    %40 = vector.load %arg6[%c0_21, %c0_22] : memref<8x160xf32, #tpu.memory_space<vmem>>, vector<8x160xf32>
    %cst_23 = arith.constant dense<0.000000e+00> : vector<8x8xf32>
    %41 = tpu.matmul %40, %39, %cst_23 {dimension_numbers = #tpu.dot_dimension_numbers<[1], [0], [0], [1], [0, 0, 1, 1], [], []>} : vector<8x160xf32>, vector<160x8xf32>, vector<8x8xf32> -> vector<8x8xf32>
    %c0_24 = arith.constant 0 : index
    %c0_25 = arith.constant 0 : index
    %c0_26 = arith.constant 0 : index
    %42 = vector.load %arg7[%c0_24, %c0_25, %c0_26] : memref<1x8x8xf32, #tpu.memory_space<vmem>>, vector<1x8x8xf32>
    %43 = vector.shape_cast %42 : vector<1x8x8xf32> to vector<8x8xf32>
    %44 = vector.shape_cast %41 : vector<8x8xf32> to vector<1x8x8xf32>
    tpu.vector_store %arg7[%c0_24, %c0_25, %c0_26], %44 {strides = array<i32>} : memref<1x8x8xf32, #tpu.memory_space<vmem>>, vector<1x8x8xf32>,
    return
  }
  func.func @transform_0(%arg0: i32) -> (i32, i32, i32) {
    %c0_i32 = arith.constant 0 : i32
    %c0_i32_0 = arith.constant 0 : i32
    %c0_i32_1 = arith.constant 0 : i32
    return %arg0, %c0_i32, %c0_i32_0 : i32, i32, i32
  }
  func.func @transform_1(%arg0: i32) -> (i32, i32, i32) {
    %c0_i32 = arith.constant 0 : i32
    %c0_i32_0 = arith.constant 0 : i32
    %c0_i32_1 = arith.constant 0 : i32
    %c0_i32_2 = arith.constant 0 : i32
    return %c0_i32, %c0_i32_0, %c0_i32_1 : i32, i32, i32
  }
  func.func @transform_2(%arg0: i32) -> (i32, i32, i32) {
    %c0_i32 = arith.constant 0 : i32
    %c0_i32_0 = arith.constant 0 : i32
    %c0_i32_1 = arith.constant 0 : i32
    %c0_i32_2 = arith.constant 0 : i32
    return %c0_i32, %c0_i32_0, %c0_i32_1 : i32, i32, i32
  }
  func.func @transform_3(%arg0: i32) -> (i32, i32, i32) {
    %c0_i32 = arith.constant 0 : i32
    %c0_i32_0 = arith.constant 0 : i32
    %c0_i32_1 = arith.constant 0 : i32
    %c0_i32_2 = arith.constant 0 : i32
    return %c0_i32, %c0_i32_0, %c0_i32_1 : i32, i32, i32
  }
  func.func @transform_4(%arg0: i32) -> (i32, i32, i32) {
    %c0_i32 = arith.constant 0 : i32
    %c0_i32_0 = arith.constant 0 : i32
    %c0_i32_1 = arith.constant 0 : i32
    %c0_i32_2 = arith.constant 0 : i32
    return %c0_i32, %c0_i32_0, %c0_i32_1 : i32, i32, i32
  }
  func.func @transform_5(%arg0: i32) -> (i32, i32) {
    %c0_i32 = arith.constant 0 : i32
    %c0_i32_0 = arith.constant 0 : i32
    %c0_i32_1 = arith.constant 0 : i32
    return %c0_i32, %c0_i32_0 : i32, i32
  }
  func.func @transform_6(%arg0: i32) -> (i32, i32, i32) {
    %c0_i32 = arith.constant 0 : i32
    %c0_i32_0 = arith.constant 0 : i32
    %c0_i32_1 = arith.constant 0 : i32
    return %arg0, %c0_i32, %c0_i32_0 : i32, i32, i32
  }
}

module attributes {stable_mosaic.version = 11 : i64} {
  func.func @_lstm_mean_kernel(%arg0: memref<96x32xbf16, #tpu.memory_space<vmem>>, %arg1: memref<32x128xbf16, #tpu.memory_space<vmem>>, %arg2: memref<32x128xbf16, #tpu.memory_space<vmem>>, %arg3: memref<1x128xf32, #tpu.memory_space<vmem>>, %arg4: memref<8x32xf32, #tpu.memory_space<vmem>>) attributes {dimension_semantics = [], scalar_prefetch = 0 : i64, scratch_operands = 0 : i64, tpu.core_type = #tpu.core_type<tc>} {
    %c0 = arith.constant 0 : index
    %c0_0 = arith.constant 0 : index
    %0 = vector.load %arg0[%c0, %c0_0] : memref<96x32xbf16, #tpu.memory_space<vmem>>, vector<96x32xbf16>
    %c0_1 = arith.constant 0 : index
    %c0_2 = arith.constant 0 : index
    %1 = vector.load %arg1[%c0_1, %c0_2] : memref<32x128xbf16, #tpu.memory_space<vmem>>, vector<32x128xbf16>
    %cst = arith.constant dense<0.000000e+00> : vector<96x128xf32>
    %2 = tpu.matmul %0, %1, %cst {dimension_numbers = #tpu.dot_dimension_numbers<[1], [0], [0], [1], [0, 0, 1, 1], [], []>} : vector<96x32xbf16>, vector<32x128xbf16>, vector<96x128xf32> -> vector<96x128xf32>
    %c0_3 = arith.constant 0 : index
    %c0_4 = arith.constant 0 : index
    %3 = vector.load %arg3[%c0_3, %c0_4] : memref<1x128xf32, #tpu.memory_space<vmem>>, vector<1x128xf32>
    %4 = vector.broadcast %3 : vector<1x128xf32> to vector<96x128xf32>
    %5 = arith.addf %2, %4 : vector<96x128xf32>
    %c0_5 = arith.constant 0 : index
    %c0_6 = arith.constant 0 : index
    %6 = vector.load %arg2[%c0_5, %c0_6] : memref<32x128xbf16, #tpu.memory_space<vmem>>, vector<32x128xbf16>
    %cst_7 = arith.constant 0.000000e+00 : f32
    %7 = vector.broadcast %cst_7 : f32 to vector<12x32xf32>
    %cst_8 = arith.constant 0.000000e+00 : f32
    %8 = vector.broadcast %cst_8 : f32 to vector<12x32xf32>
    %9 = vector.extract_strided_slice %5 {offsets = [0, 0], sizes = [12, 128], strides = [1, 1]} : vector<96x128xf32> to vector<12x128xf32>
    %10 = arith.truncf %7 : vector<12x32xf32> to vector<12x32xbf16>
    %cst_9 = arith.constant dense<0.000000e+00> : vector<12x128xf32>
    %11 = tpu.matmul %10, %6, %cst_9 {dimension_numbers = #tpu.dot_dimension_numbers<[1], [0], [0], [1], [0, 0, 1, 1], [], []>} : vector<12x32xbf16>, vector<32x128xbf16>, vector<12x128xf32> -> vector<12x128xf32>
    %12 = arith.addf %9, %11 : vector<12x128xf32>
    %13 = vector.extract_strided_slice %12 {offsets = [0, 0], sizes = [12, 32], strides = [1, 1]} : vector<12x128xf32> to vector<12x32xf32>
    %14 = arith.negf %13 : vector<12x32xf32>
    %15 = math.exp %14 : vector<12x32xf32>
    %cst_10 = arith.constant 1.000000e+00 : f32
    %16 = vector.broadcast %cst_10 : f32 to vector<12x32xf32>
    %17 = arith.addf %16, %15 : vector<12x32xf32>
    %18 = arith.divf %16, %17 : vector<12x32xf32>
    %19 = vector.extract_strided_slice %12 {offsets = [0, 32], sizes = [12, 32], strides = [1, 1]} : vector<12x128xf32> to vector<12x32xf32>
    %20 = arith.negf %19 : vector<12x32xf32>
    %21 = math.exp %20 : vector<12x32xf32>
    %cst_11 = arith.constant 1.000000e+00 : f32
    %22 = vector.broadcast %cst_11 : f32 to vector<12x32xf32>
    %23 = arith.addf %22, %21 : vector<12x32xf32>
    %24 = arith.divf %22, %23 : vector<12x32xf32>
    %25 = vector.extract_strided_slice %12 {offsets = [0, 64], sizes = [12, 32], strides = [1, 1]} : vector<12x128xf32> to vector<12x32xf32>
    %26 = math.tanh %25 : vector<12x32xf32>
    %27 = vector.extract_strided_slice %12 {offsets = [0, 96], sizes = [12, 32], strides = [1, 1]} : vector<12x128xf32> to vector<12x32xf32>
    %28 = arith.negf %27 : vector<12x32xf32>
    %29 = math.exp %28 : vector<12x32xf32>
    %cst_12 = arith.constant 1.000000e+00 : f32
    %30 = vector.broadcast %cst_12 : f32 to vector<12x32xf32>
    %31 = arith.addf %30, %29 : vector<12x32xf32>
    %32 = arith.divf %30, %31 : vector<12x32xf32>
    %33 = arith.mulf %24, %8 : vector<12x32xf32>
    %34 = arith.mulf %18, %26 : vector<12x32xf32>
    %35 = arith.addf %33, %34 : vector<12x32xf32>
    %36 = math.tanh %35 : vector<12x32xf32>
    %37 = arith.mulf %32, %36 : vector<12x32xf32>
    %cst_13 = arith.constant dense<0.000000e+00> : vector<32xf32>
    %38 = vector.multi_reduction <add>, %37, %cst_13 [0] : vector<12x32xf32> to vector<32xf32>
    %39 = vector.shape_cast %38 : vector<32xf32> to vector<1x32xf32>
    %cst_14 = arith.constant 1.200000e+01 : f32
    %40 = vector.broadcast %cst_14 : f32 to vector<1x32xf32>
    %41 = arith.divf %39, %40 : vector<1x32xf32>
    %42 = vector.extract_strided_slice %5 {offsets = [12, 0], sizes = [12, 128], strides = [1, 1]} : vector<96x128xf32> to vector<12x128xf32>
    %43 = arith.truncf %37 : vector<12x32xf32> to vector<12x32xbf16>
    %cst_15 = arith.constant dense<0.000000e+00> : vector<12x128xf32>
    %44 = tpu.matmul %43, %6, %cst_15 {dimension_numbers = #tpu.dot_dimension_numbers<[1], [0], [0], [1], [0, 0, 1, 1], [], []>} : vector<12x32xbf16>, vector<32x128xbf16>, vector<12x128xf32> -> vector<12x128xf32>
    %45 = arith.addf %42, %44 : vector<12x128xf32>
    %46 = vector.extract_strided_slice %45 {offsets = [0, 0], sizes = [12, 32], strides = [1, 1]} : vector<12x128xf32> to vector<12x32xf32>
    %47 = arith.negf %46 : vector<12x32xf32>
    %48 = math.exp %47 : vector<12x32xf32>
    %cst_16 = arith.constant 1.000000e+00 : f32
    %49 = vector.broadcast %cst_16 : f32 to vector<12x32xf32>
    %50 = arith.addf %49, %48 : vector<12x32xf32>
    %51 = arith.divf %49, %50 : vector<12x32xf32>
    %52 = vector.extract_strided_slice %45 {offsets = [0, 32], sizes = [12, 32], strides = [1, 1]} : vector<12x128xf32> to vector<12x32xf32>
    %53 = arith.negf %52 : vector<12x32xf32>
    %54 = math.exp %53 : vector<12x32xf32>
    %cst_17 = arith.constant 1.000000e+00 : f32
    %55 = vector.broadcast %cst_17 : f32 to vector<12x32xf32>
    %56 = arith.addf %55, %54 : vector<12x32xf32>
    %57 = arith.divf %55, %56 : vector<12x32xf32>
    %58 = vector.extract_strided_slice %45 {offsets = [0, 64], sizes = [12, 32], strides = [1, 1]} : vector<12x128xf32> to vector<12x32xf32>
    %59 = math.tanh %58 : vector<12x32xf32>
    %60 = vector.extract_strided_slice %45 {offsets = [0, 96], sizes = [12, 32], strides = [1, 1]} : vector<12x128xf32> to vector<12x32xf32>
    %61 = arith.negf %60 : vector<12x32xf32>
    %62 = math.exp %61 : vector<12x32xf32>
    %cst_18 = arith.constant 1.000000e+00 : f32
    %63 = vector.broadcast %cst_18 : f32 to vector<12x32xf32>
    %64 = arith.addf %63, %62 : vector<12x32xf32>
    %65 = arith.divf %63, %64 : vector<12x32xf32>
    %66 = arith.mulf %57, %35 : vector<12x32xf32>
    %67 = arith.mulf %51, %59 : vector<12x32xf32>
    %68 = arith.addf %66, %67 : vector<12x32xf32>
    %69 = math.tanh %68 : vector<12x32xf32>
    %70 = arith.mulf %65, %69 : vector<12x32xf32>
    %cst_19 = arith.constant dense<0.000000e+00> : vector<32xf32>
    %71 = vector.multi_reduction <add>, %70, %cst_19 [0] : vector<12x32xf32> to vector<32xf32>
    %72 = vector.shape_cast %71 : vector<32xf32> to vector<1x32xf32>
    %cst_20 = arith.constant 1.200000e+01 : f32
    %73 = vector.broadcast %cst_20 : f32 to vector<1x32xf32>
    %74 = arith.divf %72, %73 : vector<1x32xf32>
    %75 = vector.extract_strided_slice %5 {offsets = [24, 0], sizes = [12, 128], strides = [1, 1]} : vector<96x128xf32> to vector<12x128xf32>
    %76 = arith.truncf %70 : vector<12x32xf32> to vector<12x32xbf16>
    %cst_21 = arith.constant dense<0.000000e+00> : vector<12x128xf32>
    %77 = tpu.matmul %76, %6, %cst_21 {dimension_numbers = #tpu.dot_dimension_numbers<[1], [0], [0], [1], [0, 0, 1, 1], [], []>} : vector<12x32xbf16>, vector<32x128xbf16>, vector<12x128xf32> -> vector<12x128xf32>
    %78 = arith.addf %75, %77 : vector<12x128xf32>
    %79 = vector.extract_strided_slice %78 {offsets = [0, 0], sizes = [12, 32], strides = [1, 1]} : vector<12x128xf32> to vector<12x32xf32>
    %80 = arith.negf %79 : vector<12x32xf32>
    %81 = math.exp %80 : vector<12x32xf32>
    %cst_22 = arith.constant 1.000000e+00 : f32
    %82 = vector.broadcast %cst_22 : f32 to vector<12x32xf32>
    %83 = arith.addf %82, %81 : vector<12x32xf32>
    %84 = arith.divf %82, %83 : vector<12x32xf32>
    %85 = vector.extract_strided_slice %78 {offsets = [0, 32], sizes = [12, 32], strides = [1, 1]} : vector<12x128xf32> to vector<12x32xf32>
    %86 = arith.negf %85 : vector<12x32xf32>
    %87 = math.exp %86 : vector<12x32xf32>
    %cst_23 = arith.constant 1.000000e+00 : f32
    %88 = vector.broadcast %cst_23 : f32 to vector<12x32xf32>
    %89 = arith.addf %88, %87 : vector<12x32xf32>
    %90 = arith.divf %88, %89 : vector<12x32xf32>
    %91 = vector.extract_strided_slice %78 {offsets = [0, 64], sizes = [12, 32], strides = [1, 1]} : vector<12x128xf32> to vector<12x32xf32>
    %92 = math.tanh %91 : vector<12x32xf32>
    %93 = vector.extract_strided_slice %78 {offsets = [0, 96], sizes = [12, 32], strides = [1, 1]} : vector<12x128xf32> to vector<12x32xf32>
    %94 = arith.negf %93 : vector<12x32xf32>
    %95 = math.exp %94 : vector<12x32xf32>
    %cst_24 = arith.constant 1.000000e+00 : f32
    %96 = vector.broadcast %cst_24 : f32 to vector<12x32xf32>
    %97 = arith.addf %96, %95 : vector<12x32xf32>
    %98 = arith.divf %96, %97 : vector<12x32xf32>
    %99 = arith.mulf %90, %68 : vector<12x32xf32>
    %100 = arith.mulf %84, %92 : vector<12x32xf32>
    %101 = arith.addf %99, %100 : vector<12x32xf32>
    %102 = math.tanh %101 : vector<12x32xf32>
    %103 = arith.mulf %98, %102 : vector<12x32xf32>
    %cst_25 = arith.constant dense<0.000000e+00> : vector<32xf32>
    %104 = vector.multi_reduction <add>, %103, %cst_25 [0] : vector<12x32xf32> to vector<32xf32>
    %105 = vector.shape_cast %104 : vector<32xf32> to vector<1x32xf32>
    %cst_26 = arith.constant 1.200000e+01 : f32
    %106 = vector.broadcast %cst_26 : f32 to vector<1x32xf32>
    %107 = arith.divf %105, %106 : vector<1x32xf32>
    %108 = vector.extract_strided_slice %5 {offsets = [36, 0], sizes = [12, 128], strides = [1, 1]} : vector<96x128xf32> to vector<12x128xf32>
    %109 = arith.truncf %103 : vector<12x32xf32> to vector<12x32xbf16>
    %cst_27 = arith.constant dense<0.000000e+00> : vector<12x128xf32>
    %110 = tpu.matmul %109, %6, %cst_27 {dimension_numbers = #tpu.dot_dimension_numbers<[1], [0], [0], [1], [0, 0, 1, 1], [], []>} : vector<12x32xbf16>, vector<32x128xbf16>, vector<12x128xf32> -> vector<12x128xf32>
    %111 = arith.addf %108, %110 : vector<12x128xf32>
    %112 = vector.extract_strided_slice %111 {offsets = [0, 0], sizes = [12, 32], strides = [1, 1]} : vector<12x128xf32> to vector<12x32xf32>
    %113 = arith.negf %112 : vector<12x32xf32>
    %114 = math.exp %113 : vector<12x32xf32>
    %cst_28 = arith.constant 1.000000e+00 : f32
    %115 = vector.broadcast %cst_28 : f32 to vector<12x32xf32>
    %116 = arith.addf %115, %114 : vector<12x32xf32>
    %117 = arith.divf %115, %116 : vector<12x32xf32>
    %118 = vector.extract_strided_slice %111 {offsets = [0, 32], sizes = [12, 32], strides = [1, 1]} : vector<12x128xf32> to vector<12x32xf32>
    %119 = arith.negf %118 : vector<12x32xf32>
    %120 = math.exp %119 : vector<12x32xf32>
    %cst_29 = arith.constant 1.000000e+00 : f32
    %121 = vector.broadcast %cst_29 : f32 to vector<12x32xf32>
    %122 = arith.addf %121, %120 : vector<12x32xf32>
    %123 = arith.divf %121, %122 : vector<12x32xf32>
    %124 = vector.extract_strided_slice %111 {offsets = [0, 64], sizes = [12, 32], strides = [1, 1]} : vector<12x128xf32> to vector<12x32xf32>
    %125 = math.tanh %124 : vector<12x32xf32>
    %126 = vector.extract_strided_slice %111 {offsets = [0, 96], sizes = [12, 32], strides = [1, 1]} : vector<12x128xf32> to vector<12x32xf32>
    %127 = arith.negf %126 : vector<12x32xf32>
    %128 = math.exp %127 : vector<12x32xf32>
    %cst_30 = arith.constant 1.000000e+00 : f32
    %129 = vector.broadcast %cst_30 : f32 to vector<12x32xf32>
    %130 = arith.addf %129, %128 : vector<12x32xf32>
    %131 = arith.divf %129, %130 : vector<12x32xf32>
    %132 = arith.mulf %123, %101 : vector<12x32xf32>
    %133 = arith.mulf %117, %125 : vector<12x32xf32>
    %134 = arith.addf %132, %133 : vector<12x32xf32>
    %135 = math.tanh %134 : vector<12x32xf32>
    %136 = arith.mulf %131, %135 : vector<12x32xf32>
    %cst_31 = arith.constant dense<0.000000e+00> : vector<32xf32>
    %137 = vector.multi_reduction <add>, %136, %cst_31 [0] : vector<12x32xf32> to vector<32xf32>
    %138 = vector.shape_cast %137 : vector<32xf32> to vector<1x32xf32>
    %cst_32 = arith.constant 1.200000e+01 : f32
    %139 = vector.broadcast %cst_32 : f32 to vector<1x32xf32>
    %140 = arith.divf %138, %139 : vector<1x32xf32>
    %141 = vector.extract_strided_slice %5 {offsets = [48, 0], sizes = [12, 128], strides = [1, 1]} : vector<96x128xf32> to vector<12x128xf32>
    %142 = arith.truncf %136 : vector<12x32xf32> to vector<12x32xbf16>
    %cst_33 = arith.constant dense<0.000000e+00> : vector<12x128xf32>
    %143 = tpu.matmul %142, %6, %cst_33 {dimension_numbers = #tpu.dot_dimension_numbers<[1], [0], [0], [1], [0, 0, 1, 1], [], []>} : vector<12x32xbf16>, vector<32x128xbf16>, vector<12x128xf32> -> vector<12x128xf32>
    %144 = arith.addf %141, %143 : vector<12x128xf32>
    %145 = vector.extract_strided_slice %144 {offsets = [0, 0], sizes = [12, 32], strides = [1, 1]} : vector<12x128xf32> to vector<12x32xf32>
    %146 = arith.negf %145 : vector<12x32xf32>
    %147 = math.exp %146 : vector<12x32xf32>
    %cst_34 = arith.constant 1.000000e+00 : f32
    %148 = vector.broadcast %cst_34 : f32 to vector<12x32xf32>
    %149 = arith.addf %148, %147 : vector<12x32xf32>
    %150 = arith.divf %148, %149 : vector<12x32xf32>
    %151 = vector.extract_strided_slice %144 {offsets = [0, 32], sizes = [12, 32], strides = [1, 1]} : vector<12x128xf32> to vector<12x32xf32>
    %152 = arith.negf %151 : vector<12x32xf32>
    %153 = math.exp %152 : vector<12x32xf32>
    %cst_35 = arith.constant 1.000000e+00 : f32
    %154 = vector.broadcast %cst_35 : f32 to vector<12x32xf32>
    %155 = arith.addf %154, %153 : vector<12x32xf32>
    %156 = arith.divf %154, %155 : vector<12x32xf32>
    %157 = vector.extract_strided_slice %144 {offsets = [0, 64], sizes = [12, 32], strides = [1, 1]} : vector<12x128xf32> to vector<12x32xf32>
    %158 = math.tanh %157 : vector<12x32xf32>
    %159 = vector.extract_strided_slice %144 {offsets = [0, 96], sizes = [12, 32], strides = [1, 1]} : vector<12x128xf32> to vector<12x32xf32>
    %160 = arith.negf %159 : vector<12x32xf32>
    %161 = math.exp %160 : vector<12x32xf32>
    %cst_36 = arith.constant 1.000000e+00 : f32
    %162 = vector.broadcast %cst_36 : f32 to vector<12x32xf32>
    %163 = arith.addf %162, %161 : vector<12x32xf32>
    %164 = arith.divf %162, %163 : vector<12x32xf32>
    %165 = arith.mulf %156, %134 : vector<12x32xf32>
    %166 = arith.mulf %150, %158 : vector<12x32xf32>
    %167 = arith.addf %165, %166 : vector<12x32xf32>
    %168 = math.tanh %167 : vector<12x32xf32>
    %169 = arith.mulf %164, %168 : vector<12x32xf32>
    %cst_37 = arith.constant dense<0.000000e+00> : vector<32xf32>
    %170 = vector.multi_reduction <add>, %169, %cst_37 [0] : vector<12x32xf32> to vector<32xf32>
    %171 = vector.shape_cast %170 : vector<32xf32> to vector<1x32xf32>
    %cst_38 = arith.constant 1.200000e+01 : f32
    %172 = vector.broadcast %cst_38 : f32 to vector<1x32xf32>
    %173 = arith.divf %171, %172 : vector<1x32xf32>
    %174 = vector.extract_strided_slice %5 {offsets = [60, 0], sizes = [12, 128], strides = [1, 1]} : vector<96x128xf32> to vector<12x128xf32>
    %175 = arith.truncf %169 : vector<12x32xf32> to vector<12x32xbf16>
    %cst_39 = arith.constant dense<0.000000e+00> : vector<12x128xf32>
    %176 = tpu.matmul %175, %6, %cst_39 {dimension_numbers = #tpu.dot_dimension_numbers<[1], [0], [0], [1], [0, 0, 1, 1], [], []>} : vector<12x32xbf16>, vector<32x128xbf16>, vector<12x128xf32> -> vector<12x128xf32>
    %177 = arith.addf %174, %176 : vector<12x128xf32>
    %178 = vector.extract_strided_slice %177 {offsets = [0, 0], sizes = [12, 32], strides = [1, 1]} : vector<12x128xf32> to vector<12x32xf32>
    %179 = arith.negf %178 : vector<12x32xf32>
    %180 = math.exp %179 : vector<12x32xf32>
    %cst_40 = arith.constant 1.000000e+00 : f32
    %181 = vector.broadcast %cst_40 : f32 to vector<12x32xf32>
    %182 = arith.addf %181, %180 : vector<12x32xf32>
    %183 = arith.divf %181, %182 : vector<12x32xf32>
    %184 = vector.extract_strided_slice %177 {offsets = [0, 32], sizes = [12, 32], strides = [1, 1]} : vector<12x128xf32> to vector<12x32xf32>
    %185 = arith.negf %184 : vector<12x32xf32>
    %186 = math.exp %185 : vector<12x32xf32>
    %cst_41 = arith.constant 1.000000e+00 : f32
    %187 = vector.broadcast %cst_41 : f32 to vector<12x32xf32>
    %188 = arith.addf %187, %186 : vector<12x32xf32>
    %189 = arith.divf %187, %188 : vector<12x32xf32>
    %190 = vector.extract_strided_slice %177 {offsets = [0, 64], sizes = [12, 32], strides = [1, 1]} : vector<12x128xf32> to vector<12x32xf32>
    %191 = math.tanh %190 : vector<12x32xf32>
    %192 = vector.extract_strided_slice %177 {offsets = [0, 96], sizes = [12, 32], strides = [1, 1]} : vector<12x128xf32> to vector<12x32xf32>
    %193 = arith.negf %192 : vector<12x32xf32>
    %194 = math.exp %193 : vector<12x32xf32>
    %cst_42 = arith.constant 1.000000e+00 : f32
    %195 = vector.broadcast %cst_42 : f32 to vector<12x32xf32>
    %196 = arith.addf %195, %194 : vector<12x32xf32>
    %197 = arith.divf %195, %196 : vector<12x32xf32>
    %198 = arith.mulf %189, %167 : vector<12x32xf32>
    %199 = arith.mulf %183, %191 : vector<12x32xf32>
    %200 = arith.addf %198, %199 : vector<12x32xf32>
    %201 = math.tanh %200 : vector<12x32xf32>
    %202 = arith.mulf %197, %201 : vector<12x32xf32>
    %cst_43 = arith.constant dense<0.000000e+00> : vector<32xf32>
    %203 = vector.multi_reduction <add>, %202, %cst_43 [0] : vector<12x32xf32> to vector<32xf32>
    %204 = vector.shape_cast %203 : vector<32xf32> to vector<1x32xf32>
    %cst_44 = arith.constant 1.200000e+01 : f32
    %205 = vector.broadcast %cst_44 : f32 to vector<1x32xf32>
    %206 = arith.divf %204, %205 : vector<1x32xf32>
    %207 = vector.extract_strided_slice %5 {offsets = [72, 0], sizes = [12, 128], strides = [1, 1]} : vector<96x128xf32> to vector<12x128xf32>
    %208 = arith.truncf %202 : vector<12x32xf32> to vector<12x32xbf16>
    %cst_45 = arith.constant dense<0.000000e+00> : vector<12x128xf32>
    %209 = tpu.matmul %208, %6, %cst_45 {dimension_numbers = #tpu.dot_dimension_numbers<[1], [0], [0], [1], [0, 0, 1, 1], [], []>} : vector<12x32xbf16>, vector<32x128xbf16>, vector<12x128xf32> -> vector<12x128xf32>
    %210 = arith.addf %207, %209 : vector<12x128xf32>
    %211 = vector.extract_strided_slice %210 {offsets = [0, 0], sizes = [12, 32], strides = [1, 1]} : vector<12x128xf32> to vector<12x32xf32>
    %212 = arith.negf %211 : vector<12x32xf32>
    %213 = math.exp %212 : vector<12x32xf32>
    %cst_46 = arith.constant 1.000000e+00 : f32
    %214 = vector.broadcast %cst_46 : f32 to vector<12x32xf32>
    %215 = arith.addf %214, %213 : vector<12x32xf32>
    %216 = arith.divf %214, %215 : vector<12x32xf32>
    %217 = vector.extract_strided_slice %210 {offsets = [0, 32], sizes = [12, 32], strides = [1, 1]} : vector<12x128xf32> to vector<12x32xf32>
    %218 = arith.negf %217 : vector<12x32xf32>
    %219 = math.exp %218 : vector<12x32xf32>
    %cst_47 = arith.constant 1.000000e+00 : f32
    %220 = vector.broadcast %cst_47 : f32 to vector<12x32xf32>
    %221 = arith.addf %220, %219 : vector<12x32xf32>
    %222 = arith.divf %220, %221 : vector<12x32xf32>
    %223 = vector.extract_strided_slice %210 {offsets = [0, 64], sizes = [12, 32], strides = [1, 1]} : vector<12x128xf32> to vector<12x32xf32>
    %224 = math.tanh %223 : vector<12x32xf32>
    %225 = vector.extract_strided_slice %210 {offsets = [0, 96], sizes = [12, 32], strides = [1, 1]} : vector<12x128xf32> to vector<12x32xf32>
    %226 = arith.negf %225 : vector<12x32xf32>
    %227 = math.exp %226 : vector<12x32xf32>
    %cst_48 = arith.constant 1.000000e+00 : f32
    %228 = vector.broadcast %cst_48 : f32 to vector<12x32xf32>
    %229 = arith.addf %228, %227 : vector<12x32xf32>
    %230 = arith.divf %228, %229 : vector<12x32xf32>
    %231 = arith.mulf %222, %200 : vector<12x32xf32>
    %232 = arith.mulf %216, %224 : vector<12x32xf32>
    %233 = arith.addf %231, %232 : vector<12x32xf32>
    %234 = math.tanh %233 : vector<12x32xf32>
    %235 = arith.mulf %230, %234 : vector<12x32xf32>
    %cst_49 = arith.constant dense<0.000000e+00> : vector<32xf32>
    %236 = vector.multi_reduction <add>, %235, %cst_49 [0] : vector<12x32xf32> to vector<32xf32>
    %237 = vector.shape_cast %236 : vector<32xf32> to vector<1x32xf32>
    %cst_50 = arith.constant 1.200000e+01 : f32
    %238 = vector.broadcast %cst_50 : f32 to vector<1x32xf32>
    %239 = arith.divf %237, %238 : vector<1x32xf32>
    %240 = vector.extract_strided_slice %5 {offsets = [84, 0], sizes = [12, 128], strides = [1, 1]} : vector<96x128xf32> to vector<12x128xf32>
    %241 = arith.truncf %235 : vector<12x32xf32> to vector<12x32xbf16>
    %cst_51 = arith.constant dense<0.000000e+00> : vector<12x128xf32>
    %242 = tpu.matmul %241, %6, %cst_51 {dimension_numbers = #tpu.dot_dimension_numbers<[1], [0], [0], [1], [0, 0, 1, 1], [], []>} : vector<12x32xbf16>, vector<32x128xbf16>, vector<12x128xf32> -> vector<12x128xf32>
    %243 = arith.addf %240, %242 : vector<12x128xf32>
    %244 = vector.extract_strided_slice %243 {offsets = [0, 0], sizes = [12, 32], strides = [1, 1]} : vector<12x128xf32> to vector<12x32xf32>
    %245 = arith.negf %244 : vector<12x32xf32>
    %246 = math.exp %245 : vector<12x32xf32>
    %cst_52 = arith.constant 1.000000e+00 : f32
    %247 = vector.broadcast %cst_52 : f32 to vector<12x32xf32>
    %248 = arith.addf %247, %246 : vector<12x32xf32>
    %249 = arith.divf %247, %248 : vector<12x32xf32>
    %250 = vector.extract_strided_slice %243 {offsets = [0, 32], sizes = [12, 32], strides = [1, 1]} : vector<12x128xf32> to vector<12x32xf32>
    %251 = arith.negf %250 : vector<12x32xf32>
    %252 = math.exp %251 : vector<12x32xf32>
    %cst_53 = arith.constant 1.000000e+00 : f32
    %253 = vector.broadcast %cst_53 : f32 to vector<12x32xf32>
    %254 = arith.addf %253, %252 : vector<12x32xf32>
    %255 = arith.divf %253, %254 : vector<12x32xf32>
    %256 = vector.extract_strided_slice %243 {offsets = [0, 64], sizes = [12, 32], strides = [1, 1]} : vector<12x128xf32> to vector<12x32xf32>
    %257 = math.tanh %256 : vector<12x32xf32>
    %258 = vector.extract_strided_slice %243 {offsets = [0, 96], sizes = [12, 32], strides = [1, 1]} : vector<12x128xf32> to vector<12x32xf32>
    %259 = arith.negf %258 : vector<12x32xf32>
    %260 = math.exp %259 : vector<12x32xf32>
    %cst_54 = arith.constant 1.000000e+00 : f32
    %261 = vector.broadcast %cst_54 : f32 to vector<12x32xf32>
    %262 = arith.addf %261, %260 : vector<12x32xf32>
    %263 = arith.divf %261, %262 : vector<12x32xf32>
    %264 = arith.mulf %255, %233 : vector<12x32xf32>
    %265 = arith.mulf %249, %257 : vector<12x32xf32>
    %266 = arith.addf %264, %265 : vector<12x32xf32>
    %267 = math.tanh %266 : vector<12x32xf32>
    %268 = arith.mulf %263, %267 : vector<12x32xf32>
    %cst_55 = arith.constant dense<0.000000e+00> : vector<32xf32>
    %269 = vector.multi_reduction <add>, %268, %cst_55 [0] : vector<12x32xf32> to vector<32xf32>
    %270 = vector.shape_cast %269 : vector<32xf32> to vector<1x32xf32>
    %cst_56 = arith.constant 1.200000e+01 : f32
    %271 = vector.broadcast %cst_56 : f32 to vector<1x32xf32>
    %272 = arith.divf %270, %271 : vector<1x32xf32>
    %273 = tpu.concatenate %41, %74, %107, %140, %173, %206, %239, %272 in 0 : vector<1x32xf32>, vector<1x32xf32>, vector<1x32xf32>, vector<1x32xf32>, vector<1x32xf32>, vector<1x32xf32>, vector<1x32xf32>, vector<1x32xf32> -> vector<8x32xf32>
    %c0_57 = arith.constant 0 : index
    %c0_58 = arith.constant 0 : index
    %274 = vector.load %arg4[%c0_57, %c0_58] : memref<8x32xf32, #tpu.memory_space<vmem>>, vector<8x32xf32>
    tpu.vector_store %arg4[%c0_57, %c0_58], %273 {strides = array<i32>} : memref<8x32xf32, #tpu.memory_space<vmem>>, vector<8x32xf32>,
    return
  }
}

module attributes {stable_mosaic.version = 11 : i64} {
  func.func @_head_kernel(%arg0: memref<8x56xf32, #tpu.memory_space<vmem>>, %arg1: memref<56x64xbf16, #tpu.memory_space<vmem>>, %arg2: memref<1x64xf32, #tpu.memory_space<vmem>>, %arg3: memref<1x64xf32, #tpu.memory_space<vmem>>, %arg4: memref<1x64xf32, #tpu.memory_space<vmem>>, %arg5: memref<64x32xbf16, #tpu.memory_space<vmem>>, %arg6: memref<1x32xf32, #tpu.memory_space<vmem>>, %arg7: memref<8x3xf32, #tpu.memory_space<vmem>>, %arg8: memref<3x32x128xbf16, #tpu.memory_space<vmem>>, %arg9: memref<3x1x128xf32, #tpu.memory_space<vmem>>, %arg10: memref<3x1x128xf32, #tpu.memory_space<vmem>>, %arg11: memref<3x1x1xf32, #tpu.memory_space<vmem>>, %arg12: memref<8x3xf32, #tpu.memory_space<vmem>>) attributes {dimension_semantics = [], scalar_prefetch = 0 : i64, scratch_operands = 0 : i64, tpu.core_type = #tpu.core_type<tc>} {
    %c0 = arith.constant 0 : index
    %c0_0 = arith.constant 0 : index
    %0 = vector.load %arg0[%c0, %c0_0] : memref<8x56xf32, #tpu.memory_space<vmem>>, vector<8x56xf32>
    %1 = arith.truncf %0 : vector<8x56xf32> to vector<8x56xbf16>
    %c0_1 = arith.constant 0 : index
    %c0_2 = arith.constant 0 : index
    %2 = vector.load %arg1[%c0_1, %c0_2] : memref<56x64xbf16, #tpu.memory_space<vmem>>, vector<56x64xbf16>
    %cst = arith.constant dense<0.000000e+00> : vector<8x64xf32>
    %3 = tpu.matmul %1, %2, %cst {dimension_numbers = #tpu.dot_dimension_numbers<[1], [0], [0], [1], [0, 0, 1, 1], [], []>} : vector<8x56xbf16>, vector<56x64xbf16>, vector<8x64xf32> -> vector<8x64xf32>
    %c0_3 = arith.constant 0 : index
    %c0_4 = arith.constant 0 : index
    %4 = vector.load %arg2[%c0_3, %c0_4] : memref<1x64xf32, #tpu.memory_space<vmem>>, vector<1x64xf32>
    %5 = vector.broadcast %4 : vector<1x64xf32> to vector<8x64xf32>
    %6 = arith.addf %3, %5 : vector<8x64xf32>
    %cst_5 = arith.constant dense<0.000000e+00> : vector<64xf32>
    %7 = vector.multi_reduction <add>, %6, %cst_5 [0] : vector<8x64xf32> to vector<64xf32>
    %8 = vector.shape_cast %7 : vector<64xf32> to vector<1x64xf32>
    %cst_6 = arith.constant 8.000000e+00 : f32
    %9 = vector.broadcast %cst_6 : f32 to vector<1x64xf32>
    %10 = arith.divf %8, %9 : vector<1x64xf32>
    %11 = vector.broadcast %10 : vector<1x64xf32> to vector<8x64xf32>
    %12 = arith.subf %6, %11 : vector<8x64xf32>
    %13 = arith.mulf %12, %12 : vector<8x64xf32>
    %cst_7 = arith.constant dense<0.000000e+00> : vector<64xf32>
    %14 = vector.multi_reduction <add>, %13, %cst_7 [0] : vector<8x64xf32> to vector<64xf32>
    %15 = vector.shape_cast %14 : vector<64xf32> to vector<1x64xf32>
    %cst_8 = arith.constant 8.000000e+00 : f32
    %16 = vector.broadcast %cst_8 : f32 to vector<1x64xf32>
    %17 = arith.divf %15, %16 : vector<1x64xf32>
    %18 = vector.broadcast %10 : vector<1x64xf32> to vector<8x64xf32>
    %19 = arith.subf %6, %18 : vector<8x64xf32>
    %cst_9 = arith.constant 9.99999974E-6 : f32
    %20 = vector.broadcast %cst_9 : f32 to vector<1x64xf32>
    %21 = arith.addf %17, %20 : vector<1x64xf32>
    %22 = math.rsqrt %21 : vector<1x64xf32>
    %23 = vector.broadcast %22 : vector<1x64xf32> to vector<8x64xf32>
    %24 = arith.mulf %19, %23 : vector<8x64xf32>
    %c0_10 = arith.constant 0 : index
    %c0_11 = arith.constant 0 : index
    %25 = vector.load %arg3[%c0_10, %c0_11] : memref<1x64xf32, #tpu.memory_space<vmem>>, vector<1x64xf32>
    %26 = vector.broadcast %25 : vector<1x64xf32> to vector<8x64xf32>
    %27 = arith.mulf %24, %26 : vector<8x64xf32>
    %c0_12 = arith.constant 0 : index
    %c0_13 = arith.constant 0 : index
    %28 = vector.load %arg4[%c0_12, %c0_13] : memref<1x64xf32, #tpu.memory_space<vmem>>, vector<1x64xf32>
    %29 = vector.broadcast %28 : vector<1x64xf32> to vector<8x64xf32>
    %30 = arith.addf %27, %29 : vector<8x64xf32>
    %cst_14 = arith.constant 0.000000e+00 : f32
    %31 = vector.broadcast %cst_14 : f32 to vector<8x64xf32>
    %32 = arith.cmpf oge, %30, %31 : vector<8x64xf32>
    %cst_15 = arith.constant 0.00999999977 : f32
    %33 = vector.broadcast %cst_15 : f32 to vector<8x64xf32>
    %34 = arith.mulf %33, %30 : vector<8x64xf32>
    %35 = arith.select %32, %30, %34 : vector<8x64xi1>, vector<8x64xf32>
    %36 = arith.truncf %35 : vector<8x64xf32> to vector<8x64xbf16>
    %c0_16 = arith.constant 0 : index
    %c0_17 = arith.constant 0 : index
    %37 = vector.load %arg5[%c0_16, %c0_17] : memref<64x32xbf16, #tpu.memory_space<vmem>>, vector<64x32xbf16>
    %cst_18 = arith.constant dense<0.000000e+00> : vector<8x32xf32>
    %38 = tpu.matmul %36, %37, %cst_18 {dimension_numbers = #tpu.dot_dimension_numbers<[1], [0], [0], [1], [0, 0, 1, 1], [], []>} : vector<8x64xbf16>, vector<64x32xbf16>, vector<8x32xf32> -> vector<8x32xf32>
    %c0_19 = arith.constant 0 : index
    %c0_20 = arith.constant 0 : index
    %39 = vector.load %arg6[%c0_19, %c0_20] : memref<1x32xf32, #tpu.memory_space<vmem>>, vector<1x32xf32>
    %40 = vector.broadcast %39 : vector<1x32xf32> to vector<8x32xf32>
    %41 = arith.addf %38, %40 : vector<8x32xf32>
    %42 = arith.truncf %41 : vector<8x32xf32> to vector<8x32xbf16>
    %c0_21 = arith.constant 0 : index
    %c0_22 = arith.constant 0 : index
    %c0_23 = arith.constant 0 : index
    %43 = vector.load %arg8[%c0_21, %c0_22, %c0_23] : memref<3x32x128xbf16, #tpu.memory_space<vmem>>, vector<1x32x128xbf16>
    %44 = vector.shape_cast %43 : vector<1x32x128xbf16> to vector<32x128xbf16>
    %cst_24 = arith.constant dense<0.000000e+00> : vector<8x128xf32>
    %45 = tpu.matmul %42, %44, %cst_24 {dimension_numbers = #tpu.dot_dimension_numbers<[1], [0], [0], [1], [0, 0, 1, 1], [], []>} : vector<8x32xbf16>, vector<32x128xbf16>, vector<8x128xf32> -> vector<8x128xf32>
    %c0_25 = arith.constant 0 : index
    %c0_26 = arith.constant 0 : index
    %c0_27 = arith.constant 0 : index
    %46 = vector.load %arg9[%c0_25, %c0_26, %c0_27] : memref<3x1x128xf32, #tpu.memory_space<vmem>>, vector<1x1x128xf32>
    %47 = vector.shape_cast %46 : vector<1x1x128xf32> to vector<1x128xf32>
    %48 = vector.broadcast %47 : vector<1x128xf32> to vector<8x128xf32>
    %49 = arith.addf %45, %48 : vector<8x128xf32>
    %50 = math.tanh %49 : vector<8x128xf32>
    %c0_28 = arith.constant 0 : index
    %c0_29 = arith.constant 0 : index
    %c0_30 = arith.constant 0 : index
    %51 = vector.load %arg10[%c0_28, %c0_29, %c0_30] : memref<3x1x128xf32, #tpu.memory_space<vmem>>, vector<1x1x128xf32>
    %52 = vector.shape_cast %51 : vector<1x1x128xf32> to vector<1x128xf32>
    %53 = vector.broadcast %52 : vector<1x128xf32> to vector<8x128xf32>
    %54 = arith.mulf %50, %53 : vector<8x128xf32>
    %cst_31 = arith.constant dense<0.000000e+00> : vector<8xf32>
    %55 = vector.multi_reduction <add>, %54, %cst_31 [1] : vector<8x128xf32> to vector<8xf32>
    %56 = vector.shape_cast %55 : vector<8xf32> to vector<8x1xf32>
    %c0_32 = arith.constant 0 : index
    %c0_33 = arith.constant 0 : index
    %c0_34 = arith.constant 0 : index
    %57 = vector.load %arg11[%c0_32, %c0_33, %c0_34] : memref<3x1x1xf32, #tpu.memory_space<vmem>>, vector<1x1x1xf32>
    %58 = vector.shape_cast %57 : vector<1x1x1xf32> to vector<1x1xf32>
    %59 = vector.broadcast %58 : vector<1x1xf32> to vector<8x1xf32>
    %60 = arith.addf %56, %59 : vector<8x1xf32>
    %c0_35 = arith.constant 0 : index
    %c0_36 = arith.constant 0 : index
    %61 = vector.load %arg7[%c0_35, %c0_36] : memref<8x3xf32, #tpu.memory_space<vmem>>, vector<8x1xf32>
    %cst_37 = arith.constant 0.000000e+00 : f32
    %62 = vector.broadcast %cst_37 : f32 to vector<8x1xf32>
    %63 = arith.cmpf ogt, %61, %62 : vector<8x1xf32>
    %cst_38 = arith.constant -1.000000e+30 : f32
    %64 = vector.broadcast %cst_38 : f32 to vector<8x1xf32>
    %65 = arith.select %63, %60, %64 : vector<8x1xi1>, vector<8x1xf32>
    %cst_39 = arith.constant dense<0xFF800000> : vector<1xf32>
    %66 = vector.multi_reduction <maximumf>, %65, %cst_39 [0] : vector<8x1xf32> to vector<1xf32>
    %67 = vector.shape_cast %66 : vector<1xf32> to vector<1x1xf32>
    %68 = vector.broadcast %67 : vector<1x1xf32> to vector<8x1xf32>
    %69 = arith.subf %65, %68 : vector<8x1xf32>
    %70 = math.exp %69 : vector<8x1xf32>
    %71 = arith.mulf %70, %61 : vector<8x1xf32>
    %cst_40 = arith.constant dense<0.000000e+00> : vector<1xf32>
    %72 = vector.multi_reduction <add>, %71, %cst_40 [0] : vector<8x1xf32> to vector<1xf32>
    %73 = vector.shape_cast %72 : vector<1xf32> to vector<1x1xf32>
    %cst_41 = arith.constant 1.000000e-30 : f32
    %74 = vector.broadcast %cst_41 : f32 to vector<1x1xf32>
    %75 = arith.maximumf %73, %74 : vector<1x1xf32>
    %76 = vector.broadcast %75 : vector<1x1xf32> to vector<8x1xf32>
    %77 = arith.divf %71, %76 : vector<8x1xf32>
    %78 = vector.broadcast %77 : vector<8x1xf32> to vector<8x32xf32>
    %79 = arith.mulf %78, %41 : vector<8x32xf32>
    %cst_42 = arith.constant dense<0.000000e+00> : vector<32xf32>
    %80 = vector.multi_reduction <add>, %79, %cst_42 [0] : vector<8x32xf32> to vector<32xf32>
    %81 = vector.shape_cast %80 : vector<32xf32> to vector<1x32xf32>
    %82 = vector.broadcast %81 : vector<1x32xf32> to vector<8x32xf32>
    %83 = arith.subf %41, %82 : vector<8x32xf32>
    %84 = arith.mulf %83, %83 : vector<8x32xf32>
    %cst_43 = arith.constant dense<0.000000e+00> : vector<8xf32>
    %85 = vector.multi_reduction <add>, %84, %cst_43 [1] : vector<8x32xf32> to vector<8xf32>
    %86 = vector.shape_cast %85 : vector<8xf32> to vector<8x1xf32>
    %cst_44 = arith.constant -5.000000e-01 : f32
    %87 = vector.broadcast %cst_44 : f32 to vector<8x1xf32>
    %88 = arith.mulf %87, %86 : vector<8x1xf32>
    %89 = math.exp %88 : vector<8x1xf32>
    %c1 = arith.constant 1 : index
    %c0_45 = arith.constant 0 : index
    %c0_46 = arith.constant 0 : index
    %90 = vector.load %arg8[%c1, %c0_45, %c0_46] : memref<3x32x128xbf16, #tpu.memory_space<vmem>>, vector<1x32x128xbf16>
    %91 = vector.shape_cast %90 : vector<1x32x128xbf16> to vector<32x128xbf16>
    %cst_47 = arith.constant dense<0.000000e+00> : vector<8x128xf32>
    %92 = tpu.matmul %42, %91, %cst_47 {dimension_numbers = #tpu.dot_dimension_numbers<[1], [0], [0], [1], [0, 0, 1, 1], [], []>} : vector<8x32xbf16>, vector<32x128xbf16>, vector<8x128xf32> -> vector<8x128xf32>
    %c1_48 = arith.constant 1 : index
    %c0_49 = arith.constant 0 : index
    %c0_50 = arith.constant 0 : index
    %93 = vector.load %arg9[%c1_48, %c0_49, %c0_50] : memref<3x1x128xf32, #tpu.memory_space<vmem>>, vector<1x1x128xf32>
    %94 = vector.shape_cast %93 : vector<1x1x128xf32> to vector<1x128xf32>
    %95 = vector.broadcast %94 : vector<1x128xf32> to vector<8x128xf32>
    %96 = arith.addf %92, %95 : vector<8x128xf32>
    %97 = math.tanh %96 : vector<8x128xf32>
    %c1_51 = arith.constant 1 : index
    %c0_52 = arith.constant 0 : index
    %c0_53 = arith.constant 0 : index
    %98 = vector.load %arg10[%c1_51, %c0_52, %c0_53] : memref<3x1x128xf32, #tpu.memory_space<vmem>>, vector<1x1x128xf32>
    %99 = vector.shape_cast %98 : vector<1x1x128xf32> to vector<1x128xf32>
    %100 = vector.broadcast %99 : vector<1x128xf32> to vector<8x128xf32>
    %101 = arith.mulf %97, %100 : vector<8x128xf32>
    %cst_54 = arith.constant dense<0.000000e+00> : vector<8xf32>
    %102 = vector.multi_reduction <add>, %101, %cst_54 [1] : vector<8x128xf32> to vector<8xf32>
    %103 = vector.shape_cast %102 : vector<8xf32> to vector<8x1xf32>
    %c1_55 = arith.constant 1 : index
    %c0_56 = arith.constant 0 : index
    %c0_57 = arith.constant 0 : index
    %104 = vector.load %arg11[%c1_55, %c0_56, %c0_57] : memref<3x1x1xf32, #tpu.memory_space<vmem>>, vector<1x1x1xf32>
    %105 = vector.shape_cast %104 : vector<1x1x1xf32> to vector<1x1xf32>
    %106 = vector.broadcast %105 : vector<1x1xf32> to vector<8x1xf32>
    %107 = arith.addf %103, %106 : vector<8x1xf32>
    %c0_58 = arith.constant 0 : index
    %c1_59 = arith.constant 1 : index
    %108 = vector.load %arg7[%c0_58, %c1_59] : memref<8x3xf32, #tpu.memory_space<vmem>>, vector<8x1xf32>
    %cst_60 = arith.constant 0.000000e+00 : f32
    %109 = vector.broadcast %cst_60 : f32 to vector<8x1xf32>
    %110 = arith.cmpf ogt, %108, %109 : vector<8x1xf32>
    %cst_61 = arith.constant -1.000000e+30 : f32
    %111 = vector.broadcast %cst_61 : f32 to vector<8x1xf32>
    %112 = arith.select %110, %107, %111 : vector<8x1xi1>, vector<8x1xf32>
    %cst_62 = arith.constant dense<0xFF800000> : vector<1xf32>
    %113 = vector.multi_reduction <maximumf>, %112, %cst_62 [0] : vector<8x1xf32> to vector<1xf32>
    %114 = vector.shape_cast %113 : vector<1xf32> to vector<1x1xf32>
    %115 = vector.broadcast %114 : vector<1x1xf32> to vector<8x1xf32>
    %116 = arith.subf %112, %115 : vector<8x1xf32>
    %117 = math.exp %116 : vector<8x1xf32>
    %118 = arith.mulf %117, %108 : vector<8x1xf32>
    %cst_63 = arith.constant dense<0.000000e+00> : vector<1xf32>
    %119 = vector.multi_reduction <add>, %118, %cst_63 [0] : vector<8x1xf32> to vector<1xf32>
    %120 = vector.shape_cast %119 : vector<1xf32> to vector<1x1xf32>
    %cst_64 = arith.constant 1.000000e-30 : f32
    %121 = vector.broadcast %cst_64 : f32 to vector<1x1xf32>
    %122 = arith.maximumf %120, %121 : vector<1x1xf32>
    %123 = vector.broadcast %122 : vector<1x1xf32> to vector<8x1xf32>
    %124 = arith.divf %118, %123 : vector<8x1xf32>
    %125 = vector.broadcast %124 : vector<8x1xf32> to vector<8x32xf32>
    %126 = arith.mulf %125, %41 : vector<8x32xf32>
    %cst_65 = arith.constant dense<0.000000e+00> : vector<32xf32>
    %127 = vector.multi_reduction <add>, %126, %cst_65 [0] : vector<8x32xf32> to vector<32xf32>
    %128 = vector.shape_cast %127 : vector<32xf32> to vector<1x32xf32>
    %129 = vector.broadcast %128 : vector<1x32xf32> to vector<8x32xf32>
    %130 = arith.subf %41, %129 : vector<8x32xf32>
    %131 = arith.mulf %130, %130 : vector<8x32xf32>
    %cst_66 = arith.constant dense<0.000000e+00> : vector<8xf32>
    %132 = vector.multi_reduction <add>, %131, %cst_66 [1] : vector<8x32xf32> to vector<8xf32>
    %133 = vector.shape_cast %132 : vector<8xf32> to vector<8x1xf32>
    %cst_67 = arith.constant -5.000000e-01 : f32
    %134 = vector.broadcast %cst_67 : f32 to vector<8x1xf32>
    %135 = arith.mulf %134, %133 : vector<8x1xf32>
    %136 = math.exp %135 : vector<8x1xf32>
    %c2 = arith.constant 2 : index
    %c0_68 = arith.constant 0 : index
    %c0_69 = arith.constant 0 : index
    %137 = vector.load %arg8[%c2, %c0_68, %c0_69] : memref<3x32x128xbf16, #tpu.memory_space<vmem>>, vector<1x32x128xbf16>
    %138 = vector.shape_cast %137 : vector<1x32x128xbf16> to vector<32x128xbf16>
    %cst_70 = arith.constant dense<0.000000e+00> : vector<8x128xf32>
    %139 = tpu.matmul %42, %138, %cst_70 {dimension_numbers = #tpu.dot_dimension_numbers<[1], [0], [0], [1], [0, 0, 1, 1], [], []>} : vector<8x32xbf16>, vector<32x128xbf16>, vector<8x128xf32> -> vector<8x128xf32>
    %c2_71 = arith.constant 2 : index
    %c0_72 = arith.constant 0 : index
    %c0_73 = arith.constant 0 : index
    %140 = vector.load %arg9[%c2_71, %c0_72, %c0_73] : memref<3x1x128xf32, #tpu.memory_space<vmem>>, vector<1x1x128xf32>
    %141 = vector.shape_cast %140 : vector<1x1x128xf32> to vector<1x128xf32>
    %142 = vector.broadcast %141 : vector<1x128xf32> to vector<8x128xf32>
    %143 = arith.addf %139, %142 : vector<8x128xf32>
    %144 = math.tanh %143 : vector<8x128xf32>
    %c2_74 = arith.constant 2 : index
    %c0_75 = arith.constant 0 : index
    %c0_76 = arith.constant 0 : index
    %145 = vector.load %arg10[%c2_74, %c0_75, %c0_76] : memref<3x1x128xf32, #tpu.memory_space<vmem>>, vector<1x1x128xf32>
    %146 = vector.shape_cast %145 : vector<1x1x128xf32> to vector<1x128xf32>
    %147 = vector.broadcast %146 : vector<1x128xf32> to vector<8x128xf32>
    %148 = arith.mulf %144, %147 : vector<8x128xf32>
    %cst_77 = arith.constant dense<0.000000e+00> : vector<8xf32>
    %149 = vector.multi_reduction <add>, %148, %cst_77 [1] : vector<8x128xf32> to vector<8xf32>
    %150 = vector.shape_cast %149 : vector<8xf32> to vector<8x1xf32>
    %c2_78 = arith.constant 2 : index
    %c0_79 = arith.constant 0 : index
    %c0_80 = arith.constant 0 : index
    %151 = vector.load %arg11[%c2_78, %c0_79, %c0_80] : memref<3x1x1xf32, #tpu.memory_space<vmem>>, vector<1x1x1xf32>
    %152 = vector.shape_cast %151 : vector<1x1x1xf32> to vector<1x1xf32>
    %153 = vector.broadcast %152 : vector<1x1xf32> to vector<8x1xf32>
    %154 = arith.addf %150, %153 : vector<8x1xf32>
    %c0_81 = arith.constant 0 : index
    %c2_82 = arith.constant 2 : index
    %155 = vector.load %arg7[%c0_81, %c2_82] : memref<8x3xf32, #tpu.memory_space<vmem>>, vector<8x1xf32>
    %cst_83 = arith.constant 0.000000e+00 : f32
    %156 = vector.broadcast %cst_83 : f32 to vector<8x1xf32>
    %157 = arith.cmpf ogt, %155, %156 : vector<8x1xf32>
    %cst_84 = arith.constant -1.000000e+30 : f32
    %158 = vector.broadcast %cst_84 : f32 to vector<8x1xf32>
    %159 = arith.select %157, %154, %158 : vector<8x1xi1>, vector<8x1xf32>
    %cst_85 = arith.constant dense<0xFF800000> : vector<1xf32>
    %160 = vector.multi_reduction <maximumf>, %159, %cst_85 [0] : vector<8x1xf32> to vector<1xf32>
    %161 = vector.shape_cast %160 : vector<1xf32> to vector<1x1xf32>
    %162 = vector.broadcast %161 : vector<1x1xf32> to vector<8x1xf32>
    %163 = arith.subf %159, %162 : vector<8x1xf32>
    %164 = math.exp %163 : vector<8x1xf32>
    %165 = arith.mulf %164, %155 : vector<8x1xf32>
    %cst_86 = arith.constant dense<0.000000e+00> : vector<1xf32>
    %166 = vector.multi_reduction <add>, %165, %cst_86 [0] : vector<8x1xf32> to vector<1xf32>
    %167 = vector.shape_cast %166 : vector<1xf32> to vector<1x1xf32>
    %cst_87 = arith.constant 1.000000e-30 : f32
    %168 = vector.broadcast %cst_87 : f32 to vector<1x1xf32>
    %169 = arith.maximumf %167, %168 : vector<1x1xf32>
    %170 = vector.broadcast %169 : vector<1x1xf32> to vector<8x1xf32>
    %171 = arith.divf %165, %170 : vector<8x1xf32>
    %172 = vector.broadcast %171 : vector<8x1xf32> to vector<8x32xf32>
    %173 = arith.mulf %172, %41 : vector<8x32xf32>
    %cst_88 = arith.constant dense<0.000000e+00> : vector<32xf32>
    %174 = vector.multi_reduction <add>, %173, %cst_88 [0] : vector<8x32xf32> to vector<32xf32>
    %175 = vector.shape_cast %174 : vector<32xf32> to vector<1x32xf32>
    %176 = vector.broadcast %175 : vector<1x32xf32> to vector<8x32xf32>
    %177 = arith.subf %41, %176 : vector<8x32xf32>
    %178 = arith.mulf %177, %177 : vector<8x32xf32>
    %cst_89 = arith.constant dense<0.000000e+00> : vector<8xf32>
    %179 = vector.multi_reduction <add>, %178, %cst_89 [1] : vector<8x32xf32> to vector<8xf32>
    %180 = vector.shape_cast %179 : vector<8xf32> to vector<8x1xf32>
    %cst_90 = arith.constant -5.000000e-01 : f32
    %181 = vector.broadcast %cst_90 : f32 to vector<8x1xf32>
    %182 = arith.mulf %181, %180 : vector<8x1xf32>
    %183 = math.exp %182 : vector<8x1xf32>
    %184 = tpu.concatenate %89, %136, %183 in 1 : vector<8x1xf32>, vector<8x1xf32>, vector<8x1xf32> -> vector<8x3xf32>
    %c0_91 = arith.constant 0 : index
    %c0_92 = arith.constant 0 : index
    %185 = vector.load %arg12[%c0_91, %c0_92] : memref<8x3xf32, #tpu.memory_space<vmem>>, vector<8x3xf32>
    tpu.vector_store %arg12[%c0_91, %c0_92], %184 {strides = array<i32>} : memref<8x3xf32, #tpu.memory_space<vmem>>, vector<8x3xf32>,
    return
  }
}

</mosaic_0001>

<bundles_post_ra>
// kernel: tapnet_forward.6
= control target key start
LH: loop header
LB: loop body
LE: loop exit
PB: predicated region body
PF: predicated region fallthrough
CT: control target
= control target key end

     0   :  { %s1057_s18 = smov 0   ;;  %s1526_s0 = inlined_call_operand.vmem [shape: bf16[3,192,30], index: 0, kind: input, shape index: {}]   ;;  %s1527_s1 = inlined_call_operand.vmem [shape: bf16[3,30,16], index: 1, kind: input, shape index: {}]   ;;  %s1528_s2 = inlined_call_operand.vmem [shape: f32[3,1,16], index: 2, kind: input, shape index: {}]   ;;  %s1529_s3 = inlined_call_operand.vmem [shape: f32[1,1,16], index: 3, kind: input, shape index: {}]   ;;  %s1530_s4 = inlined_call_operand.vmem [shape: f32[1,1,16], index: 4, kind: input, shape index: {}]   ;;  %s1531_s5 = inlined_call_operand.vmem [shape: f32[3,192,16], index: 5, kind: output, shape index: {}]  }
   0x1 LB: > { %s900_s19 = sadd.s32 4294967295, %s1024_s18   ;;  %p904_p0 = scmp.ge.s32.totalorder %s1024_s18, 1  ;;  %s1024_s18 = sphi %s1057_s18, %s15_s18  }
   0x2   : > { %p205_p1 = scmp.lt.s32.totalorder %s1024_s18, 4 }
   0x4   : > { %p206_p2 = pnand %p904_p0, %p205_p1 }
   0x5   : > { %p241_p3 = scmp.lt.s32.totalorder (!%p206_p2), %s900_s19, 2 }
   0x6   : > { %209 = sbr.rel (%p206_p2) target bundleno = 372 (0x174), region = 40 }
   0xb   : > { %s1533_s19 = smov (!%p241_p3, %s900_s19), 2  ;;  %vm400_vm0 = vcmask 1046528   ;;  %vm363_vm1 = vcmask 244736   ;;  %vm473_vm2 = vcmask 130048  }
   0xc   : > { %s979_s20 = sshll.u32 %s1533_s19, 4  ;;  %s1000_s24 = smul.u32 96, %s1533_s19 }
   0xd   : > { %s250_s23 = scalar_lea.vmem %s1527_s1, %s979_s20  ;;  %s253_s27 = scalar_lea.vmem %s1528_s2, %s1533_s19 }
   0xe   : > { %v963_v0 = vld [vmem:[%s250_s23 + $0x8] sm:$0xf]  ;;  %v993_v1 = vld [vmem:[%s250_s23 + $0x8] sm:$0x70]  ;;  %s245_s30 = scalar_lea.vmem %s1526_s0, %s1000_s24  ;;  %v992_v4 = vld [vmem:[%s250_s23] sm:$0xff]  ;;  %s1001_s12 = smul.u32 192, %s1533_s19 }
   0xf   : > { %v964_v2 = vor.u32 %v993_v1, %v963_v0  ;;  %v980_v5 = vld [vmem:[%s245_s30] sm:$0xff]  ;;  %v983_v6 = vld [vmem:[%s245_s30 + $0x18] sm:$0xff]  ;;  %v986_v7 = vld [vmem:[%s245_s30 + $0x30] sm:$0xff] }
  0x10   : > { %v989_v8 = vld [vmem:[%s245_s30 + $0x48] sm:$0xff]  ;;  %v984_v10 = vld [vmem:[%s245_s30 + $0x20] sm:$0xff]  ;;  %v987_v11 = vld [vmem:[%s245_s30 + $0x38] sm:$0xff]  ;;  %s1438_s15 = scalar_lea.vmem %s1531_s5, %s1001_s12 }
  0x11   : > { %v402_v3 = vsel %vm400_vm0, %v964_v2, 0  ;;  %v981_v9 = vld [vmem:[%s245_s30 + $0x8] sm:$0xff]  ;;  %v990_v12 = vld [vmem:[%s245_s30 + $0x50] sm:$0xff]  ;;  %v988_v15 = vld [vmem:[%s245_s30 + $0x40] sm:$0xff] }
  0x12   : > { %410 = vmatpush.bf16.msra.mxu0 %v402_v3  ;;  %994 = vmatpush.bf16.msra.mxu1 %v402_v3  ;;  %v982_v13 = vld [vmem:[%s245_s30 + $0x10] sm:$0xff]  ;;  %v985_v14 = vld [vmem:[%s245_s30 + $0x28] sm:$0xff]  ;;  %v991_v16 = vld [vmem:[%s245_s30 + $0x58] sm:$0xff] }
  0x13   : > { %995 = vmatpush.bf16.msra.mxu2 %v402_v3  ;;  %996 = vmatpush.bf16.msra.mxu3 %v402_v3  ;;  %v1098_v27 = vld [vmem:[%s253_s27] ss:$0 sm:$0xff] }
  0x16   : > { %411 = vmatpush.bf16.msra.mxu0 %v992_v4  ;;  %997 = vmatpush.bf16.msra.mxu1 %v992_v4 }
  0x17   : > { %998 = vmatpush.bf16.msra.mxu2 %v992_v4  ;;  %999 = vmatpush.bf16.msra.mxu3 %v992_v4 }
  0x19   : > { %965 = vmatmul.msk.bf16.vlgmr.msra.gmra.mxu0 %vm363_vm1, %v980_v5  ;;  %968 = vmatmul.msk.bf16.vlgmr.msra.gmra.mxu1 %vm363_vm1, %v983_v6 }
  0x1a   : > { %971 = vmatmul.msk.bf16.vlgmr.msra.gmra.mxu2 %vm363_vm1, %v986_v7  ;;  %974 = vmatmul.msk.bf16.vlgmr.msra.gmra.mxu3 %vm363_vm1, %v989_v8 }
  0x29   : > { %966 = vmatmul.msk.bf16.gmra.mxu0 %vm363_vm1, %v981_v9  ;;  %969 = vmatmul.msk.bf16.gmra.mxu1 %vm363_vm1, %v984_v10 }
  0x2a   : > { %972 = vmatmul.msk.bf16.gmra.mxu2 %vm363_vm1, %v987_v11  ;;  %975 = vmatmul.msk.bf16.gmra.mxu3 %vm363_vm1, %v990_v12 }
  0x39   : > { %967 = vmatmul.msk.bf16.gmra.mxu0 %vm363_vm1, %v982_v13  ;;  %970 = vmatmul.msk.bf16.gmra.mxu1 %vm363_vm1, %v985_v14 }
  0x3a   : > { %973 = vmatmul.msk.bf16.gmra.mxu2 %vm363_vm1, %v988_v15  ;;  %976 = vmatmul.msk.bf16.gmra.mxu3 %vm363_vm1, %v991_v16 }
  0x96   : > { %v413_v17 = vpop.f32.mrf.mxu0  ;;  %v428_v18 = vpop.f32.mrf.mxu1 }
  0x97   : > { %v1104_v31 = vadd.f32 %v1098_v27, %v413_v17  ;;  %v1126_v48 = vadd.f32 %v1098_v27, %v428_v18 }
  0x99   : > { %v474_v37 = vsel %vm473_vm2, %v1104_v31, 0.0  ;;  %v485_v55 = vsel %vm473_vm2, %v1126_v48, 0.0 }
  0x9d   : > { %v443_v21 = vpop.f32.mrf.mxu2  ;;  %v1091_v25 = vpop.f32.mrf.mxu3 }
  0x9e   : > { %v415_v19 = vpop.f32.mrf.mxu0  ;;  %v430_v20 = vpop.f32.mrf.mxu1  ;;  %v1157_v6 = vadd.f32 %v1098_v27, %v443_v21 }
  0x9f   : > { %v1101_v29 = vadd.f32 %v1098_v27, %v415_v19  ;;  %v1132_v52 = vadd.f32 %v1098_v27, %v430_v20 }
  0xa0   : > { %v497_v12 = vsel %vm473_vm2, %v1157_v6, 0.0 }
  0xa1   : > { %v475_v35 = vsel %vm473_vm2, %v1101_v29, 0.0  ;;  %v487_v58 = vsel %vm473_vm2, %v1132_v52, 0.0 }
  0xa2   : > { %v476_v40 = vadd.f32 %v475_v35, %v474_v37 }
  0xa5   : > { %v445_v24 = vpop.f32.mrf.mxu2  ;;  %v460_v34 = vpop.f32.mrf.mxu3 }
  0xa6   : > { %v418_v22 = vpop.f32.mrf.mxu0  ;;  %v433_v23 = vpop.f32.mrf.mxu1  ;;  %v1162_v9 = vadd.f32 %v1098_v27, %v445_v24  ;;  %v1193_v35 = vadd.f32 %v1098_v27, %v460_v34 }
  0xa7   : > { %v1107_v32 = vadd.f32 %v1098_v27, %v418_v22  ;;  %v1139_v56 = vadd.f32 %v1098_v27, %v433_v23 }
  0xa8   : > { %v499_v15 = vsel %vm473_vm2, %v1162_v9, 0.0 }
  0xa9   : > { %v477_v38 = vsel %vm473_vm2, %v1107_v32, 0.0  ;;  %v489_v62 = vsel %vm473_vm2, %v1139_v56, 0.0 }
  0xaa   : > { %v478_v42 = vadd.f32 %v477_v38, %v476_v40  ;;  %v1026_v40 = vmov 192.0  }
  0xab   : > { %1014 = vrcp.f32 %v1026_v40 }
  0xad   : > { %v448_v30 = vpop.f32.mrf.mxu2  ;;  %v463_v51 = vpop.f32.mrf.mxu3 }
  0xae   : > { %v420_v26 = vpop.f32.mrf.mxu0  ;;  %v435_v28 = vpop.f32.mrf.mxu1  ;;  %v1169_v13 = vadd.f32 %v1098_v27, %v448_v30 }
  0xaf   : > { %v1112_v36 = vadd.f32 %v1098_v27, %v420_v26  ;;  %v1144_v59 = vadd.f32 %v1098_v27, %v435_v28  ;;  %v1188_v28 = vadd.f32 %v1098_v27, %v1091_v25 }
  0xb0   : > { %v501_v19 = vsel %vm473_vm2, %v1169_v13, 0.0 }
  0xb1   : > { %v479_v41 = vsel %vm473_vm2, %v1112_v36, 0.0  ;;  %v491_v2 = vsel %vm473_vm2, %v1144_v59, 0.0 }
  0xb2   : > { %v480_v45 = vadd.f32 %v479_v41, %v478_v42  ;;  %v509_v41 = vsel %vm473_vm2, %v1188_v28, 0.0  ;;  %v1200_v42 = vadd.f32 %v1098_v27, %v463_v51 }
  0xb5   : > { %v450_v47 = vpop.f32.mrf.mxu2  ;;  %v465_v5 = vpop.f32.mrf.mxu3 }
  0xb6   : > { %v423_v33 = vpop.f32.mrf.mxu0  ;;  %v438_v43 = vpop.f32.mrf.mxu1  ;;  %v1174_v16 = vadd.f32 %v1098_v27, %v450_v47 }
  0xb7   : > { %v1119_v39 = vadd.f32 %v1098_v27, %v423_v33  ;;  %v1149_v63 = vadd.f32 %v1098_v27, %v438_v43  ;;  %v511_v43 = vsel %vm473_vm2, %v1193_v35, 0.0 }
  0xb8   : > { %v503_v23 = vsel %vm473_vm2, %v1174_v16, 0.0 }
  0xb9   : > { %v481_v44 = vsel %vm473_vm2, %v1119_v39, 0.0  ;;  %v493_v7 = vsel %vm473_vm2, %v1149_v63, 0.0 }
  0xba   : > { %v482_v50 = vadd.f32 %v481_v44, %v480_v45  ;;  %v1205_v44 = vadd.f32 %v1098_v27, %v465_v5 }
  0xbc   : > { %v515_v51 = vsel %vm473_vm2, %v1205_v44, 0.0 }
  0xbd   : > { %v453_v1 = vpop.f32.mrf.mxu2  ;;  %v468_v22 = vpop.f32.mrf.mxu3 }
  0xbe   : > { %v425_v46 = vpop.f32.mrf.mxu0  ;;  %v440_v61 = vpop.f32.mrf.mxu1  ;;  %v1179_v20 = vadd.f32 %v1098_v27, %v453_v1  ;;  %v1210_v47 = vadd.f32 %v1098_v27, %v468_v22 }
  0xbf   : > { %v1129_v49 = vadd.f32 %v1098_v27, %v425_v46  ;;  %v1154_v3 = vadd.f32 %v1098_v27, %v440_v61  ;;  %v513_v46 = vsel %vm473_vm2, %v1200_v42, 0.0 }
  0xc0   : > { %v505_v30 = vsel %vm473_vm2, %v1179_v20, 0.0 }
  0xc1   : > { %v483_v53 = vsel %vm473_vm2, %v1129_v49, 0.0  ;;  %v495_v10 = vsel %vm473_vm2, %v1154_v3, 0.0 }
  0xc2   : > { %v484_v54 = vadd.f32 %v483_v53, %v482_v50  ;;  %v1015_v50 = vpop.eup %1014 }
  0xc3   : > { %vm532_vm3 = vweird.f32 %v1015_v50 }
  0xc4   : > { %v486_v57 = vadd.f32 %v485_v55, %v484_v54 }
  0xc5   : > { %v455_v18 = vpop.f32.mrf.mxu2  ;;  %v470_v45 = vpop.f32.mrf.mxu3 }
  0xc6   : > { %v488_v60 = vadd.f32 %v487_v58, %v486_v57  ;;  %v1184_v24 = vadd.f32 %v1098_v27, %v455_v18  ;;  %v1215_v54 = vadd.f32 %v1098_v27, %v470_v45  ;;  %v517_v57 = vsel %vm473_vm2, %v1210_v47, 0.0 }
  0xc7   : > { %v528_v58 = vmul.f32 192.0, %v1015_v50 }
  0xc8   : > { %v490_v0 = vadd.f32 %v489_v62, %v488_v60  ;;  %v507_v37 = vsel %vm473_vm2, %v1184_v24, 0.0  ;;  %v519_v61 = vsel %vm473_vm2, %v1215_v54, 0.0 }
  0xca   : > { %v492_v4 = vadd.f32 %v491_v2, %v490_v0  ;;  %v529_v0 = vsub.f32 1.0, %v528_v58 }
  0xcc   : > { %v494_v8 = vadd.f32 %v493_v7, %v492_v4  ;;  %v530_v4 = vmul.f32 %v1015_v50, %v529_v0 }
  0xce   : > { %v496_v11 = vadd.f32 %v495_v10, %v494_v8  ;;  %v531_v8 = vadd.f32 %v1015_v50, %v530_v4 }
  0xd0   : > { %v498_v14 = vadd.f32 %v497_v12, %v496_v11  ;;  %v1221_v11 = vsel %vm532_vm3, %v1015_v50, %v531_v8 }
  0xd2   : > { %v500_v17 = vadd.f32 %v499_v15, %v498_v14 }
  0xd4   : > { %v502_v21 = vadd.f32 %v501_v19, %v500_v17 }
  0xd6   : > { %v504_v26 = vadd.f32 %v503_v23, %v502_v21 }
  0xd8   : > { %v506_v33 = vadd.f32 %v505_v30, %v504_v26 }
  0xda   : > { %v508_v38 = vadd.f32 %v507_v37, %v506_v33 }
  0xdc   : > { %v510_v25 = vadd.f32 %v509_v41, %v508_v38 }
  0xde   : > { %v512_v34 = vadd.f32 %v511_v43, %v510_v25 }
  0xe0   : > { %v514_v53 = vadd.f32 %v513_v46, %v512_v34 }
  0xe2   : > { %v516_v55 = vadd.f32 %v515_v51, %v514_v53 }
  0xe4   : > { %v518_v60 = vadd.f32 %v517_v57, %v516_v55 }
  0xe6   : > { %v520_v62 = vadd.f32 %v519_v61, %v518_v60 }
  0xe8   : > { %v521_v1 = vrot.slane %v520_v62, 4 }
  0xea   : > { %v522_v2 = vadd.f32 %v521_v1, %v520_v62 }
  0xec   : > { %v523_v5 = vrot.slane %v522_v2, 2 }
  0xee   : > { %v524_v7 = vadd.f32 %v523_v5, %v522_v2 }
  0xf0   : > { %v525_v10 = vrot.slane %v524_v7, 1 }
  0xf2   : > { %v526_v27 = vadd.f32 %v525_v10, %v524_v7 }
  0xf4   : > { %v1224_v12 = vmul.f32 %v1221_v11, %v526_v27 }
  0xf6   : > { %v1228_v14 = vsub.f32 %v1104_v31, %v1224_v12  ;;  %v1232_v15 = vsub.f32 %v1101_v29, %v1224_v12  ;;  %v1236_v17 = vsub.f32 %v1107_v32, %v1224_v12  ;;  %v1240_v18 = vsub.f32 %v1112_v36, %v1224_v12 }
  0xf7   : > { %v1248_v31 = vsub.f32 %v1119_v39, %v1224_v12  ;;  %v1254_v32 = vsub.f32 %v1129_v49, %v1224_v12  ;;  %v1262_v30 = vsub.f32 %v1126_v48, %v1224_v12  ;;  %v1269_v49 = vsub.f32 %v1132_v52, %v1224_v12 }
  0xf8   : > { %v559_v19 = vmul.f32 %v1228_v14, %v1228_v14  ;;  %v560_v21 = vmul.f32 %v1232_v15, %v1232_v15  ;;  %v561_v29 = vmul.f32 %v1236_v17, %v1236_v17  ;;  %v562_v36 = vmul.f32 %v1240_v18, %v1240_v18 }
  0xf9   : > { %v563_v39 = vmul.f32 %v1248_v31, %v1248_v31  ;;  %v564_v38 = vmul.f32 %v1254_v32, %v1254_v32  ;;  %v1276_v48 = vsub.f32 %v1139_v56, %v1224_v12  ;;  %v565_v25 = vmul.f32 %v1262_v30, %v1262_v30 }
  0xfa   : > { %v583_v22 = vsel %vm473_vm2, %v559_v19, 0.0  ;;  %v584_v23 = vsel %vm473_vm2, %v560_v21, 0.0  ;;  %v586_v33 = vsel %vm473_vm2, %v561_v29, 0.0  ;;  %v588_v40 = vsel %vm473_vm2, %v562_v36, 0.0 }
  0xfb   : > { %v585_v26 = vadd.f32 %v584_v23, %v583_v22  ;;  %v590_v43 = vsel %vm473_vm2, %v563_v39, 0.0  ;;  %v1283_v52 = vsub.f32 %v1144_v59, %v1224_v12  ;;  %v566_v45 = vmul.f32 %v1269_v49, %v1269_v49 }
  0xfc   : > { %v592_v46 = vsel %vm473_vm2, %v564_v38, 0.0  ;;  %v1290_v56 = vsub.f32 %v1149_v63, %v1224_v12  ;;  %v567_v53 = vmul.f32 %v1276_v48, %v1276_v48  ;;  %v594_v51 = vsel %vm473_vm2, %v565_v25, 0.0 }
  0xfd   : > { %v587_v37 = vadd.f32 %v586_v33, %v585_v26  ;;  %v1297_v59 = vsub.f32 %v1154_v3, %v1224_v12  ;;  %v568_v57 = vmul.f32 %v1283_v52, %v1283_v52  ;;  %v596_v58 = vsel %vm473_vm2, %v566_v45, 0.0 }
  0xfe   : > { %v1304_v63 = vsub.f32 %v1157_v6, %v1224_v12  ;;  %v569_v61 = vmul.f32 %v1290_v56, %v1290_v56  ;;  %v598_v62 = vsel %vm473_vm2, %v567_v53, 0.0  ;;  %v1311_v3 = vsub.f32 %v1162_v9, %v1224_v12 }
  0xff   : > { %v589_v41 = vadd.f32 %v588_v40, %v587_v37  ;;  %v570_v1 = vmul.f32 %v1297_v59, %v1297_v59  ;;  %v600_v2 = vsel %vm473_vm2, %v568_v57, 0.0  ;;  %v1318_v6 = vsub.f32 %v1169_v13, %v1224_v12 }
 0x100   : > { %v571_v5 = vmul.f32 %v1304_v63, %v1304_v63  ;;  %v602_v7 = vsel %vm473_vm2, %v569_v61, 0.0  ;;  %v1325_v9 = vsub.f32 %v1174_v16, %v1224_v12  ;;  %v572_v10 = vmul.f32 %v1311_v3, %v1311_v3 }
 0x101   : > { %v591_v34 = vadd.f32 %v590_v43, %v589_v41  ;;  %v604_v27 = vsel %vm473_vm2, %v570_v1, 0.0  ;;  %v1332_v13 = vsub.f32 %v1179_v20, %v1224_v12  ;;  %v573_v21 = vmul.f32 %v1318_v6, %v1318_v6 }
 0x102   : > { %v606_v29 = vsel %vm473_vm2, %v571_v5, 0.0  ;;  %v1339_v16 = vsub.f32 %v1184_v24, %v1224_v12  ;;  %v574_v22 = vmul.f32 %v1325_v9, %v1325_v9  ;;  %v608_v23 = vsel %vm473_vm2, %v572_v10, 0.0 }
 0x103   : > { %v593_v50 = vadd.f32 %v592_v46, %v591_v34  ;;  %v1346_v20 = vsub.f32 %v1188_v28, %v1224_v12  ;;  %v575_v39 = vmul.f32 %v1332_v13, %v1332_v13  ;;  %v610_v33 = vsel %vm473_vm2, %v573_v21, 0.0 }
 0x104   : > { %v1353_v24 = vsub.f32 %v1193_v35, %v1224_v12  ;;  %v576_v38 = vmul.f32 %v1339_v16, %v1339_v16  ;;  %v612_v40 = vsel %vm473_vm2, %v574_v22, 0.0  ;;  %v1360_v28 = vsub.f32 %v1200_v42, %v1224_v12 }
 0x105   : > { %v595_v55 = vadd.f32 %v594_v51, %v593_v50  ;;  %v577_v25 = vmul.f32 %v1346_v20, %v1346_v20  ;;  %v614_v43 = vsel %vm473_vm2, %v575_v39, 0.0  ;;  %v556_v35 = vsub.f32 %v1205_v44, %v1224_v12 }
 0x106   : > { %v578_v45 = vmul.f32 %v1353_v24, %v1353_v24  ;;  %v616_v46 = vsel %vm473_vm2, %v576_v38, 0.0  ;;  %v557_v53 = vsub.f32 %v1210_v47, %v1224_v12  ;;  %v579_v42 = vmul.f32 %v1360_v28, %v1360_v28 }
 0x107   : > { %v597_v60 = vadd.f32 %v596_v58, %v595_v55  ;;  %v618_v51 = vsel %vm473_vm2, %v577_v25, 0.0  ;;  %v558_v57 = vsub.f32 %v1215_v54, %v1224_v12  ;;  %v580_v58 = vmul.f32 %v556_v35, %v556_v35 }
 0x108   : > { %v620_v44 = vsel %vm473_vm2, %v578_v45, 0.0  ;;  %v581_v61 = vmul.f32 %v557_v53, %v557_v53 }
 0x109   : > { %v599_v0 = vadd.f32 %v598_v62, %v597_v60  ;;  %v622_v62 = vsel %vm473_vm2, %v579_v42, 0.0  ;;  %v582_v1 = vmul.f32 %v558_v57, %v558_v57  ;;  %v624_v47 = vsel %vm473_vm2, %v580_v58, 0.0 }
 0x10b   : > { %v601_v4 = vadd.f32 %v600_v2, %v599_v0 }
 0x10d   : > { %v603_v8 = vadd.f32 %v602_v7, %v601_v4  ;;  %v626_v4 = vsel %vm473_vm2, %v581_v61, 0.0  ;;  %v628_v7 = vsel %vm473_vm2, %v582_v1, 0.0 }
 0x10f   : > { %v605_v19 = vadd.f32 %v604_v27, %v603_v8 }
 0x111   : > { %v607_v36 = vadd.f32 %v606_v29, %v605_v19 }
 0x113   : > { %v609_v26 = vadd.f32 %v608_v23, %v607_v36 }
 0x115   : > { %v611_v37 = vadd.f32 %v610_v33, %v609_v26 }
 0x117   : > { %v613_v41 = vadd.f32 %v612_v40, %v611_v37 }
 0x119   : > { %v615_v34 = vadd.f32 %v614_v43, %v613_v41 }
 0x11b   : > { %v617_v50 = vadd.f32 %v616_v46, %v615_v34 }
 0x11d   : > { %v619_v55 = vadd.f32 %v618_v51, %v617_v50 }
 0x11f   : > { %v621_v60 = vadd.f32 %v620_v44, %v619_v55 }
 0x121   : > { %v623_v0 = vadd.f32 %v622_v62, %v621_v60 }
 0x123   : > { %v625_v2 = vadd.f32 %v624_v47, %v623_v0 }
 0x125   : > { %v627_v5 = vadd.f32 %v626_v4, %v625_v2 }
 0x127   : > { %v629_v8 = vadd.f32 %v628_v7, %v627_v5 }
 0x129   : > { %v630_v10 = vrot.slane %v629_v8, 4 }
 0x12b   : > { %v631_v54 = vadd.f32 %v630_v10, %v629_v8 }
 0x12d   : > { %v632_v12 = vrot.slane %v631_v54, 2 }
 0x12f   : > { %v633_v27 = vadd.f32 %v632_v12, %v631_v54 }
 0x131   : > { %v634_v19 = vrot.slane %v633_v27, 1 }
 0x133   : > { %v635_v21 = vadd.f32 %v634_v19, %v633_v27 }
 0x135   : > { %v636_v29 = vmul.f32 %v635_v21, %v1221_v11  ;;  %v1012_v11 = vld [vmem:[%s1529_s3] ss:$0 sm:$0xff] }
 0x137   : > { %v637_v36 = vadd.f32 1e-05, %v636_v29 }
 0x139   : > { %1016 = vrsqrt.f32 %v637_v36  ;;  %vm644_vm5 = vweird.f32 %v637_v36 }
 0x13f   : > { %v1017_v22 = vpop.eup %1016 }
 0x140   : > { %v639_v23 = vmul.f32 %v1017_v22, %v637_v36  ;;  %vm645_vm4 = vweird.f32 %v1017_v22 }
 0x141   : > { %vm646_vm6 = vmor %vm644_vm5, %vm645_vm4 }
 0x142   : > { %v640_v26 = vmul.f32 %v1017_v22, %v639_v23 }
 0x144   : > { %v641_v39 = vmul.f32 0.5, %v640_v26 }
 0x146   : > { %v642_v33 = vsub.f32 1.5, %v641_v39 }
 0x148   : > { %v643_v37 = vmul.f32 %v1017_v22, %v642_v33 }
 0x14a   : > { %v647_v38 = vsel %vm646_vm6, %v1017_v22, %v643_v37 }
 0x14b   : > { %v669_v40 = vmul.f32 %v647_v38, %v556_v35  ;;  %v670_v41 = vmul.f32 %v647_v38, %v557_v53  ;;  %v648_v25 = vmul.f32 %v647_v38, %v1228_v14  ;;  %v649_v43 = vmul.f32 %v647_v38, %v1232_v15 }
 0x14c   : > { %v650_v34 = vmul.f32 %v647_v38, %v1236_v17  ;;  %v651_v45 = vmul.f32 %v647_v38, %v1240_v18  ;;  %v652_v46 = vmul.f32 %v647_v38, %v1248_v31  ;;  %v653_v50 = vmul.f32 %v647_v38, %v1254_v32 }
 0x14d   : > { %v654_v42 = vmul.f32 %v647_v38, %v1262_v30  ;;  %v655_v35 = vmul.f32 %v647_v38, %v1269_v49  ;;  %v656_v14 = vmul.f32 %v647_v38, %v1276_v48  ;;  %v657_v53 = vmul.f32 %v647_v38, %v1283_v52  ;;  %v1405_v30 = vld [vmem:[%s1530_s4] ss:$0 sm:$0xff] }
 0x14e   : > { %v658_v51 = vmul.f32 %v647_v38, %v1290_v56  ;;  %v659_v15 = vmul.f32 %v647_v38, %v1297_v59  ;;  %v660_v17 = vmul.f32 %v647_v38, %v1304_v63  ;;  %v661_v18 = vmul.f32 %v647_v38, %v1311_v3 }
 0x14f   : > { %v662_v31 = vmul.f32 %v647_v38, %v1318_v6  ;;  %v663_v32 = vmul.f32 %v647_v38, %v1325_v9  ;;  %v676_v55 = vmul.f32 %v1012_v11, %v648_v25  ;;  %v664_v49 = vmul.f32 %v647_v38, %v1332_v13 }
 0x150   : > { %v665_v48 = vmul.f32 %v647_v38, %v1339_v16  ;;  %v666_v52 = vmul.f32 %v647_v38, %v1346_v20  ;;  %v677_v56 = vmul.f32 %v1012_v11, %v649_v43  ;;  %v667_v59 = vmul.f32 %v647_v38, %v1353_v24 }
 0x151   : > { %v668_v63 = vmul.f32 %v647_v38, %v1360_v28  ;;  %v671_v3 = vmul.f32 %v647_v38, %v558_v57  ;;  %v678_v6 = vmul.f32 %v1012_v11, %v650_v34  ;;  %v679_v9 = vmul.f32 %v1012_v11, %v651_v45 }
 0x152   : > { %v680_v58 = vmul.f32 %v1012_v11, %v652_v46  ;;  %v681_v44 = vmul.f32 %v1012_v11, %v653_v50  ;;  %v682_v60 = vmul.f32 %v1012_v11, %v654_v42  ;;  %v683_v61 = vmul.f32 %v1012_v11, %v655_v35 }
 0x153   : > { %v684_v62 = vmul.f32 %v1012_v11, %v656_v14  ;;  %v685_v0 = vmul.f32 %v1012_v11, %v657_v53  ;;  %v704_v13 = vadd.f32 %v1405_v30, %v676_v55  ;;  %v686_v16 = vmul.f32 %v1012_v11, %v658_v51 }
 0x154   : > { %v687_v1 = vmul.f32 %v1012_v11, %v659_v15  ;;  %v688_v20 = vmul.f32 %v1012_v11, %v660_v17  ;;  %v705_v47 = vadd.f32 %v1405_v30, %v677_v56  ;;  %v689_v24 = vmul.f32 %v1012_v11, %v661_v18 }
 0x155   : > { %v690_v2 = vmul.f32 %v1012_v11, %v662_v31  ;;  %v691_v28 = vmul.f32 %v1012_v11, %v663_v32  ;;  %v706_v57 = vadd.f32 %v1405_v30, %v678_v6  ;;  %v692_v4 = vmul.f32 %v1012_v11, %v664_v49 }
 0x156   : > { %v1415_v5 = vmul.f32 %v1012_v11, %v665_v48  ;;  %v1417_v7 = vmul.f32 %v1012_v11, %v666_v52  ;;  %v707_v8 = vadd.f32 %v1405_v30, %v679_v9  ;;  %v1421_v10 = vmul.f32 %v1012_v11, %v667_v59 }
 0x157   : > { %v1423_v54 = vmul.f32 %v1012_v11, %v668_v63  ;;  %v708_v12 = vadd.f32 %v1405_v30, %v680_v58  ;;  %v752_v27 = vmul.f32 0.01, %v704_v13  ;;  %v1426_v19 = vmul.f32 %v1012_v11, %v669_v40 }
 0x158   : > { %v709_v21 = vadd.f32 %v1405_v30, %v681_v44  ;;  %vm728_vm7 = vcmp.ge.f32.partialorder %v704_v13, 0.0  ;;  %v753_v29 = vmul.f32 0.01, %v705_v47  ;;  %v1429_v36 = vmul.f32 %v1012_v11, %v670_v41 }
 0x159   : > { %v710_v22 = vadd.f32 %v1405_v30, %v682_v60  ;;  %vm729_vm8 = vcmp.ge.f32.partialorder %v705_v47, 0.0  ;;  %v754_v23 = vmul.f32 0.01, %v706_v57  ;;  %v1432_v26 = vmul.f32 %v1012_v11, %v671_v3 }
 0x15a   : > { %v711_v39 = vadd.f32 %v1405_v30, %v683_v61  ;;  %vm730_vm9 = vcmp.ge.f32.partialorder %v706_v57, 0.0  ;;  %v755_v33 = vmul.f32 0.01, %v707_v8  ;;  %v712_v37 = vadd.f32 %v1405_v30, %v684_v62 }
 0x15b   : > { %vm731_vm10 = vcmp.ge.f32.partialorder %v707_v8, 0.0  ;;  %v756_v38 = vmul.f32 0.01, %v708_v12  ;;  %v776_v40 = vsel %vm728_vm7, %v704_v13, %v752_v27  ;;  %v713_v41 = vadd.f32 %v1405_v30, %v685_v0 }
 0x15c   : > { %vm732_vm11 = vcmp.ge.f32.partialorder %v708_v12, 0.0  ;;  %v757_v25 = vmul.f32 0.01, %v709_v21  ;;  %v777_v11 = vsel %vm729_vm8, %v705_v47, %v753_v29  ;;  %v714_v43 = vadd.f32 %v1405_v30, %v686_v16  ;;  %800 = vst.msk [vmem:[%s1438_s15] sm:$0xff] %vm473_vm2, %v776_v40 }
 0x15d   : > { %vm733_vm12 = vcmp.ge.f32.partialorder %v709_v21, 0.0  ;;  %v758_v34 = vmul.f32 0.01, %v710_v22  ;;  %v778_v45 = vsel %vm730_vm9, %v706_v57, %v754_v23  ;;  %v715_v46 = vadd.f32 %v1405_v30, %v687_v1  ;;  %801 = vst.msk [vmem:[%s1438_s15 + $0x8] sm:$0xff] %vm473_vm2, %v777_v11 }
 0x15e   : > { %vm734_vm13 = vcmp.ge.f32.partialorder %v710_v22, 0.0  ;;  %v759_v50 = vmul.f32 0.01, %v711_v39  ;;  %v779_v42 = vsel %vm731_vm10, %v707_v8, %v755_v33  ;;  %v716_v35 = vadd.f32 %v1405_v30, %v688_v20  ;;  %802 = vst.msk [vmem:[%s1438_s15 + $0x10] sm:$0xff] %vm473_vm2, %v778_v45 }
 0x15f   : > { %vm735_vm14 = vcmp.ge.f32.partialorder %v711_v39, 0.0  ;;  %v760_v14 = vmul.f32 0.01, %v712_v37  ;;  %v780_v53 = vsel %vm732_vm11, %v708_v12, %v756_v38  ;;  %v717_v51 = vadd.f32 %v1405_v30, %v689_v24  ;;  %803 = vst.msk [vmem:[%s1438_s15 + $0x18] sm:$0xff] %vm473_vm2, %v779_v42 }
 0x160   : > { %vm736_vm15 = vcmp.ge.f32.partialorder %v712_v37, 0.0  ;;  %v761_v15 = vmul.f32 0.01, %v713_v41  ;;  %v781_v17 = vsel %vm733_vm12, %v709_v21, %v757_v25  ;;  %v718_v18 = vadd.f32 %v1405_v30, %v690_v2  ;;  %804 = vst.msk [vmem:[%s1438_s15 + $0x20] sm:$0xff] %vm473_vm2, %v780_v53 }
 0x161   : > { %vm737_vm0 = vcmp.ge.f32.partialorder %v713_v41, 0.0  ;;  %v762_v31 = vmul.f32 0.01, %v714_v43  ;;  %v782_v32 = vsel %vm734_vm13, %v710_v22, %v758_v34  ;;  %v719_v55 = vadd.f32 %v1405_v30, %v691_v28  ;;  %805 = vst.msk [vmem:[%s1438_s15 + $0x28] sm:$0xff] %vm473_vm2, %v781_v17 }
 0x162   : > { %vm738_vm1 = vcmp.ge.f32.partialorder %v714_v43, 0.0  ;;  %v763_v49 = vmul.f32 0.01, %v715_v46  ;;  %v783_v48 = vsel %vm735_vm14, %v711_v39, %v759_v50  ;;  %v720_v52 = vadd.f32 %v1405_v30, %v692_v4  ;;  %806 = vst.msk [vmem:[%s1438_s15 + $0x30] sm:$0xff] %vm473_vm2, %v782_v32 }
 0x163   : > { %vm739_vm3 = vcmp.ge.f32.partialorder %v715_v46, 0.0  ;;  %v764_v56 = vmul.f32 0.01, %v716_v35  ;;  %v784_v59 = vsel %vm736_vm15, %v712_v37, %v760_v14  ;;  %v721_v63 = vadd.f32 %v1405_v30, %v1415_v5  ;;  %807 = vst.msk [vmem:[%s1438_s15 + $0x38] sm:$0xff] %vm473_vm2, %v783_v48 }
 0x164   : > { %vm740_vm4 = vcmp.ge.f32.partialorder %v716_v35, 0.0  ;;  %v765_v3 = vmul.f32 0.01, %v717_v51  ;;  %v785_v6 = vsel %vm737_vm0, %v713_v41, %v761_v15  ;;  %v722_v9 = vadd.f32 %v1405_v30, %v1417_v7  ;;  %808 = vst.msk [vmem:[%s1438_s15 + $0x40] sm:$0xff] %vm473_vm2, %v784_v59 }
 0x165   : > { %vm741_vm5 = vcmp.ge.f32.partialorder %v717_v51, 0.0  ;;  %v766_v58 = vmul.f32 0.01, %v718_v18  ;;  %v786_v44 = vsel %vm738_vm1, %v714_v43, %v762_v31  ;;  %v723_v60 = vadd.f32 %v1405_v30, %v1421_v10  ;;  %809 = vst.msk [vmem:[%s1438_s15 + $0x48] sm:$0xff] %vm473_vm2, %v785_v6 }
 0x166   : > { %vm742_vm6 = vcmp.ge.f32.partialorder %v718_v18, 0.0  ;;  %v767_v61 = vmul.f32 0.01, %v719_v55  ;;  %v787_v62 = vsel %vm739_vm3, %v715_v46, %v763_v49  ;;  %v724_v0 = vadd.f32 %v1405_v30, %v1423_v54  ;;  %810 = vst.msk [vmem:[%s1438_s15 + $0x50] sm:$0xff] %vm473_vm2, %v786_v44 }
 0x167   : > { %vm743_vm7 = vcmp.ge.f32.partialorder %v719_v55, 0.0  ;;  %v768_v13 = vmul.f32 0.01, %v720_v52  ;;  %v788_v16 = vsel %vm740_vm4, %v716_v35, %v764_v56  ;;  %v725_v1 = vadd.f32 %v1405_v30, %v1426_v19  ;;  %811 = vst.msk [vmem:[%s1438_s15 + $0x58] sm:$0xff] %vm473_vm2, %v787_v62 }
 0x168   : > { %vm744_vm8 = vcmp.ge.f32.partialorder %v720_v52, 0.0  ;;  %v769_v20 = vmul.f32 0.01, %v721_v63  ;;  %v789_v47 = vsel %vm741_vm5, %v717_v51, %v765_v3  ;;  %v726_v24 = vadd.f32 %v1405_v30, %v1429_v36  ;;  %812 = vst.msk [vmem:[%s1438_s15 + $0x60] sm:$0xff] %vm473_vm2, %v788_v16 }
 0x169   : > { %vm745_vm9 = vcmp.ge.f32.partialorder %v721_v63, 0.0  ;;  %v770_v2 = vmul.f32 0.01, %v722_v9  ;;  %v790_v28 = vsel %vm742_vm6, %v718_v18, %v766_v58  ;;  %v727_v57 = vadd.f32 %v1405_v30, %v1432_v26  ;;  %813 = vst.msk [vmem:[%s1438_s15 + $0x68] sm:$0xff] %vm473_vm2, %v789_v47 }
 0x16a   : > { %vm746_vm10 = vcmp.ge.f32.partialorder %v722_v9, 0.0  ;;  %v771_v4 = vmul.f32 0.01, %v723_v60  ;;  %v791_v5 = vsel %vm743_vm7, %v719_v55, %v767_v61  ;;  %vm747_vm11 = vcmp.ge.f32.partialorder %v723_v60, 0.0  ;;  %814 = vst.msk [vmem:[%s1438_s15 + $0x70] sm:$0xff] %vm473_vm2, %v790_v28 }
 0x16b   : > { %v772_v7 = vmul.f32 0.01, %v724_v0  ;;  %v792_v8 = vsel %vm744_vm8, %v720_v52, %v768_v13  ;;  %vm748_vm12 = vcmp.ge.f32.partialorder %v724_v0, 0.0  ;;  %v773_v10 = vmul.f32 0.01, %v725_v1  ;;  %815 = vst.msk [vmem:[%s1438_s15 + $0x78] sm:$0xff] %vm473_vm2, %v791_v5 }
 0x16c   : > { %v793_v54 = vsel %vm745_vm9, %v721_v63, %v769_v20  ;;  %vm749_vm13 = vcmp.ge.f32.partialorder %v725_v1, 0.0  ;;  %v774_v30 = vmul.f32 0.01, %v726_v24  ;;  %v794_v12 = vsel %vm746_vm10, %v722_v9, %v770_v2  ;;  %816 = vst.msk [vmem:[%s1438_s15 + $0x80] sm:$0xff] %vm473_vm2, %v792_v8 }
 0x16d   : > { %vm750_vm14 = vcmp.ge.f32.partialorder %v726_v24, 0.0  ;;  %v775_v27 = vmul.f32 0.01, %v727_v57  ;;  %v795_v19 = vsel %vm747_vm11, %v723_v60, %v771_v4  ;;  %vm751_vm15 = vcmp.ge.f32.partialorder %v727_v57, 0.0  ;;  %817 = vst.msk [vmem:[%s1438_s15 + $0x88] sm:$0xff] %vm473_vm2, %v793_v54 }
 0x16e   : > { %v796_v21 = vsel %vm748_vm12, %v724_v0, %v772_v7  ;;  %v797_v29 = vsel %vm749_vm13, %v725_v1, %v773_v10  ;;  %818 = vst.msk [vmem:[%s1438_s15 + $0x90] sm:$0xff] %vm473_vm2, %v794_v12  ;;  %v798_v36 = vsel %vm750_vm14, %v726_v24, %v774_v30 }
 0x16f   : > { %819 = vst.msk [vmem:[%s1438_s15 + $0x98] sm:$0xff] %vm473_vm2, %v795_v19  ;;  %v799_v22 = vsel %vm751_vm15, %v727_v57, %v775_v27 }
 0x170   : > { %820 = vst.msk [vmem:[%s1438_s15 + $0xa0] sm:$0xff] %vm473_vm2, %v796_v21 }
 0x171   : > { %821 = vst.msk [vmem:[%s1438_s15 + $0xa8] sm:$0xff] %vm473_vm2, %v797_v29 }
 0x172   : > { %822 = vst.msk [vmem:[%s1438_s15 + $0xb0] sm:$0xff] %vm473_vm2, %v798_v36 }
 0x173   : > { %823 = vst.msk [vmem:[%s1438_s15 + $0xb8] sm:$0xff] %vm473_vm2, %v799_v22 }
 0x174 PF: > { %s15_s18 = sadd.s32 1, %s1024_s18  }
 0x175   : > { %p12_p4 = scmp.ge.s32.totalorder %s15_s18, 5  }
 0x177   :  { %14 = sbr.rel (!%p12_p4) target bundleno = 1 (0x1), region = 76 }

// kernel: tapnet_forward.7
= control target key start
LH: loop header
LB: loop body
LE: loop exit
PB: predicated region body
PF: predicated region fallthrough
CT: control target
= control target key end

     0   :  { %s965_s18 = smov 0   ;;  %s1391_s0 = inlined_call_operand.vmem [shape: bf16[3,176,48], index: 0, kind: input, shape index: {}]   ;;  %s1392_s1 = inlined_call_operand.vmem [shape: bf16[1,48,16], index: 1, kind: input, shape index: {}]   ;;  %s1393_s2 = inlined_call_operand.vmem [shape: f32[1,1,16], index: 2, kind: input, shape index: {}]   ;;  %s1394_s3 = inlined_call_operand.vmem [shape: f32[1,1,16], index: 3, kind: input, shape index: {}]   ;;  %s1395_s4 = inlined_call_operand.vmem [shape: f32[1,1,16], index: 4, kind: input, shape index: {}]   ;;  %s1396_s5 = inlined_call_operand.vmem [shape: f32[3,176,16], index: 5, kind: output, shape index: {}]  }
   0x1 LB: > { %s809_s19 = sadd.s32 4294967295, %s932_s18   ;;  %p813_p0 = scmp.ge.s32.totalorder %s932_s18, 1  ;;  %s932_s18 = sphi %s965_s18, %s15_s18  }
   0x2   : > { %p187_p1 = scmp.lt.s32.totalorder %s932_s18, 4 }
   0x4   : > { %p188_p2 = pnand %p813_p0, %p187_p1 }
   0x5   : > { %p215_p3 = scmp.lt.s32.totalorder (!%p188_p2), %s809_s19, 2 }
   0x6   : > { %191 = sbr.rel (%p188_p2) target bundleno = 359 (0x167), region = 40 }
   0xb   : > { %v898_v0 = vld [vmem:[%s1392_s1 + $0x10] sm:$0xff]  ;;  %v897_v1 = vld [vmem:[%s1392_s1 + $0x8] sm:$0xff]  ;;  %s1398_s19 = smov (!%p215_p3, %s809_s19), 2  ;;  %v896_v2 = vld [vmem:[%s1392_s1] sm:$0xff]  ;;  %vm331_vm0 = vcmask 392192   ;;  %vm429_vm1 = vcmask 130048  }
   0xc   : > { %370 = vmatpush.bf16.msra.mxu0 %v898_v0  ;;  %899 = vmatpush.bf16.msra.mxu1 %v898_v0  ;;  %s908_s24 = smul.u32 88, %s1398_s19  ;;  %v1002_v23 = vld [vmem:[%s1393_s2] ss:$0 sm:$0xff] }
   0xd   : > { %900 = vmatpush.bf16.msra.mxu2 %v898_v0  ;;  %901 = vmatpush.bf16.msra.mxu3 %v898_v0  ;;  %s909_s11 = smul.u32 176, %s1398_s19 }
   0xe   : > { %s219_s29 = scalar_lea.vmem %s1391_s0, %s908_s24 }
   0xf   : > { %v885_v3 = vld [vmem:[%s219_s29] sm:$0xff]  ;;  %v888_v4 = vld [vmem:[%s219_s29 + $0x18] sm:$0xff]  ;;  %v891_v5 = vld [vmem:[%s219_s29 + $0x30] sm:$0xff]  ;;  %s1314_s14 = scalar_lea.vmem %s1396_s5, %s909_s11 }
  0x10   : > { %371 = vmatpush.bf16.msra.mxu0 %v897_v1  ;;  %902 = vmatpush.bf16.msra.mxu1 %v897_v1  ;;  %v894_v6 = vld [vmem:[%s219_s29 + $0x48] sm:$0xff]  ;;  %v889_v8 = vld [vmem:[%s219_s29 + $0x20] sm:$0xff]  ;;  %v892_v9 = vld [vmem:[%s219_s29 + $0x38] sm:$0xff] }
  0x11   : > { %903 = vmatpush.bf16.msra.mxu2 %v897_v1  ;;  %904 = vmatpush.bf16.msra.mxu3 %v897_v1  ;;  %v886_v7 = vld [vmem:[%s219_s29 + $0x8] sm:$0xff]  ;;  %v895_v10 = vld [vmem:[%s219_s29 + $0x50] sm:$0xff]  ;;  %v893_v13 = vld [vmem:[%s219_s29 + $0x40] sm:$0xff] }
  0x12   : > { %v887_v11 = vld [vmem:[%s219_s29 + $0x10] sm:$0xff]  ;;  %v890_v12 = vld [vmem:[%s219_s29 + $0x28] sm:$0xff] }
  0x14   : > { %372 = vmatpush.bf16.msra.mxu0 %v896_v2  ;;  %905 = vmatpush.bf16.msra.mxu1 %v896_v2 }
  0x15   : > { %906 = vmatpush.bf16.msra.mxu2 %v896_v2  ;;  %907 = vmatpush.bf16.msra.mxu3 %v896_v2 }
  0x17   : > { %872 = vmatmul.msk.bf16.vlgmr.msra.gmra.mxu0 %vm331_vm0, %v885_v3  ;;  %875 = vmatmul.msk.bf16.vlgmr.msra.gmra.mxu1 %vm331_vm0, %v888_v4 }
  0x18   : > { %878 = vmatmul.msk.bf16.vlgmr.msra.gmra.mxu2 %vm331_vm0, %v891_v5  ;;  %881 = vmatmul.msk.bf16.vlgmr.msra.gmra.mxu3 %vm331_vm0, %v894_v6 }
  0x27   : > { %873 = vmatmul.msk.bf16.gmra.mxu0 %vm331_vm0, %v886_v7  ;;  %876 = vmatmul.msk.bf16.gmra.mxu1 %vm331_vm0, %v889_v8 }
  0x28   : > { %879 = vmatmul.msk.bf16.gmra.mxu2 %vm331_vm0, %v892_v9  ;;  %882 = vmatmul.msk.bf16.gmra.mxu3 %vm331_vm0, %v895_v10 }
  0x37   : > { %874 = vmatmul.msk.bf16.gmra.mxu0 %vm331_vm0, %v887_v11  ;;  %877 = vmatmul.msk.bf16.gmra.mxu1 %vm331_vm0, %v890_v12 }
  0x38   : > { %880 = vmatmul.msk.bf16.gmra.mxu2 %vm331_vm0, %v893_v13 }
  0x94   : > { %v374_v14 = vpop.f32.mrf.mxu0  ;;  %v389_v15 = vpop.f32.mrf.mxu1 }
  0x95   : > { %v1008_v27 = vadd.f32 %v1002_v23, %v374_v14  ;;  %v1030_v44 = vadd.f32 %v1002_v23, %v389_v15 }
  0x97   : > { %v430_v32 = vsel %vm429_vm1, %v1008_v27, 0.0  ;;  %v441_v50 = vsel %vm429_vm1, %v1030_v44, 0.0 }
  0x9b   : > { %v404_v18 = vpop.f32.mrf.mxu2  ;;  %v419_v39 = vpop.f32.mrf.mxu3 }
  0x9c   : > { %v376_v16 = vpop.f32.mrf.mxu0  ;;  %v391_v17 = vpop.f32.mrf.mxu1  ;;  %v1061_v1 = vadd.f32 %v1002_v23, %v404_v18 }
  0x9d   : > { %v1005_v25 = vadd.f32 %v1002_v23, %v376_v16  ;;  %v1036_v47 = vadd.f32 %v1002_v23, %v391_v17 }
  0x9e   : > { %v453_v7 = vsel %vm429_vm1, %v1061_v1, 0.0 }
  0x9f   : > { %v431_v30 = vsel %vm429_vm1, %v1005_v25, 0.0  ;;  %v443_v53 = vsel %vm429_vm1, %v1036_v47, 0.0 }
  0xa0   : > { %v432_v35 = vadd.f32 %v431_v30, %v430_v32 }
  0xa3   : > { %v406_v21 = vpop.f32.mrf.mxu2  ;;  %v421_v57 = vpop.f32.mrf.mxu3 }
  0xa4   : > { %v379_v19 = vpop.f32.mrf.mxu0  ;;  %v394_v20 = vpop.f32.mrf.mxu1  ;;  %v1066_v4 = vadd.f32 %v1002_v23, %v406_v21 }
  0xa5   : > { %v1011_v28 = vadd.f32 %v1002_v23, %v379_v19  ;;  %v1043_v51 = vadd.f32 %v1002_v23, %v394_v20  ;;  %v934_v20 = vmov 176.0  }
  0xa6   : > { %v455_v11 = vsel %vm429_vm1, %v1066_v4, 0.0  ;;  %922 = vrcp.f32 %v934_v20 }
  0xa7   : > { %v433_v33 = vsel %vm429_vm1, %v1011_v28, 0.0  ;;  %v445_v58 = vsel %vm429_vm1, %v1043_v51, 0.0 }
  0xa8   : > { %v434_v37 = vadd.f32 %v433_v33, %v432_v35 }
  0xab   : > { %v409_v26 = vpop.f32.mrf.mxu2  ;;  %v424_v10 = vpop.f32.mrf.mxu3 }
  0xac   : > { %v381_v22 = vpop.f32.mrf.mxu0  ;;  %v396_v24 = vpop.f32.mrf.mxu1  ;;  %v1073_v8 = vadd.f32 %v1002_v23, %v409_v26 }
  0xad   : > { %v1016_v31 = vadd.f32 %v1002_v23, %v381_v22  ;;  %v1048_v54 = vadd.f32 %v1002_v23, %v396_v24  ;;  %v1091_v22 = vadd.f32 %v1002_v23, %v419_v39  ;;  %v923_v35 = vpop.eup %922 }
  0xae   : > { %v457_v15 = vsel %vm429_vm1, %v1073_v8, 0.0  ;;  %vm484_vm2 = vweird.f32 %v923_v35 }
  0xaf   : > { %v435_v36 = vsel %vm429_vm1, %v1016_v31, 0.0  ;;  %v447_v62 = vsel %vm429_vm1, %v1048_v54, 0.0 }
  0xb0   : > { %v436_v41 = vadd.f32 %v435_v36, %v434_v37  ;;  %v465_v36 = vsel %vm429_vm1, %v1091_v22, 0.0  ;;  %v1103_v37 = vadd.f32 %v1002_v23, %v424_v10 }
  0xb3   : > { %v411_v43 = vpop.f32.mrf.mxu2  ;;  %v426_v33 = vpop.f32.mrf.mxu3 }
  0xb4   : > { %v384_v29 = vpop.f32.mrf.mxu0  ;;  %v399_v38 = vpop.f32.mrf.mxu1  ;;  %v1078_v12 = vadd.f32 %v1002_v23, %v411_v43  ;;  %v469_v43 = vsel %vm429_vm1, %v1103_v37, 0.0 }
  0xb5   : > { %v1023_v34 = vadd.f32 %v1002_v23, %v384_v29  ;;  %v1053_v59 = vadd.f32 %v1002_v23, %v399_v38  ;;  %v1096_v29 = vadd.f32 %v1002_v23, %v421_v57 }
  0xb6   : > { %v459_v18 = vsel %vm429_vm1, %v1078_v12, 0.0 }
  0xb7   : > { %v437_v40 = vsel %vm429_vm1, %v1023_v34, 0.0  ;;  %v449_v2 = vsel %vm429_vm1, %v1053_v59, 0.0  ;;  %v467_v39 = vsel %vm429_vm1, %v1096_v29, 0.0 }
  0xb8   : > { %v438_v46 = vadd.f32 %v437_v40, %v436_v41  ;;  %v1108_v40 = vadd.f32 %v1002_v23, %v426_v33 }
  0xbb   : > { %v414_v61 = vpop.f32.mrf.mxu2 }
  0xbc   : > { %v386_v42 = vpop.f32.mrf.mxu0  ;;  %v401_v56 = vpop.f32.mrf.mxu1  ;;  %v1083_v16 = vadd.f32 %v1002_v23, %v414_v61 }
  0xbd   : > { %v1033_v45 = vadd.f32 %v1002_v23, %v386_v42  ;;  %v1058_v63 = vadd.f32 %v1002_v23, %v401_v56  ;;  %v480_v42 = vmul.f32 176.0, %v923_v35 }
  0xbe   : > { %v461_v24 = vsel %vm429_vm1, %v1083_v16, 0.0 }
  0xbf   : > { %v439_v48 = vsel %vm429_vm1, %v1033_v45, 0.0  ;;  %v451_v5 = vsel %vm429_vm1, %v1058_v63, 0.0 }
  0xc0   : > { %v440_v49 = vadd.f32 %v439_v48, %v438_v46  ;;  %v471_v48 = vsel %vm429_vm1, %v1108_v40, 0.0 }
  0xc2   : > { %v442_v52 = vadd.f32 %v441_v50, %v440_v49  ;;  %v481_v50 = vsub.f32 1.0, %v480_v42 }
  0xc3   : > { %v416_v14 = vpop.f32.mrf.mxu2 }
  0xc4   : > { %v444_v55 = vadd.f32 %v443_v53, %v442_v52  ;;  %v1088_v19 = vadd.f32 %v1002_v23, %v416_v14 }
  0xc6   : > { %v446_v60 = vadd.f32 %v445_v58, %v444_v55  ;;  %v463_v30 = vsel %vm429_vm1, %v1088_v19, 0.0  ;;  %v482_v55 = vmul.f32 %v923_v35, %v481_v50 }
  0xc8   : > { %v448_v0 = vadd.f32 %v447_v62, %v446_v60  ;;  %v483_v58 = vadd.f32 %v923_v35, %v482_v55 }
  0xca   : > { %v450_v3 = vadd.f32 %v449_v2, %v448_v0  ;;  %v1114_v61 = vsel %vm484_vm2, %v923_v35, %v483_v58 }
  0xcc   : > { %v452_v6 = vadd.f32 %v451_v5, %v450_v3 }
  0xce   : > { %v454_v9 = vadd.f32 %v453_v7, %v452_v6 }
  0xd0   : > { %v456_v13 = vadd.f32 %v455_v11, %v454_v9 }
  0xd2   : > { %v458_v17 = vadd.f32 %v457_v15, %v456_v13 }
  0xd4   : > { %v460_v21 = vadd.f32 %v459_v18, %v458_v17 }
  0xd6   : > { %v462_v26 = vadd.f32 %v461_v24, %v460_v21 }
  0xd8   : > { %v464_v32 = vadd.f32 %v463_v30, %v462_v26 }
  0xda   : > { %v466_v38 = vadd.f32 %v465_v36, %v464_v32 }
  0xdc   : > { %v468_v41 = vadd.f32 %v467_v39, %v466_v38 }
  0xde   : > { %v470_v46 = vadd.f32 %v469_v43, %v468_v41 }
  0xe0   : > { %v472_v49 = vadd.f32 %v471_v48, %v470_v46 }
  0xe2   : > { %v473_v52 = vrot.slane %v472_v49, 4 }
  0xe4   : > { %v474_v53 = vadd.f32 %v473_v52, %v472_v49 }
  0xe6   : > { %v475_v56 = vrot.slane %v474_v53, 2 }
  0xe8   : > { %v476_v57 = vadd.f32 %v475_v56, %v474_v53 }
  0xea   : > { %v477_v23 = vrot.slane %v476_v57, 1 }
  0xec   : > { %v478_v60 = vadd.f32 %v477_v23, %v476_v57 }
  0xee   : > { %v1117_v62 = vmul.f32 %v1114_v61, %v478_v60 }
  0xf0   : > { %v1121_v0 = vsub.f32 %v1008_v27, %v1117_v62  ;;  %v1125_v2 = vsub.f32 %v1005_v25, %v1117_v62  ;;  %v1129_v3 = vsub.f32 %v1011_v28, %v1117_v62  ;;  %v1133_v5 = vsub.f32 %v1016_v31, %v1117_v62 }
  0xf1   : > { %v1141_v27 = vsub.f32 %v1023_v34, %v1117_v62  ;;  %v1147_v28 = vsub.f32 %v1033_v45, %v1117_v62  ;;  %v1155_v13 = vsub.f32 %v1030_v44, %v1117_v62  ;;  %v1162_v45 = vsub.f32 %v1036_v47, %v1117_v62 }
  0xf2   : > { %v509_v6 = vmul.f32 %v1121_v0, %v1121_v0  ;;  %v510_v7 = vmul.f32 %v1125_v2, %v1125_v2  ;;  %v511_v25 = vmul.f32 %v1129_v3, %v1129_v3  ;;  %v512_v31 = vmul.f32 %v1133_v5, %v1133_v5 }
  0xf3   : > { %v513_v34 = vmul.f32 %v1141_v27, %v1141_v27  ;;  %v514_v17 = vmul.f32 %v1147_v28, %v1147_v28  ;;  %v1169_v44 = vsub.f32 %v1043_v51, %v1117_v62  ;;  %v515_v21 = vmul.f32 %v1155_v13, %v1155_v13 }
  0xf4   : > { %v531_v9 = vsel %vm429_vm1, %v509_v6, 0.0  ;;  %v532_v10 = vsel %vm429_vm1, %v510_v7, 0.0  ;;  %v534_v14 = vsel %vm429_vm1, %v511_v25, 0.0  ;;  %v536_v18 = vsel %vm429_vm1, %v512_v31, 0.0 }
  0xf5   : > { %v533_v11 = vadd.f32 %v532_v10, %v531_v9  ;;  %v538_v24 = vsel %vm429_vm1, %v513_v34, 0.0  ;;  %v1176_v47 = vsub.f32 %v1048_v54, %v1117_v62  ;;  %v516_v30 = vmul.f32 %v1162_v45, %v1162_v45 }
  0xf6   : > { %v540_v32 = vsel %vm429_vm1, %v514_v17, 0.0  ;;  %v1183_v51 = vsub.f32 %v1053_v59, %v1117_v62  ;;  %v517_v35 = vmul.f32 %v1169_v44, %v1169_v44  ;;  %v542_v36 = vsel %vm429_vm1, %v515_v21, 0.0 }
  0xf7   : > { %v535_v15 = vadd.f32 %v534_v14, %v533_v11  ;;  %v1190_v54 = vsub.f32 %v1058_v63, %v1117_v62  ;;  %v518_v39 = vmul.f32 %v1176_v47, %v1176_v47  ;;  %v544_v41 = vsel %vm429_vm1, %v516_v30, 0.0 }
  0xf8   : > { %v1197_v59 = vsub.f32 %v1061_v1, %v1117_v62  ;;  %v519_v43 = vmul.f32 %v1183_v51, %v1183_v51  ;;  %v546_v46 = vsel %vm429_vm1, %v517_v35, 0.0  ;;  %v1204_v63 = vsub.f32 %v1066_v4, %v1117_v62 }
  0xf9   : > { %v537_v20 = vadd.f32 %v536_v18, %v535_v15  ;;  %v520_v49 = vmul.f32 %v1190_v54, %v1190_v54  ;;  %v548_v50 = vsel %vm429_vm1, %v518_v39, 0.0  ;;  %v1211_v1 = vsub.f32 %v1073_v8, %v1117_v62 }
  0xfa   : > { %v521_v53 = vmul.f32 %v1197_v59, %v1197_v59  ;;  %v550_v55 = vsel %vm429_vm1, %v519_v43, 0.0  ;;  %v1218_v4 = vsub.f32 %v1078_v12, %v1117_v62  ;;  %v522_v57 = vmul.f32 %v1204_v63, %v1204_v63 }
  0xfb   : > { %v539_v26 = vadd.f32 %v538_v24, %v537_v20  ;;  %v552_v58 = vsel %vm429_vm1, %v520_v49, 0.0  ;;  %v1225_v8 = vsub.f32 %v1083_v16, %v1117_v62  ;;  %v523_v60 = vmul.f32 %v1211_v1, %v1211_v1 }
  0xfc   : > { %v554_v6 = vsel %vm429_vm1, %v521_v53, 0.0  ;;  %v1232_v12 = vsub.f32 %v1088_v19, %v1117_v62  ;;  %v524_v25 = vmul.f32 %v1218_v4, %v1218_v4  ;;  %v556_v31 = vsel %vm429_vm1, %v522_v57, 0.0 }
  0xfd   : > { %v541_v33 = vadd.f32 %v540_v32, %v539_v26  ;;  %v1239_v16 = vsub.f32 %v1091_v22, %v1117_v62  ;;  %v525_v10 = vmul.f32 %v1225_v8, %v1225_v8  ;;  %v558_v11 = vsel %vm429_vm1, %v523_v60, 0.0 }
  0xfe   : > { %v1246_v19 = vsub.f32 %v1096_v29, %v1117_v62  ;;  %v526_v14 = vmul.f32 %v1232_v12, %v1232_v12  ;;  %v560_v15 = vsel %vm429_vm1, %v524_v25, 0.0  ;;  %v507_v22 = vsub.f32 %v1103_v37, %v1117_v62  ;;  %v920_v25 = vld [vmem:[%s1394_s3] ss:$0 sm:$0xff] }
  0xff   : > { %v543_v38 = vadd.f32 %v542_v36, %v541_v33  ;;  %v527_v18 = vmul.f32 %v1239_v16, %v1239_v16  ;;  %v562_v20 = vsel %vm429_vm1, %v525_v10, 0.0  ;;  %v508_v24 = vsub.f32 %v1108_v40, %v1117_v62 }
 0x100   : > { %v528_v29 = vmul.f32 %v1246_v19, %v1246_v19  ;;  %v564_v26 = vsel %vm429_vm1, %v526_v14, 0.0  ;;  %v529_v32 = vmul.f32 %v507_v22, %v507_v22 }
 0x101   : > { %v545_v42 = vadd.f32 %v544_v41, %v543_v38  ;;  %v566_v33 = vsel %vm429_vm1, %v527_v18, 0.0  ;;  %v530_v37 = vmul.f32 %v508_v24, %v508_v24 }
 0x102   : > { %v568_v36 = vsel %vm429_vm1, %v528_v29, 0.0  ;;  %v570_v39 = vsel %vm429_vm1, %v529_v32, 0.0 }
 0x103   : > { %v547_v48 = vadd.f32 %v546_v46, %v545_v42  ;;  %v572_v42 = vsel %vm429_vm1, %v530_v37, 0.0 }
 0x105   : > { %v549_v52 = vadd.f32 %v548_v50, %v547_v48 }
 0x107   : > { %v551_v56 = vadd.f32 %v550_v55, %v549_v52 }
 0x109   : > { %v553_v23 = vadd.f32 %v552_v58, %v551_v56 }
 0x10b   : > { %v555_v7 = vadd.f32 %v554_v6, %v553_v23 }
 0x10d   : > { %v557_v9 = vadd.f32 %v556_v31, %v555_v7 }
 0x10f   : > { %v559_v34 = vadd.f32 %v558_v11, %v557_v9 }
 0x111   : > { %v561_v17 = vadd.f32 %v560_v15, %v559_v34 }
 0x113   : > { %v563_v21 = vadd.f32 %v562_v20, %v561_v17 }
 0x115   : > { %v565_v30 = vadd.f32 %v564_v26, %v563_v21 }
 0x117   : > { %v567_v35 = vadd.f32 %v566_v33, %v565_v30 }
 0x119   : > { %v569_v38 = vadd.f32 %v568_v36, %v567_v35 }
 0x11b   : > { %v571_v41 = vadd.f32 %v570_v39, %v569_v38 }
 0x11d   : > { %v573_v40 = vadd.f32 %v572_v42, %v571_v41 }
 0x11f   : > { %v574_v62 = vrot.slane %v573_v40, 4 }
 0x121   : > { %v575_v43 = vadd.f32 %v574_v62, %v573_v40 }
 0x123   : > { %v576_v46 = vrot.slane %v575_v43, 2 }
 0x125   : > { %v577_v48 = vadd.f32 %v576_v46, %v575_v43 }
 0x127   : > { %v578_v49 = vrot.slane %v577_v48, 1 }
 0x129   : > { %v579_v50 = vadd.f32 %v578_v49, %v577_v48 }
 0x12b   : > { %v580_v52 = vmul.f32 %v579_v50, %v1114_v61 }
 0x12d   : > { %v581_v53 = vadd.f32 1e-05, %v580_v52 }
 0x12f   : > { %924 = vrsqrt.f32 %v581_v53  ;;  %vm588_vm4 = vweird.f32 %v581_v53 }
 0x135   : > { %v925_v55 = vpop.eup %924 }
 0x136   : > { %v583_v56 = vmul.f32 %v925_v55, %v581_v53  ;;  %vm589_vm3 = vweird.f32 %v925_v55 }
 0x137   : > { %vm590_vm5 = vmor %vm588_vm4, %vm589_vm3 }
 0x138   : > { %v584_v57 = vmul.f32 %v925_v55, %v583_v56 }
 0x13a   : > { %v585_v58 = vmul.f32 0.5, %v584_v57 }
 0x13c   : > { %v586_v23 = vsub.f32 1.5, %v585_v58 }
 0x13e   : > { %v587_v60 = vmul.f32 %v925_v55, %v586_v23 }
 0x140   : > { %v591_v6 = vsel %vm590_vm5, %v925_v55, %v587_v60 }
 0x141   : > { %v592_v7 = vmul.f32 %v591_v6, %v1121_v0  ;;  %v593_v61 = vmul.f32 %v591_v6, %v1125_v2  ;;  %v594_v31 = vmul.f32 %v591_v6, %v1129_v3  ;;  %v595_v9 = vmul.f32 %v591_v6, %v1133_v5 }
 0x142   : > { %v596_v10 = vmul.f32 %v591_v6, %v1141_v27  ;;  %v597_v11 = vmul.f32 %v591_v6, %v1147_v28  ;;  %v598_v34 = vmul.f32 %v591_v6, %v1155_v13  ;;  %v599_v14 = vmul.f32 %v591_v6, %v1162_v45  ;;  %v1286_v27 = vld [vmem:[%s1395_s4] ss:$0 sm:$0xff] }
 0x143   : > { %v600_v0 = vmul.f32 %v591_v6, %v1169_v44  ;;  %v601_v15 = vmul.f32 %v591_v6, %v1176_v47  ;;  %v602_v17 = vmul.f32 %v591_v6, %v1183_v51  ;;  %v603_v2 = vmul.f32 %v591_v6, %v1190_v54 }
 0x144   : > { %v604_v3 = vmul.f32 %v591_v6, %v1197_v59  ;;  %v605_v5 = vmul.f32 %v591_v6, %v1204_v63  ;;  %v618_v18 = vmul.f32 %v920_v25, %v592_v7  ;;  %v606_v28 = vmul.f32 %v591_v6, %v1211_v1 }
 0x145   : > { %v607_v13 = vmul.f32 %v591_v6, %v1218_v4  ;;  %v608_v45 = vmul.f32 %v591_v6, %v1225_v8  ;;  %v619_v44 = vmul.f32 %v920_v25, %v593_v61  ;;  %v609_v47 = vmul.f32 %v591_v6, %v1232_v12 }
 0x146   : > { %v610_v51 = vmul.f32 %v591_v6, %v1239_v16  ;;  %v611_v54 = vmul.f32 %v591_v6, %v1246_v19  ;;  %v620_v59 = vmul.f32 %v920_v25, %v594_v31  ;;  %v612_v63 = vmul.f32 %v591_v6, %v507_v22 }
 0x147   : > { %v613_v20 = vmul.f32 %v591_v6, %v508_v24  ;;  %v621_v21 = vmul.f32 %v920_v25, %v595_v9  ;;  %v622_v29 = vmul.f32 %v920_v25, %v596_v10  ;;  %v623_v26 = vmul.f32 %v920_v25, %v597_v11 }
 0x148   : > { %v624_v30 = vmul.f32 %v920_v25, %v598_v34  ;;  %v625_v1 = vmul.f32 %v920_v25, %v599_v14  ;;  %v644_v4 = vadd.f32 %v1286_v27, %v618_v18  ;;  %v626_v32 = vmul.f32 %v920_v25, %v600_v0 }
 0x149   : > { %v627_v8 = vmul.f32 %v920_v25, %v601_v15  ;;  %v628_v33 = vmul.f32 %v920_v25, %v602_v17  ;;  %v645_v12 = vadd.f32 %v1286_v27, %v619_v44  ;;  %v629_v35 = vmul.f32 %v920_v25, %v603_v2 }
 0x14a   : > { %v630_v16 = vmul.f32 %v920_v25, %v604_v3  ;;  %v631_v37 = vmul.f32 %v920_v25, %v605_v5  ;;  %v646_v19 = vadd.f32 %v1286_v27, %v620_v59  ;;  %v632_v22 = vmul.f32 %v920_v25, %v606_v28 }
 0x14b   : > { %v633_v24 = vmul.f32 %v920_v25, %v607_v13  ;;  %v634_v36 = vmul.f32 %v920_v25, %v608_v45  ;;  %v647_v38 = vadd.f32 %v1286_v27, %v621_v21  ;;  %v635_v39 = vmul.f32 %v920_v25, %v609_v47 }
 0x14c   : > { %v1299_v41 = vmul.f32 %v920_v25, %v610_v51  ;;  %v648_v42 = vadd.f32 %v1286_v27, %v622_v29  ;;  %v688_v40 = vmul.f32 0.01, %v644_v4  ;;  %v1302_v62 = vmul.f32 %v920_v25, %v611_v54 }
 0x14d   : > { %v649_v43 = vadd.f32 %v1286_v27, %v623_v26  ;;  %vm666_vm6 = vcmp.ge.f32.partialorder %v644_v4, 0.0  ;;  %v689_v46 = vmul.f32 0.01, %v645_v12  ;;  %v1305_v48 = vmul.f32 %v920_v25, %v612_v63 }
 0x14e   : > { %v650_v49 = vadd.f32 %v1286_v27, %v624_v30  ;;  %vm667_vm7 = vcmp.ge.f32.partialorder %v645_v12, 0.0  ;;  %v690_v50 = vmul.f32 0.01, %v646_v19  ;;  %v1308_v52 = vmul.f32 %v920_v25, %v613_v20 }
 0x14f   : > { %v651_v53 = vadd.f32 %v1286_v27, %v625_v1  ;;  %vm668_vm8 = vcmp.ge.f32.partialorder %v646_v19, 0.0  ;;  %v691_v55 = vmul.f32 0.01, %v647_v38  ;;  %v652_v56 = vadd.f32 %v1286_v27, %v626_v32 }
 0x150   : > { %vm669_vm9 = vcmp.ge.f32.partialorder %v647_v38, 0.0  ;;  %v692_v57 = vmul.f32 0.01, %v648_v42  ;;  %v710_v58 = vsel %vm666_vm6, %v644_v4, %v688_v40  ;;  %v653_v23 = vadd.f32 %v1286_v27, %v627_v8 }
 0x151   : > { %vm670_vm10 = vcmp.ge.f32.partialorder %v648_v42, 0.0  ;;  %v693_v60 = vmul.f32 0.01, %v649_v43  ;;  %v711_v6 = vsel %vm667_vm7, %v645_v12, %v689_v46  ;;  %v654_v7 = vadd.f32 %v1286_v27, %v628_v33  ;;  %732 = vst.msk [vmem:[%s1314_s14] sm:$0xff] %vm429_vm1, %v710_v58 }
 0x152   : > { %vm671_vm11 = vcmp.ge.f32.partialorder %v649_v43, 0.0  ;;  %v694_v25 = vmul.f32 0.01, %v650_v49  ;;  %v712_v61 = vsel %vm668_vm8, %v646_v19, %v690_v50  ;;  %v655_v31 = vadd.f32 %v1286_v27, %v629_v35  ;;  %733 = vst.msk [vmem:[%s1314_s14 + $0x8] sm:$0xff] %vm429_vm1, %v711_v6 }
 0x153   : > { %vm672_vm12 = vcmp.ge.f32.partialorder %v650_v49, 0.0  ;;  %v695_v9 = vmul.f32 0.01, %v651_v53  ;;  %v713_v10 = vsel %vm669_vm9, %v647_v38, %v691_v55  ;;  %v656_v11 = vadd.f32 %v1286_v27, %v630_v16  ;;  %734 = vst.msk [vmem:[%s1314_s14 + $0x10] sm:$0xff] %vm429_vm1, %v712_v61 }
 0x154   : > { %vm673_vm13 = vcmp.ge.f32.partialorder %v651_v53, 0.0  ;;  %v696_v34 = vmul.f32 0.01, %v652_v56  ;;  %v714_v14 = vsel %vm670_vm10, %v648_v42, %v692_v57  ;;  %v657_v0 = vadd.f32 %v1286_v27, %v631_v37  ;;  %735 = vst.msk [vmem:[%s1314_s14 + $0x18] sm:$0xff] %vm429_vm1, %v713_v10 }
 0x155   : > { %vm674_vm14 = vcmp.ge.f32.partialorder %v652_v56, 0.0  ;;  %v697_v15 = vmul.f32 0.01, %v653_v23  ;;  %v715_v17 = vsel %vm671_vm11, %v649_v43, %v693_v60  ;;  %v658_v2 = vadd.f32 %v1286_v27, %v632_v22  ;;  %736 = vst.msk [vmem:[%s1314_s14 + $0x20] sm:$0xff] %vm429_vm1, %v714_v14 }
 0x156   : > { %vm675_vm15 = vcmp.ge.f32.partialorder %v653_v23, 0.0  ;;  %v698_v3 = vmul.f32 0.01, %v654_v7  ;;  %v716_v5 = vsel %vm672_vm12, %v650_v49, %v694_v25  ;;  %v659_v18 = vadd.f32 %v1286_v27, %v633_v24  ;;  %737 = vst.msk [vmem:[%s1314_s14 + $0x28] sm:$0xff] %vm429_vm1, %v715_v17 }
 0x157   : > { %vm676_vm0 = vcmp.ge.f32.partialorder %v654_v7, 0.0  ;;  %v699_v28 = vmul.f32 0.01, %v655_v31  ;;  %v717_v13 = vsel %vm673_vm13, %v651_v53, %v695_v9  ;;  %v660_v45 = vadd.f32 %v1286_v27, %v634_v36  ;;  %738 = vst.msk [vmem:[%s1314_s14 + $0x30] sm:$0xff] %vm429_vm1, %v716_v5 }
 0x158   : > { %vm677_vm2 = vcmp.ge.f32.partialorder %v655_v31, 0.0  ;;  %v700_v44 = vmul.f32 0.01, %v656_v11  ;;  %v718_v47 = vsel %vm674_vm14, %v652_v56, %v696_v34  ;;  %v661_v51 = vadd.f32 %v1286_v27, %v635_v39  ;;  %739 = vst.msk [vmem:[%s1314_s14 + $0x38] sm:$0xff] %vm429_vm1, %v717_v13 }
 0x159   : > { %vm678_vm3 = vcmp.ge.f32.partialorder %v656_v11, 0.0  ;;  %v701_v54 = vmul.f32 0.01, %v657_v0  ;;  %v719_v59 = vsel %vm675_vm15, %v653_v23, %v697_v15  ;;  %v662_v63 = vadd.f32 %v1286_v27, %v1299_v41  ;;  %740 = vst.msk [vmem:[%s1314_s14 + $0x40] sm:$0xff] %vm429_vm1, %v718_v47 }
 0x15a   : > { %vm679_vm4 = vcmp.ge.f32.partialorder %v657_v0, 0.0  ;;  %v702_v20 = vmul.f32 0.01, %v658_v2  ;;  %v720_v21 = vsel %vm676_vm0, %v654_v7, %v698_v3  ;;  %v663_v29 = vadd.f32 %v1286_v27, %v1302_v62  ;;  %741 = vst.msk [vmem:[%s1314_s14 + $0x48] sm:$0xff] %vm429_vm1, %v719_v59 }
 0x15b   : > { %vm680_vm5 = vcmp.ge.f32.partialorder %v658_v2, 0.0  ;;  %v703_v26 = vmul.f32 0.01, %v659_v18  ;;  %v721_v30 = vsel %vm677_vm2, %v655_v31, %v699_v28  ;;  %v664_v1 = vadd.f32 %v1286_v27, %v1305_v48  ;;  %742 = vst.msk [vmem:[%s1314_s14 + $0x50] sm:$0xff] %vm429_vm1, %v720_v21 }
 0x15c   : > { %vm681_vm6 = vcmp.ge.f32.partialorder %v659_v18, 0.0  ;;  %v704_v4 = vmul.f32 0.01, %v660_v45  ;;  %v722_v32 = vsel %vm678_vm3, %v656_v11, %v700_v44  ;;  %v665_v8 = vadd.f32 %v1286_v27, %v1308_v52  ;;  %743 = vst.msk [vmem:[%s1314_s14 + $0x58] sm:$0xff] %vm429_vm1, %v721_v30 }
 0x15d   : > { %vm682_vm7 = vcmp.ge.f32.partialorder %v660_v45, 0.0  ;;  %v705_v33 = vmul.f32 0.01, %v661_v51  ;;  %v723_v12 = vsel %vm679_vm4, %v657_v0, %v701_v54  ;;  %vm683_vm8 = vcmp.ge.f32.partialorder %v661_v51, 0.0  ;;  %744 = vst.msk [vmem:[%s1314_s14 + $0x60] sm:$0xff] %vm429_vm1, %v722_v32 }
 0x15e   : > { %v706_v35 = vmul.f32 0.01, %v662_v63  ;;  %v724_v16 = vsel %vm680_vm5, %v658_v2, %v702_v20  ;;  %vm684_vm9 = vcmp.ge.f32.partialorder %v662_v63, 0.0  ;;  %v707_v37 = vmul.f32 0.01, %v663_v29  ;;  %745 = vst.msk [vmem:[%s1314_s14 + $0x68] sm:$0xff] %vm429_vm1, %v723_v12 }
 0x15f   : > { %v725_v19 = vsel %vm681_vm6, %v659_v18, %v703_v26  ;;  %vm685_vm10 = vcmp.ge.f32.partialorder %v663_v29, 0.0  ;;  %v708_v27 = vmul.f32 0.01, %v664_v1  ;;  %v726_v22 = vsel %vm682_vm7, %v660_v45, %v704_v4  ;;  %746 = vst.msk [vmem:[%s1314_s14 + $0x70] sm:$0xff] %vm429_vm1, %v724_v16 }
 0x160   : > { %vm686_vm11 = vcmp.ge.f32.partialorder %v664_v1, 0.0  ;;  %v709_v24 = vmul.f32 0.01, %v665_v8  ;;  %v727_v36 = vsel %vm683_vm8, %v661_v51, %v705_v33  ;;  %vm687_vm12 = vcmp.ge.f32.partialorder %v665_v8, 0.0  ;;  %747 = vst.msk [vmem:[%s1314_s14 + $0x78] sm:$0xff] %vm429_vm1, %v725_v19 }
 0x161   : > { %v728_v38 = vsel %vm684_vm9, %v662_v63, %v706_v35  ;;  %v729_v39 = vsel %vm685_vm10, %v663_v29, %v707_v37  ;;  %748 = vst.msk [vmem:[%s1314_s14 + $0x80] sm:$0xff] %vm429_vm1, %v726_v22  ;;  %v730_v41 = vsel %vm686_vm11, %v664_v1, %v708_v27 }
 0x162   : > { %749 = vst.msk [vmem:[%s1314_s14 + $0x88] sm:$0xff] %vm429_vm1, %v727_v36  ;;  %v731_v42 = vsel %vm687_vm12, %v665_v8, %v709_v24 }
 0x163   : > { %750 = vst.msk [vmem:[%s1314_s14 + $0x90] sm:$0xff] %vm429_vm1, %v728_v38 }
 0x164   : > { %751 = vst.msk [vmem:[%s1314_s14 + $0x98] sm:$0xff] %vm429_vm1, %v729_v39 }
 0x165   : > { %752 = vst.msk [vmem:[%s1314_s14 + $0xa0] sm:$0xff] %vm429_vm1, %v730_v41 }
 0x166   : > { %753 = vst.msk [vmem:[%s1314_s14 + $0xa8] sm:$0xff] %vm429_vm1, %v731_v42 }
 0x167 PF: > { %s15_s18 = sadd.s32 1, %s932_s18  }
 0x168   : > { %p12_p4 = scmp.ge.s32.totalorder %s15_s18, 5  }
 0x16a   :  { %14 = sbr.rel (!%p12_p4) target bundleno = 1 (0x1), region = 70 }

// kernel: tapnet_forward.8
= control target key start
LH: loop header
LB: loop body
LE: loop exit
PB: predicated region body
PF: predicated region fallthrough
CT: control target
= control target key end

     0   :  { %s973_s21 = smov 0   ;;  %s1333_s0 = inlined_call_operand.vmem [shape: bf16[3,160,48], index: 0, kind: input, shape index: {}]   ;;  %s1334_s1 = inlined_call_operand.vmem [shape: bf16[1,48,8], index: 1, kind: input, shape index: {}]   ;;  %s1335_s2 = inlined_call_operand.vmem [shape: f32[1,1,8], index: 2, kind: input, shape index: {}]   ;;  %s1336_s3 = inlined_call_operand.vmem [shape: f32[1,1,8], index: 3, kind: input, shape index: {}]   ;;  %s1337_s4 = inlined_call_operand.vmem [shape: f32[1,1,8], index: 4, kind: input, shape index: {}]   ;;  %s1338_s5 = inlined_call_operand.vmem [shape: f32[8,160], index: 5, kind: input, shape index: {}]   ;;  %s1339_s6 = inlined_call_operand.vmem [shape: f32[3,8,8], index: 6, kind: output, shape index: {}]  }
   0x1 LB: > { %s818_s22 = sadd.s32 4294967295, %s935_s21   ;;  %p822_p0 = scmp.ge.s32.totalorder %s935_s21, 1  ;;  %s935_s21 = sphi %s973_s21, %s16_s21  }
   0x2   : > { %p212_p1 = scmp.lt.s32.totalorder %s935_s21, 4 }
   0x4   : > { %p213_p2 = pnand %p822_p0, %p212_p1 }
   0x5   : > { %p241_p3 = scmp.lt.s32.totalorder (!%p213_p2), %s818_s22, 2 }
   0x6   : > { %216 = sbr.rel (%p213_p2) target bundleno = 485 (0x1e5), region = 44 }
   0xb   : > { %v902_v0 = vld [vmem:[%s1334_s1 + $0x10] sm:$0xff]  ;;  %v901_v1 = vld [vmem:[%s1334_s1 + $0x8] sm:$0xff]  ;;  %s1341_s22 = smov (!%p241_p3, %s818_s22), 2  ;;  %v900_v2 = vld [vmem:[%s1334_s1] sm:$0xff]  ;;  %vm349_vm0 = vcmask 392192   ;;  %vm439_vm1 = vcmask 64512  }
   0xc   : > { %385 = vmatpush.bf16.msra.mxu0 %v902_v0  ;;  %904 = vmatpush.bf16.msra.mxu2 %v902_v0  ;;  %s912_s27 = smul.u32 80, %s1341_s22  ;;  %v1009_v22 = vld [vmem:[%s1335_s2] ss:$0 sm:$0xff]  ;;  %vm720_vm14 = vcmask 261120   ;;  %s824_s19 = sshll.u32 %s1341_s22, 3 }
   0xd   : > { %903 = vmatpush.bf16.msra.mxu1 %v902_v0  ;;  %905 = vmatpush.bf16.msra.mxu3 %v902_v0  ;;  %s249_s24 = scalar_lea.vmem %s1339_s6, %s824_s19 }
   0xe   : > { %s245_s8 = scalar_lea.vmem %s1333_s0, %s912_s27 }
   0xf   : > { %v890_v3 = vld [vmem:[%s245_s8] sm:$0xff]  ;;  %v895_v4 = vld [vmem:[%s245_s8 + $0x28] sm:$0xff]  ;;  %v893_v5 = vld [vmem:[%s245_s8 + $0x18] sm:$0xff] }
  0x10   : > { %386 = vmatpush.bf16.msra.mxu0 %v901_v1  ;;  %907 = vmatpush.bf16.msra.mxu2 %v901_v1  ;;  %v898_v6 = vld [vmem:[%s245_s8 + $0x40] sm:$0xff]  ;;  %v891_v7 = vld [vmem:[%s245_s8 + $0x8] sm:$0xff]  ;;  %v896_v8 = vld [vmem:[%s245_s8 + $0x30] sm:$0xff] }
  0x11   : > { %906 = vmatpush.bf16.msra.mxu1 %v901_v1  ;;  %908 = vmatpush.bf16.msra.mxu3 %v901_v1  ;;  %v894_v9 = vld [vmem:[%s245_s8 + $0x20] sm:$0xff]  ;;  %v899_v10 = vld [vmem:[%s245_s8 + $0x48] sm:$0xff]  ;;  %v892_v11 = vld [vmem:[%s245_s8 + $0x10] sm:$0xff] }
  0x12   : > { %v897_v12 = vld [vmem:[%s245_s8 + $0x38] sm:$0xff] }
  0x14   : > { %387 = vmatpush.bf16.msra.mxu0 %v900_v2  ;;  %910 = vmatpush.bf16.msra.mxu2 %v900_v2 }
  0x15   : > { %909 = vmatpush.bf16.msra.mxu1 %v900_v2  ;;  %911 = vmatpush.bf16.msra.mxu3 %v900_v2 }
  0x17   : > { %877 = vmatmul.msk.bf16.vlgmr.msra.gmra.mxu0 %vm349_vm0, %v890_v3  ;;  %882 = vmatmul.msk.bf16.vlgmr.msra.gmra.mxu2 %vm349_vm0, %v895_v4 }
  0x18   : > { %880 = vmatmul.msk.bf16.vlgmr.msra.gmra.mxu1 %vm349_vm0, %v893_v5  ;;  %885 = vmatmul.msk.bf16.vlgmr.msra.gmra.mxu3 %vm349_vm0, %v898_v6 }
  0x27   : > { %878 = vmatmul.msk.bf16.gmra.mxu0 %vm349_vm0, %v891_v7  ;;  %883 = vmatmul.msk.bf16.gmra.mxu2 %vm349_vm0, %v896_v8 }
  0x28   : > { %881 = vmatmul.msk.bf16.gmra.mxu1 %vm349_vm0, %v894_v9  ;;  %886 = vmatmul.msk.bf16.gmra.mxu3 %vm349_vm0, %v899_v10  ;;  %v937_v9 = vmov 160.0  }
  0x29   : > { %925 = vrcp.f32 %v937_v9 }
  0x37   : > { %879 = vmatmul.msk.bf16.gmra.mxu0 %vm349_vm0, %v892_v11  ;;  %884 = vmatmul.msk.bf16.gmra.mxu2 %vm349_vm0, %v897_v12 }
  0x94   : > { %v389_v13 = vpop.f32.mrf.mxu0 }
  0x95   : > { %v404_v16 = vpop.f32.mrf.mxu1  ;;  %v1015_v24 = vadd.f32 %v1009_v22, %v389_v13 }
  0x96   : > { %v1037_v41 = vadd.f32 %v1009_v22, %v404_v16 }
  0x97   : > { %v440_v31 = vsel %vm439_vm1, %v1015_v24, 0.0 }
  0x98   : > { %v451_v49 = vsel %vm439_vm1, %v1037_v41, 0.0 }
  0x9a   : > { %v414_v14 = vpop.f32.mrf.mxu2 }
  0x9b   : > { %v429_v30 = vpop.f32.mrf.mxu3  ;;  %v1058_v56 = vadd.f32 %v1009_v22, %v414_v14 }
  0x9c   : > { %v391_v15 = vpop.f32.mrf.mxu0  ;;  %v1088_v13 = vadd.f32 %v1009_v22, %v429_v30 }
  0x9d   : > { %v406_v20 = vpop.f32.mrf.mxu1  ;;  %v1012_v23 = vadd.f32 %v1009_v22, %v391_v15  ;;  %v459_v62 = vsel %vm439_vm1, %v1058_v56, 0.0 }
  0x9e   : > { %v1043_v44 = vadd.f32 %v1009_v22, %v406_v20 }
  0x9f   : > { %v441_v27 = vsel %vm439_vm1, %v1012_v23, 0.0 }
  0xa0   : > { %v442_v34 = vadd.f32 %v441_v27, %v440_v31  ;;  %v453_v53 = vsel %vm439_vm1, %v1043_v44, 0.0 }
  0xa2   : > { %v416_v18 = vpop.f32.mrf.mxu2 }
  0xa3   : > { %v431_v48 = vpop.f32.mrf.mxu3  ;;  %v1063_v59 = vadd.f32 %v1009_v22, %v416_v18  ;;  %v926_v18 = vpop.eup %925 }
  0xa4   : > { %v394_v17 = vpop.f32.mrf.mxu0  ;;  %v1093_v16 = vadd.f32 %v1009_v22, %v431_v48  ;;  %v486_v31 = vmul.f32 160.0, %v926_v18  ;;  %vm490_vm2 = vweird.f32 %v926_v18 }
  0xa5   : > { %v1018_v25 = vadd.f32 %v1009_v22, %v394_v17  ;;  %v409_v29 = vpop.f32.mrf.mxu1  ;;  %v461_v2 = vsel %vm439_vm1, %v1063_v59, 0.0 }
  0xa6   : > { %v1050_v50 = vadd.f32 %v1009_v22, %v409_v29  ;;  %v473_v29 = vsel %vm439_vm1, %v1093_v16, 0.0 }
  0xa7   : > { %v443_v32 = vsel %vm439_vm1, %v1018_v25, 0.0 }
  0xa8   : > { %v444_v37 = vadd.f32 %v443_v32, %v442_v34  ;;  %v455_v57 = vsel %vm439_vm1, %v1050_v50, 0.0 }
  0xaa   : > { %v419_v21 = vpop.f32.mrf.mxu2 }
  0xab   : > { %v1070_v63 = vadd.f32 %v1009_v22, %v419_v21  ;;  %v434_v1 = vpop.f32.mrf.mxu3  ;;  %v471_v21 = vsel %vm439_vm1, %v1088_v13, 0.0 }
  0xac   : > { %v396_v19 = vpop.f32.mrf.mxu0 }
  0xad   : > { %v1023_v28 = vadd.f32 %v1009_v22, %v396_v19  ;;  %v411_v47 = vpop.f32.mrf.mxu1  ;;  %v463_v6 = vsel %vm439_vm1, %v1070_v63, 0.0 }
  0xae   : > { %v1055_v54 = vadd.f32 %v1009_v22, %v411_v47 }
  0xaf   : > { %v445_v36 = vsel %vm439_vm1, %v1023_v28, 0.0 }
  0xb0   : > { %v446_v39 = vadd.f32 %v445_v36, %v444_v37  ;;  %v457_v60 = vsel %vm439_vm1, %v1055_v54, 0.0  ;;  %v487_v37 = vsub.f32 1.0, %v486_v31 }
  0xb2   : > { %v421_v35 = vpop.f32.mrf.mxu2 }
  0xb3   : > { %v1075_v3 = vadd.f32 %v1009_v22, %v421_v35  ;;  %v436_v20 = vpop.f32.mrf.mxu3 }
  0xb4   : > { %v399_v26 = vpop.f32.mrf.mxu0  ;;  %v1105_v30 = vadd.f32 %v1009_v22, %v436_v20 }
  0xb5   : > { %v1030_v33 = vadd.f32 %v1009_v22, %v399_v26  ;;  %v465_v10 = vsel %vm439_vm1, %v1075_v3, 0.0  ;;  %v1100_v26 = vadd.f32 %v1009_v22, %v434_v1 }
  0xb6   : > { %v477_v36 = vsel %vm439_vm1, %v1105_v30, 0.0 }
  0xb7   : > { %v447_v38 = vsel %vm439_vm1, %v1030_v33, 0.0  ;;  %v475_v34 = vsel %vm439_vm1, %v1100_v26, 0.0 }
  0xb8   : > { %v448_v43 = vadd.f32 %v447_v38, %v446_v39 }
  0xba   : > { %v424_v52 = vpop.f32.mrf.mxu2 }
  0xbb   : > { %v1080_v7 = vadd.f32 %v1009_v22, %v424_v52 }
  0xbc   : > { %v401_v40 = vpop.f32.mrf.mxu0 }
  0xbd   : > { %v1040_v42 = vadd.f32 %v1009_v22, %v401_v40  ;;  %v467_v14 = vsel %vm439_vm1, %v1080_v7, 0.0  ;;  %v488_v40 = vmul.f32 %v926_v18, %v487_v37 }
  0xbf   : > { %v449_v45 = vsel %vm439_vm1, %v1040_v42, 0.0 }
  0xc0   : > { %v450_v46 = vadd.f32 %v449_v45, %v448_v43 }
  0xc2   : > { %v452_v51 = vadd.f32 %v451_v49, %v450_v46  ;;  %v426_v5 = vpop.f32.mrf.mxu2  ;;  %v489_v46 = vadd.f32 %v926_v18, %v488_v40 }
  0xc3   : > { %v1085_v11 = vadd.f32 %v1009_v22, %v426_v5 }
  0xc4   : > { %v454_v55 = vadd.f32 %v453_v53, %v452_v51  ;;  %v1111_v48 = vsel %vm490_vm2, %v926_v18, %v489_v46 }
  0xc5   : > { %v469_v17 = vsel %vm439_vm1, %v1085_v11, 0.0 }
  0xc6   : > { %v456_v58 = vadd.f32 %v455_v57, %v454_v55 }
  0xc8   : > { %v458_v61 = vadd.f32 %v457_v60, %v456_v58 }
  0xca   : > { %v460_v0 = vadd.f32 %v459_v62, %v458_v61 }
  0xcc   : > { %v462_v4 = vadd.f32 %v461_v2, %v460_v0 }
  0xce   : > { %v464_v8 = vadd.f32 %v463_v6, %v462_v4 }
  0xd0   : > { %v466_v12 = vadd.f32 %v465_v10, %v464_v8 }
  0xd2   : > { %v468_v15 = vadd.f32 %v467_v14, %v466_v12 }
  0xd4   : > { %v470_v19 = vadd.f32 %v469_v17, %v468_v15 }
  0xd6   : > { %v472_v27 = vadd.f32 %v471_v21, %v470_v19 }
  0xd8   : > { %v474_v32 = vadd.f32 %v473_v29, %v472_v27 }
  0xda   : > { %v476_v35 = vadd.f32 %v475_v34, %v474_v32 }
  0xdc   : > { %v478_v38 = vadd.f32 %v477_v36, %v476_v35 }
  0xde   : > { %v479_v39 = vrot.slane %v478_v38, 4 }
  0xe0   : > { %v480_v43 = vadd.f32 %v479_v39, %v478_v38 }
  0xe2   : > { %v481_v45 = vrot.slane %v480_v43, 2 }
  0xe4   : > { %v482_v47 = vadd.f32 %v481_v45, %v480_v43 }
  0xe6   : > { %v483_v22 = vrot.slane %v482_v47, 1 }
  0xe8   : > { %v484_v49 = vadd.f32 %v483_v22, %v482_v47 }
  0xea   : > { %v1114_v51 = vmul.f32 %v1111_v48, %v484_v49 }
  0xec   : > { %v1118_v52 = vsub.f32 %v1015_v24, %v1114_v51  ;;  %v1122_v53 = vsub.f32 %v1012_v23, %v1114_v51  ;;  %v1126_v55 = vsub.f32 %v1018_v25, %v1114_v51  ;;  %v1130_v57 = vsub.f32 %v1023_v28, %v1114_v51 }
  0xed   : > { %v1138_v24 = vsub.f32 %v1030_v33, %v1114_v51  ;;  %v1144_v25 = vsub.f32 %v1040_v42, %v1114_v51  ;;  %v1152_v1 = vsub.f32 %v1037_v41, %v1114_v51  ;;  %v1159_v42 = vsub.f32 %v1043_v44, %v1114_v51 }
  0xee   : > { %v513_v58 = vmul.f32 %v1118_v52, %v1118_v52  ;;  %v514_v60 = vmul.f32 %v1122_v53, %v1122_v53  ;;  %v515_v23 = vmul.f32 %v1126_v55, %v1126_v55  ;;  %v516_v28 = vmul.f32 %v1130_v57, %v1130_v57 }
  0xef   : > { %v517_v33 = vmul.f32 %v1138_v24, %v1138_v24  ;;  %v518_v5 = vmul.f32 %v1144_v25, %v1144_v25  ;;  %v1166_v41 = vsub.f32 %v1050_v50, %v1114_v51  ;;  %v519_v9 = vmul.f32 %v1152_v1, %v1152_v1 }
  0xf0   : > { %v533_v61 = vsel %vm439_vm1, %v513_v58, 0.0  ;;  %v534_v62 = vsel %vm439_vm1, %v514_v60, 0.0  ;;  %v536_v2 = vsel %vm439_vm1, %v515_v23, 0.0  ;;  %v538_v6 = vsel %vm439_vm1, %v516_v28, 0.0 }
  0xf1   : > { %v535_v0 = vadd.f32 %v534_v62, %v533_v61  ;;  %v540_v10 = vsel %vm439_vm1, %v517_v33, 0.0  ;;  %v1173_v44 = vsub.f32 %v1055_v54, %v1114_v51  ;;  %v520_v14 = vmul.f32 %v1159_v42, %v1159_v42 }
  0xf2   : > { %v542_v15 = vsel %vm439_vm1, %v518_v5, 0.0  ;;  %v1180_v50 = vsub.f32 %v1058_v56, %v1114_v51  ;;  %v521_v18 = vmul.f32 %v1166_v41, %v1166_v41  ;;  %v544_v19 = vsel %vm439_vm1, %v519_v9, 0.0 }
  0xf3   : > { %v537_v4 = vadd.f32 %v536_v2, %v535_v0  ;;  %v1187_v54 = vsub.f32 %v1063_v59, %v1114_v51  ;;  %v522_v21 = vmul.f32 %v1173_v44, %v1173_v44  ;;  %v546_v27 = vsel %vm439_vm1, %v520_v14, 0.0 }
  0xf4   : > { %v1194_v56 = vsub.f32 %v1070_v63, %v1114_v51  ;;  %v523_v31 = vmul.f32 %v1180_v50, %v1180_v50  ;;  %v548_v32 = vsel %vm439_vm1, %v521_v18, 0.0  ;;  %v1201_v59 = vsub.f32 %v1075_v3, %v1114_v51 }
  0xf5   : > { %v539_v8 = vadd.f32 %v538_v6, %v537_v4  ;;  %v524_v35 = vmul.f32 %v1187_v54, %v1187_v54  ;;  %v550_v36 = vsel %vm439_vm1, %v522_v21, 0.0  ;;  %v507_v63 = vsub.f32 %v1080_v7, %v1114_v51 }
  0xf6   : > { %v525_v38 = vmul.f32 %v1194_v56, %v1194_v56  ;;  %v552_v39 = vsel %vm439_vm1, %v523_v31, 0.0  ;;  %v508_v43 = vsub.f32 %v1085_v11, %v1114_v51  ;;  %v526_v3 = vmul.f32 %v1201_v59, %v1201_v59 }
  0xf7   : > { %v541_v12 = vadd.f32 %v540_v10, %v539_v8  ;;  %v554_v45 = vsel %vm439_vm1, %v524_v35, 0.0  ;;  %v509_v47 = vsub.f32 %v1088_v13, %v1114_v51  ;;  %v527_v22 = vmul.f32 %v507_v63, %v507_v63 }
  0xf8   : > { %v556_v7 = vsel %vm439_vm1, %v525_v38, 0.0  ;;  %v510_v58 = vsub.f32 %v1093_v16, %v1114_v51  ;;  %v528_v60 = vmul.f32 %v508_v43, %v508_v43  ;;  %v558_v23 = vsel %vm439_vm1, %v526_v3, 0.0 }
  0xf9   : > { %v543_v17 = vadd.f32 %v542_v15, %v541_v12  ;;  %v511_v28 = vsub.f32 %v1100_v26, %v1114_v51  ;;  %v529_v61 = vmul.f32 %v509_v47, %v509_v47  ;;  %v560_v62 = vsel %vm439_vm1, %v527_v22, 0.0 }
  0xfa   : > { %v512_v13 = vsub.f32 %v1105_v30, %v1114_v51  ;;  %v530_v33 = vmul.f32 %v510_v58, %v510_v58  ;;  %v562_v2 = vsel %vm439_vm1, %v528_v60, 0.0 }
  0xfb   : > { %v545_v20 = vadd.f32 %v544_v19, %v543_v17  ;;  %v531_v5 = vmul.f32 %v511_v28, %v511_v28  ;;  %v564_v16 = vsel %vm439_vm1, %v529_v61, 0.0 }
  0xfc   : > { %v532_v8 = vmul.f32 %v512_v13, %v512_v13  ;;  %v566_v9 = vsel %vm439_vm1, %v530_v33, 0.0 }
  0xfd   : > { %v547_v29 = vadd.f32 %v546_v27, %v545_v20  ;;  %v568_v26 = vsel %vm439_vm1, %v531_v5, 0.0 }
  0xfe   : > { %v570_v14 = vsel %vm439_vm1, %v532_v8, 0.0 }
  0xff   : > { %v549_v34 = vadd.f32 %v548_v32, %v547_v29 }
 0x101   : > { %v551_v37 = vadd.f32 %v550_v36, %v549_v34 }
 0x103   : > { %v553_v40 = vadd.f32 %v552_v39, %v551_v37  ;;  %v1236_v37 = vld [vmem:[%s1336_s3] ss:$0 sm:$0xff] }
 0x105   : > { %v555_v46 = vadd.f32 %v554_v45, %v553_v40  ;;  %v1245_v40 = vld [vmem:[%s1337_s4] ss:$0 sm:$0xff] }
 0x107   : > { %v557_v49 = vadd.f32 %v556_v7, %v555_v46 }
 0x109   : > { %v559_v11 = vadd.f32 %v558_v23, %v557_v49 }
 0x10b   : > { %v561_v0 = vadd.f32 %v560_v62, %v559_v11 }
 0x10d   : > { %v563_v4 = vadd.f32 %v562_v2, %v561_v0 }
 0x10f   : > { %v565_v6 = vadd.f32 %v564_v16, %v563_v4 }
 0x111   : > { %v567_v10 = vadd.f32 %v566_v9, %v565_v6 }
 0x113   : > { %v569_v12 = vadd.f32 %v568_v26, %v567_v10 }
 0x115   : > { %v571_v15 = vadd.f32 %v570_v14, %v569_v12 }
 0x117   : > { %v572_v17 = vrot.slane %v571_v15, 4 }
 0x119   : > { %v573_v30 = vadd.f32 %v572_v17, %v571_v15 }
 0x11b   : > { %v574_v51 = vrot.slane %v573_v30, 2 }
 0x11d   : > { %v575_v18 = vadd.f32 %v574_v51, %v573_v30 }
 0x11f   : > { %v576_v19 = vrot.slane %v575_v18, 1 }
 0x121   : > { %v577_v20 = vadd.f32 %v576_v19, %v575_v18 }
 0x123   : > { %v578_v21 = vmul.f32 %v577_v20, %v1111_v48 }
 0x125   : > { %v579_v27 = vadd.f32 1e-05, %v578_v21 }
 0x127   : > { %927 = vrsqrt.f32 %v579_v27  ;;  %vm586_vm4 = vweird.f32 %v579_v27 }
 0x12d   : > { %v928_v29 = vpop.eup %927 }
 0x12e   : > { %v581_v31 = vmul.f32 %v928_v29, %v579_v27  ;;  %vm587_vm3 = vweird.f32 %v928_v29 }
 0x12f   : > { %vm588_vm5 = vmor %vm586_vm4, %vm587_vm3 }
 0x130   : > { %v582_v32 = vmul.f32 %v928_v29, %v581_v31 }
 0x132   : > { %v583_v34 = vmul.f32 0.5, %v582_v32 }
 0x134   : > { %v584_v35 = vsub.f32 1.5, %v583_v34 }
 0x136   : > { %v585_v36 = vmul.f32 %v928_v29, %v584_v35 }
 0x138   : > { %v1238_v38 = vsel %vm588_vm5, %v928_v29, %v585_v36 }
 0x139   : > { %v609_v48 = vmul.f32 %v1238_v38, %v512_v13  ;;  %v605_v39 = vmul.f32 %v1238_v38, %v508_v43  ;;  %v604_v3 = vmul.f32 %v1238_v38, %v507_v63  ;;  %v608_v45 = vmul.f32 %v1238_v38, %v511_v28 }
 0x13a   : > { %v603_v46 = vmul.f32 %v1238_v38, %v1201_v59  ;;  %v607_v22 = vmul.f32 %v1238_v38, %v510_v58  ;;  %v602_v7 = vmul.f32 %v1238_v38, %v1194_v56  ;;  %v606_v49 = vmul.f32 %v1238_v38, %v509_v47 }
 0x13b   : > { %v633_v43 = vmul.f32 %v1236_v37, %v609_v48  ;;  %v629_v60 = vmul.f32 %v1236_v37, %v605_v39  ;;  %v628_v23 = vmul.f32 %v1236_v37, %v604_v3  ;;  %v632_v63 = vmul.f32 %v1236_v37, %v608_v45 }
 0x13c   : > { %v627_v11 = vmul.f32 %v1236_v37, %v603_v46  ;;  %v631_v28 = vmul.f32 %v1236_v37, %v607_v22  ;;  %v626_v59 = vmul.f32 %v1236_v37, %v602_v7  ;;  %v630_v58 = vmul.f32 %v1236_v37, %v606_v49 }
 0x13d   : > { %v653_v56 = vadd.f32 %v1245_v40, %v629_v60  ;;  %v657_v47 = vadd.f32 %v1245_v40, %v633_v43  ;;  %v652_v61 = vadd.f32 %v1245_v40, %v628_v23  ;;  %v656_v62 = vadd.f32 %v1245_v40, %v632_v63 }
 0x13e   : > { %v651_v0 = vadd.f32 %v1245_v40, %v627_v11  ;;  %v655_v13 = vadd.f32 %v1245_v40, %v631_v28  ;;  %v650_v33 = vadd.f32 %v1245_v40, %v626_v59  ;;  %v654_v2 = vadd.f32 %v1245_v40, %v630_v58 }
 0x13f   : > { %vm673_vm6 = vcmp.ge.f32.partialorder %v653_v56, 0.0  ;;  %v693_v4 = vmul.f32 0.01, %v653_v56  ;;  %vm677_vm7 = vcmp.ge.f32.partialorder %v657_v47, 0.0  ;;  %v697_v5 = vmul.f32 0.01, %v657_v47 }
 0x140   : > { %vm672_vm8 = vcmp.ge.f32.partialorder %v652_v61, 0.0  ;;  %v692_v16 = vmul.f32 0.01, %v652_v61  ;;  %vm676_vm9 = vcmp.ge.f32.partialorder %v656_v62, 0.0  ;;  %v696_v6 = vmul.f32 0.01, %v656_v62 }
 0x141   : > { %v713_v8 = vsel %vm673_vm6, %v653_v56, %v693_v4  ;;  %v717_v9 = vsel %vm677_vm7, %v657_v47, %v697_v5  ;;  %vm671_vm10 = vcmp.ge.f32.partialorder %v651_v0, 0.0  ;;  %v691_v10 = vmul.f32 0.01, %v651_v0 }
 0x142   : > { %724 = vmatpush.msrb.mxu1 %v713_v8  ;;  %756 = vmatpush.msrb.mxu3 %v717_v9  ;;  %v712_v26 = vsel %vm672_vm8, %v652_v61, %v692_v16  ;;  %v716_v12 = vsel %vm676_vm9, %v656_v62, %v696_v6  ;;  %vm675_vm11 = vcmp.ge.f32.partialorder %v655_v13, 0.0  ;;  %v695_v14 = vmul.f32 0.01, %v655_v13 }
 0x143   : > { %v711_v15 = vsel %vm671_vm10, %v651_v0, %v691_v10  ;;  %vm670_vm12 = vcmp.ge.f32.partialorder %v650_v33, 0.0  ;;  %v690_v17 = vmul.f32 0.01, %v650_v33  ;;  %vm674_vm13 = vcmp.ge.f32.partialorder %v654_v2, 0.0 }
 0x144   : > { %725 = vmatpush.msrb.mxu1 %v712_v26  ;;  %757 = vmatpush.msrb.mxu3 %v716_v12  ;;  %v715_v30 = vsel %vm675_vm11, %v655_v13, %v695_v14  ;;  %v694_v51 = vmul.f32 0.01, %v654_v2  ;;  %v601_v18 = vmul.f32 %v1238_v38, %v1187_v54  ;;  %v600_v19 = vmul.f32 %v1238_v38, %v1180_v50  ;;  %v719_v50 = vld [vmem:[%s1338_s5 + $0x8] sm:$0xff] }
 0x145   : > { %v710_v20 = vsel %vm670_vm12, %v650_v33, %v690_v17  ;;  %v599_v21 = vmul.f32 %v1238_v38, %v1173_v44  ;;  %v598_v27 = vmul.f32 %v1238_v38, %v1166_v41  ;;  %v597_v29 = vmul.f32 %v1238_v38, %v1159_v42 }
 0x146   : > { %726 = vmatpush.msrb.mxu1 %v711_v15  ;;  %758 = vmatpush.msrb.mxu3 %v715_v30  ;;  %v714_v31 = vsel %vm674_vm13, %v654_v2, %v694_v51  ;;  %v625_v32 = vmul.f32 %v1236_v37, %v601_v18  ;;  %v624_v54 = vmul.f32 %v1236_v37, %v600_v19  ;;  %v718_v51 = vld [vmem:[%s1338_s5] sm:$0xff] }
 0x147   : > { %v623_v44 = vmul.f32 %v1236_v37, %v599_v21  ;;  %v622_v34 = vmul.f32 %v1236_v37, %v598_v27  ;;  %v621_v41 = vmul.f32 %v1236_v37, %v597_v29  ;;  %v596_v42 = vmul.f32 %v1238_v38, %v1152_v1 }
 0x148   : > { %727 = vmatpush.msrb.mxu1 %v710_v20  ;;  %759 = vmatpush.msrb.mxu3 %v714_v31  ;;  %v649_v35 = vadd.f32 %v1245_v40, %v625_v32  ;;  %v648_v36 = vadd.f32 %v1245_v40, %v624_v54  ;;  %v595_v45 = vmul.f32 %v1238_v38, %v1144_v25 }
 0x149   : > { %v647_v48 = vadd.f32 %v1245_v40, %v623_v44  ;;  %v646_v39 = vadd.f32 %v1245_v40, %v622_v34  ;;  %v620_v3 = vmul.f32 %v1236_v37, %v596_v42  ;;  %887 = vmatmul.msk.f32.vlgmr.msrb.gmra.mxu3 %vm720_vm14, %v719_v50  ;;  %v645_v7 = vadd.f32 %v1245_v40, %v621_v41 }
 0x14a   : > { %vm669_vm15 = vcmp.ge.f32.partialorder %v649_v35, 0.0  ;;  %v689_v46 = vmul.f32 0.01, %v649_v35  ;;  %vm668_vm0 = vcmp.ge.f32.partialorder %v648_v36, 0.0  ;;  %v688_v1 = vmul.f32 0.01, %v648_v36 }
 0x14b   : > { %v687_v22 = vmul.f32 0.01, %v647_v48  ;;  %vm667_vm2 = vcmp.ge.f32.partialorder %v647_v48, 0.0  ;;  %vm666_vm3 = vcmp.ge.f32.partialorder %v646_v39, 0.0  ;;  %v686_v60 = vmul.f32 0.01, %v646_v39 }
 0x14c   : > { %v709_v49 = vsel %vm669_vm15, %v649_v35, %v689_v46  ;;  %v708_v43 = vsel %vm668_vm0, %v648_v36, %v688_v1  ;;  %v619_v23 = vmul.f32 %v1236_v37, %v595_v45  ;;  %v644_v63 = vadd.f32 %v1245_v40, %v620_v3 }
 0x14d   : > { %728 = vmatpush.msrb.mxu1 %v709_v49  ;;  %v594_v25 = vmul.f32 %v1238_v38, %v1138_v24  ;;  %v593_v11 = vmul.f32 %v1238_v38, %v1130_v57  ;;  %v592_v28 = vmul.f32 %v1238_v38, %v1126_v55  ;;  %v707_v59 = vsel %vm667_vm2, %v647_v48, %v687_v22 }
 0x14e   : > { %v685_v58 = vmul.f32 0.01, %v645_v7  ;;  %v643_v56 = vadd.f32 %v1245_v40, %v619_v23  ;;  %v591_v62 = vmul.f32 %v1238_v38, %v1122_v53  ;;  %v706_v24 = vsel %vm666_vm3, %v646_v39, %v686_v60 }
 0x14f   : > { %729 = vmatpush.msrb.mxu1 %v708_v43  ;;  %v618_v47 = vmul.f32 %v1236_v37, %v594_v25  ;;  %v617_v61 = vmul.f32 %v1236_v37, %v593_v11  ;;  %vm665_vm4 = vcmp.ge.f32.partialorder %v645_v7, 0.0  ;;  %v684_v0 = vmul.f32 0.01, %v644_v63 }
 0x150   : > { %v616_v55 = vmul.f32 %v1236_v37, %v592_v28  ;;  %v590_v13 = vmul.f32 %v1238_v38, %v1118_v52  ;;  %vm664_vm5 = vcmp.ge.f32.partialorder %v644_v63, 0.0  ;;  %v705_v33 = vsel %vm665_vm4, %v645_v7, %v685_v58 }
 0x151   : > { %730 = vmatpush.msrb.mxu1 %v707_v59  ;;  %v642_v57 = vadd.f32 %v1245_v40, %v618_v47  ;;  %v683_v2 = vmul.f32 0.01, %v643_v56  ;;  %v641_v4 = vadd.f32 %v1245_v40, %v617_v61  ;;  %v615_v5 = vmul.f32 %v1236_v37, %v591_v62 }
 0x152   : > { %vm663_vm6 = vcmp.ge.f32.partialorder %v643_v56, 0.0  ;;  %v704_v53 = vsel %vm664_vm5, %v644_v63, %v684_v0  ;;  %v640_v6 = vadd.f32 %v1245_v40, %v616_v55  ;;  %v614_v8 = vmul.f32 %v1236_v37, %v590_v13 }
 0x153   : > { %731 = vmatpush.msrb.mxu1 %v706_v24  ;;  %v682_v16 = vmul.f32 0.01, %v642_v57  ;;  %vm662_vm7 = vcmp.ge.f32.partialorder %v642_v57, 0.0  ;;  %v703_v9 = vsel %vm663_vm6, %v643_v56, %v683_v2  ;;  %v681_v52 = vmul.f32 0.01, %v641_v4 }
 0x154   : > { %v639_v38 = vadd.f32 %v1245_v40, %v615_v5  ;;  %vm661_vm8 = vcmp.ge.f32.partialorder %v641_v4, 0.0  ;;  %v680_v26 = vmul.f32 0.01, %v640_v6  ;;  %v638_v12 = vadd.f32 %v1245_v40, %v614_v8 }
 0x155   : > { %732 = vmatpush.msrb.mxu1 %v705_v33  ;;  %v702_v10 = vsel %vm662_vm7, %v642_v57, %v682_v16  ;;  %vm660_vm9 = vcmp.ge.f32.partialorder %v640_v6, 0.0  ;;  %v701_v14 = vsel %vm661_vm8, %v641_v4, %v681_v52 }
 0x156   : > { %v679_v15 = vmul.f32 0.01, %v639_v38  ;;  %vm659_vm10 = vcmp.ge.f32.partialorder %v639_v38, 0.0  ;;  %v700_v37 = vsel %vm660_vm9, %v640_v6, %v680_v26  ;;  %v678_v17 = vmul.f32 0.01, %v638_v12 }
 0x157   : > { %733 = vmatpush.msrb.mxu1 %v704_v53  ;;  %vm658_vm11 = vcmp.ge.f32.partialorder %v638_v12, 0.0 }
 0x158   : > { %v699_v30 = vsel %vm659_vm10, %v639_v38, %v679_v15  ;;  %v698_v18 = vsel %vm658_vm11, %v638_v12, %v678_v17 }
 0x159   : > { %734 = vmatpush.msrb.mxu1 %v703_v9 }
 0x15b   : > { %735 = vmatpush.msrb.mxu1 %v702_v10 }
 0x15d   : > { %736 = vmatpush.msrb.mxu1 %v701_v14 }
 0x15f   : > { %737 = vmatpush.msrb.mxu1 %v700_v37 }
 0x161   : > { %738 = vmatpush.msrb.mxu1 %v699_v30 }
 0x163   : > { %739 = vmatpush.msrb.mxu1 %v698_v18 }
 0x164   : > { %740 = vmatmul.f32.vlgmr.msrb.gmra.mxu1 %v718_v51 }
 0x1cc   : > { %v761_v40 = vpop.f32.mrf.mxu3 }
 0x1e1   : > { %v741_v19 = vpop.f32.mrf.mxu1 }
 0x1e2   : > { %v762_v20 = vadd.f32 %v761_v40, %v741_v19 }
 0x1e4   : > { %764 = vst.msk [vmem:[%s249_s24] sm:$0xff] %vm439_vm1, %v762_v20 }
 0x1e5 PF: > { %s16_s21 = sadd.s32 1, %s935_s21  }
 0x1e6   : > { %p13_p4 = scmp.ge.s32.totalorder %s16_s21, 5  }
 0x1e8   :  { %15 = sbr.rel (!%p13_p4) target bundleno = 1 (0x1), region = 74 }

// kernel: tapnet_forward.5
= control target key start
LH: loop header
LB: loop body
LE: loop exit
PB: predicated region body
PF: predicated region fallthrough
CT: control target
= control target key end

     0   :  { %vm80_vm0 = vcmask 261120   ;;  %v1363_v5 = vmov 0   ;;  %s1364_s25 = smov 64   ;;  %s1365_s26 = smov 32   ;;  %vm289_vm9 = vcmask 1043456   ;;  %vm247_vm10 = vcmask 1048320   ;;  %s1706_s1 = inlined_call_operand.vmem [shape: bf16[32,128], index: 1, kind: input, shape index: {}]   ;;  %s1707_s2 = inlined_call_operand.vmem [shape: bf16[32,128], index: 2, kind: input, shape index: {}]   ;;  %s1708_s3 = inlined_call_operand.vmem [shape: f32[1,128], index: 3, kind: input, shape index: {}]   ;;  %s1709_s0 = inlined_call_operand.vmem [shape: bf16[96,32], index: 0, kind: input, shape index: {}]   ;;  %s1710_s4 = inlined_call_operand.vmem [shape: f32[8,32], index: 4, kind: output, shape index: {}]  }
   0x1   :  { %v1222_v0 = vld [vmem:[%s1706_s1 + $0x8] sm:$0xff]  ;;  %v1221_v2 = vld [vmem:[%s1706_s1] sm:$0xff]  ;;  %vm249_vm11 = vcmask 1044224  }
   0x2   :  { %v1398_v1 = vld [vmem:[%s1707_s2 + $0x8] sm:$0xff]  ;;  %105 = vmatpush.bf16.msra.mxu0 %v1222_v0  ;;  %v1407_v3 = vld [vmem:[%s1707_s2] sm:$0xff]  ;;  %1225 = vmatpush.bf16.msra.mxu3 %v1222_v0 }
   0x3   :  { %163 = vmatpush.bf16.msra.mxu1 %v1398_v1  ;;  %279 = vmatpush.bf16.msra.mxu2 %v1398_v1  ;;  %v1215_v4 = vld [vmem:[%s1709_s0] sm:$0xff] }
   0x4   :  { %v1427_v6 = vld [vmem:[%s1708_s3] ss:$0 sm:$0xff] }
   0x6   :  { %106 = vmatpush.bf16.msra.mxu0 %v1221_v2  ;;  %1226 = vmatpush.bf16.msra.mxu3 %v1221_v2 }
   0x7   :  { %164 = vmatpush.bf16.msra.mxu1 %v1407_v3  ;;  %280 = vmatpush.bf16.msra.mxu2 %v1407_v3 }
   0x9   :  { %1178 = vmatmul.msk.bf16.vlgmr.msra.gmra.mxu0 %vm80_vm0, %v1215_v4  ;;  %v1216_v4 = vld [vmem:[%s1709_s0 + $0x8] sm:$0xff] }
   0xa   :  { %409 = vmatpush.bf16.msrb.mxu3 %v1398_v1  ;;  %165 = vmatmul.bf16.vlgmr.msra.gmra.mxu1 %v1363_v5 }
   0xb   :  { %523 = vmatpush.bf16.msrb.mxu1 %v1398_v1  ;;  %652 = vmatpush.bf16.msrb.mxu2 %v1398_v1 }
   0xe   :  { %410 = vmatpush.bf16.msrb.mxu3 %v1407_v3 }
   0xf   :  { %524 = vmatpush.bf16.msrb.mxu1 %v1407_v3  ;;  %653 = vmatpush.bf16.msrb.mxu2 %v1407_v3 }
  0x13   :  { %895 = vmatpush.bf16.msra.mxu1 %v1398_v1 }
  0x17   :  { %896 = vmatpush.bf16.msra.mxu1 %v1407_v3 }
  0x19   :  { %1179 = vmatmul.msk.bf16.gmra.mxu0 %vm80_vm0, %v1216_v4 }
  0x86   :  { %v108_v7 = vpop.f32.mrf.mxu0 }
  0x87   :  { %v166_v8 = vpop.f32.mrf.mxu1  ;;  %v109_v9 = vadd.f32 %v1427_v6, %v108_v7 }
  0x89   :  { %v171_v10 = vadd.f32 %v166_v8, %v109_v9 }
  0x8b   :  { %1232 = vtanh.f32 %v171_v10  ;;  %v1192_v17 = vmul.f32 -1.442695, %v171_v10 }
  0x8e   :  { %v110_v11 = vpop.f32.mrf.mxu0 }
  0x8f   :  { %v1431_v12 = vadd.f32 %v1427_v6, %v110_v11  ;;  %v168_v13 = vpop.f32.mrf.mxu1 }
  0x91   :  { %v1233_v14 = vpop.eup %1232  ;;  %v172_v15 = vadd.f32 %v168_v13, %v1431_v12 }
  0x92   :  { %217 = vrot.lane.b32.xlu0 %v1233_v14, %s1364_s25 }
  0x93   :  { %1234 = vtanh.f32 %v172_v15  ;;  %v1193_v18 = vmul.f32 -1.442695, %v172_v15 }
  0x94   :  { %1236 = vpow2.f32 %v1192_v17 }
  0x95   :  { %1238 = vpow2.f32 %v1193_v18 }
  0x96   :  { %v113_v10 = vpop.f32.mrf.mxu0 }
  0x97   :  { %v114_v11 = vadd.f32 %v1427_v6, %v113_v10 }
  0x99   :  { %v1235_v16 = vpop.eup %1234 }
  0x9a   :  { %219 = vrot.lane.b32.xlu0 %v1235_v16, %s1364_s25  ;;  %v1237_v19 = vpop.eup %1236 }
  0x9b   :  { %v179_v20 = vadd.f32 1.0, %v1237_v19  ;;  %v1239_v21 = vpop.eup %1238 }
  0x9c   :  { %v180_v22 = vadd.f32 1.0, %v1239_v21 }
  0x9d   :  { %1240 = vrcp.f32 %v179_v20  ;;  %v192_v31 = vand.u32 2147483648, %v179_v20  ;;  %vm186_vm2 = vweird.f32 %v179_v20  ;;  %v190_v32 = vand.u32 2147483647, %v179_v20 }
  0x9e   :  { %1242 = vrcp.f32 %v180_v22  ;;  %v207_v40 = vand.u32 2147483648, %v180_v22  ;;  %vm201_vm6 = vweird.f32 %v180_v22  ;;  %v205_v41 = vand.u32 2147483647, %v180_v22 }
  0x9f   :  { %v193_v35 = vor.u32 1.1754944e-38, %v192_v31  ;;  %vm191_vm4 = vcmp.eq.f32.partialorder %v190_v32, 8.507059e+37 }
  0xa0   :  { %v208_v43 = vor.u32 1.1754944e-38, %v207_v40  ;;  %vm206_vm8 = vcmp.eq.f32.partialorder %v205_v41, 8.507059e+37 }
  0xa3   :  { %v1241_v23 = vpop.eup %1240 }
  0xa4   :  { %v182_v24 = vmul.f32 %v1241_v23, %v179_v20  ;;  %v1243_v26 = vpop.eup %1242  ;;  %vm187_vm1 = vweird.f32 %v1241_v23 }
  0xa5   :  { %v197_v28 = vmul.f32 %v1243_v26, %v180_v22  ;;  %vm188_vm3 = vmor %vm186_vm2, %vm187_vm1  ;;  %vm202_vm5 = vweird.f32 %v1243_v26 }
  0xa6   :  { %v183_v25 = vsub.f32 1.0, %v182_v24  ;;  %vm203_vm7 = vmor %vm201_vm6, %vm202_vm5  ;;  %vm1124_vm6 = vcmask 1040384  }
  0xa7   :  { %v198_v30 = vsub.f32 1.0, %v197_v28 }
  0xa8   :  { %v184_v27 = vmul.f32 %v1241_v23, %v183_v25 }
  0xa9   :  { %v199_v34 = vmul.f32 %v1243_v26, %v198_v30 }
  0xaa   :  { %v185_v29 = vadd.f32 %v1241_v23, %v184_v27 }
  0xab   :  { %v200_v39 = vadd.f32 %v1243_v26, %v199_v34 }
  0xac   :  { %v189_v33 = vsel %vm188_vm3, %v1241_v23, %v185_v29 }
  0xad   :  { %v194_v37 = vsel %vm191_vm4, %v193_v35, %v189_v33  ;;  %v204_v42 = vsel %vm203_vm7, %v1243_v26, %v200_v39 }
  0xae   :  { %v209_v44 = vsel %vm206_vm8, %v208_v43, %v204_v42  ;;  %v213_v47 = vmul.f32 0.0, %v194_v37 }
  0xaf   :  { %v214_v50 = vmul.f32 0.0, %v209_v44 }
 0x104   :  { %v218_v36 = vpop.permute.xlu0 %217 }
 0x105   :  { %v223_v38 = vmul.f32 %v218_v36, %v194_v37 }
 0x107   :  { %227 = vrot.lane.b32.xlu1 %v223_v38, %s1365_s26 }
 0x10c   :  { %v220_v45 = vpop.permute.xlu0 %219 }
 0x10d   :  { %v224_v46 = vmul.f32 %v220_v45, %v209_v44 }
 0x10f   :  { %229 = vrot.lane.b32.xlu1 %v224_v46, %s1365_s26 }
 0x179   :  { %v228_v48 = vpop.permute.xlu1 %227 }
 0x17a   :  { %v1438_v49 = vadd.f32 %v228_v48, %v213_v47 }
 0x17c   :  { %1244 = vtanh.f32 %v1438_v49  ;;  %v339_v54 = vrot.slane %v1438_v49, 4  ;;  %v1366_v49 = vmov 12.0  }
 0x181   :  { %v230_v51 = vpop.permute.xlu1 %229 }
 0x182   :  { %v1245_v52 = vpop.eup %1244  ;;  %v234_v53 = vadd.f32 %v230_v51, %v214_v50 }
 0x183   :  { %239 = vrot.lane.b32.xlu2 %v1245_v52, %s1364_s25 }
 0x184   :  { %1246 = vtanh.f32 %v234_v53  ;;  %v340_v55 = vrot.slane %v234_v53, 4 }
 0x186   :  { %v1446_v56 = vsel %vm289_vm9, %v339_v54, %v340_v55 }
 0x18a   :  { %v1247_v57 = vpop.eup %1246 }
 0x18b   :  { %241 = vrot.lane.b32.xlu2 %v1247_v57, %s1364_s25 }
 0x1dd   :  { %v240_v58 = vpop.permute.xlu2 %239 }
 0x1de   :  { %v245_v59 = vmul.f32 %v240_v58, %v194_v37 }
 0x1e0   :  { %v248_v62 = vsel %vm247_vm10, %v245_v59, 0.0 }
 0x1e5   :  { %v242_v60 = vpop.permute.xlu2 %241 }
 0x1e6   :  { %v246_v61 = vmul.f32 %v242_v60, %v209_v44 }
 0x1e8   :  { %v250_v63 = vsel %vm249_vm11, %v246_v61, 0.0  ;;  %v266_v0 = vpack.c.bf16 %v246_v61, %v245_v59  ;;  %v1219_v61 = vld [vmem:[%s1709_s0 + $0x20] sm:$0xff] }
 0x1e9   :  { %v1451_v2 = vadd.f32 %v250_v63, %v248_v62  ;;  %1182 = vmatmul.msk.bf16.vlgmr.msra.gmra.mxu3 %vm80_vm0, %v1219_v61 }
 0x1ea   :  { %268 = vrot.lane.b32.xlu0 %v266_v0, %s1365_s26  ;;  %766 = vmatpush.bf16.msra.mxu3 %v1398_v1 }
 0x1eb   :  { %v252_v62 = vrot.slane %v1451_v2, 4 }
 0x1ee   :  { %767 = vmatpush.bf16.msra.mxu3 %v1407_v3 }
 0x25c   :  { %v269_v5 = vpop.permute.xlu0 %268 }
 0x25d   :  { %1194 = vmatmul.msk.bf16.vlgmr.msra.gmra.mxu2 %vm80_vm0, %v269_v5  ;;  %v253_v5 = vadd.f32 %v252_v62, %v1451_v2 }
 0x25e   :  { %1009 = vmatpush.bf16.msra.mxu2 %v1398_v1  ;;  %v1220_v1 = vld [vmem:[%s1709_s0 + $0x28] sm:$0xff] }
 0x25f   :  { %1183 = vmatmul.msk.bf16.gmra.mxu3 %vm80_vm0, %v1220_v1 }
 0x262   :  { %1010 = vmatpush.bf16.msra.mxu2 %v1407_v3 }
 0x2e0   :  { %v282_v7 = vpop.f32.mrf.mxu2 }
 0x2e1   :  { %v290_v8 = vrot.slane %v282_v7, 4 }
 0x2e3   :  { %v295_v9 = vadd.f32 %v290_v8, %v1431_v12 }
 0x2e5   :  { %1248 = vtanh.f32 %v295_v9  ;;  %v1195_v21 = vmul.f32 -1.442695, %v295_v9 }
 0x2e8   :  { %v284_v13 = vpop.f32.mrf.mxu2 }
 0x2e9   :  { %v291_v14 = vrot.slane %v284_v13, 4  ;;  %v254_v13 = vrot.slane %v253_v5, 2 }
 0x2eb   :  { %v1249_v15 = vpop.eup %1248  ;;  %v292_v16 = vsel %vm289_vm9, %v290_v8, %v291_v14  ;;  %v255_v2 = vadd.f32 %v254_v13, %v253_v5 }
 0x2ec   :  { %v296_v17 = vadd.f32 %v292_v16, %v114_v11  ;;  %348 = vrot.lane.b32.xlu1 %v1249_v15, %s1364_s25 }
 0x2ee   :  { %1250 = vtanh.f32 %v296_v17  ;;  %v1196_v19 = vmul.f32 -1.442695, %v296_v17 }
 0x2f0   :  { %1252 = vpow2.f32 %v1196_v19 }
 0x2f4   :  { %v1251_v18 = vpop.eup %1250 }
 0x2f5   :  { %350 = vrot.lane.b32.xlu2 %v1251_v18, %s1364_s25 }
 0x2f6   :  { %v1253_v20 = vpop.eup %1252 }
 0x2f7   :  { %v304_v12 = vadd.f32 1.0, %v1253_v20 }
 0x2f9   :  { %1254 = vrcp.f32 %v304_v12  ;;  %v331_v30 = vand.u32 2147483648, %v304_v12  ;;  %vm325_vm13 = vweird.f32 %v304_v12  ;;  %v329_v31 = vand.u32 2147483647, %v304_v12 }
 0x2fa   :  { %1256 = vpow2.f32 %v1195_v21  ;;  %v256_v21 = vrot.slane %v255_v2, 1 }
 0x2fb   :  { %v332_v34 = vor.u32 1.1754944e-38, %v331_v30  ;;  %vm330_vm15 = vcmp.eq.f32.partialorder %v329_v31, 8.507059e+37 }
 0x2ff   :  { %v1255_v22 = vpop.eup %1254 }
 0x300   :  { %v1257_v23 = vpop.eup %1256  ;;  %v321_v24 = vmul.f32 %v1255_v22, %v304_v12  ;;  %vm326_vm12 = vweird.f32 %v1255_v22 }
 0x301   :  { %v303_v25 = vadd.f32 1.0, %v1257_v23  ;;  %vm327_vm14 = vmor %vm325_vm13, %vm326_vm12 }
 0x302   :  { %v322_v26 = vsub.f32 1.0, %v321_v24 }
 0x303   :  { %1258 = vrcp.f32 %v303_v25  ;;  %v316_v41 = vand.u32 2147483648, %v303_v25  ;;  %vm310_vm2 = vweird.f32 %v303_v25  ;;  %v314_v42 = vand.u32 2147483647, %v303_v25 }
 0x304   :  { %v323_v27 = vmul.f32 %v1255_v22, %v322_v26 }
 0x305   :  { %v317_v44 = vor.u32 1.1754944e-38, %v316_v41  ;;  %vm315_vm4 = vcmp.eq.f32.partialorder %v314_v42, 8.507059e+37 }
 0x306   :  { %v324_v29 = vadd.f32 %v1255_v22, %v323_v27 }
 0x308   :  { %v328_v33 = vsel %vm327_vm14, %v1255_v22, %v324_v29 }
 0x309   :  { %v1259_v28 = vpop.eup %1258  ;;  %v333_v36 = vsel %vm330_vm15, %v332_v34, %v328_v33  ;;  %v1509_v34 = vpop.f32.mrf.mxu3 }
 0x30a   :  { %v306_v32 = vmul.f32 %v1259_v28, %v303_v25  ;;  %vm311_vm1 = vweird.f32 %v1259_v28  ;;  %v345_v48 = vmul.f32 %v1446_v56, %v333_v36  ;;  %v257_v25 = vadd.f32 %v256_v21, %v255_v2 }
 0x30b   :  { %vm312_vm3 = vmor %vm310_vm2, %vm311_vm1 }
 0x30c   :  { %v307_v37 = vsub.f32 1.0, %v306_v32  ;;  %v1217_v32 = vld [vmem:[%s1709_s0 + $0x10] sm:$0xff] }
 0x30d   :  { %1180 = vmatmul.msk.bf16.gmra.mxu0 %vm80_vm0, %v1217_v32 }
 0x30e   :  { %v308_v39 = vmul.f32 %v1259_v28, %v307_v37 }
 0x310   :  { %v309_v40 = vadd.f32 %v1259_v28, %v308_v39 }
 0x312   :  { %v313_v43 = vsel %vm312_vm3, %v1259_v28, %v309_v40  ;;  %vm1126_vm3 = vcmask 1041408  }
 0x313   :  { %v318_v46 = vsel %vm315_vm4, %v317_v44, %v313_v43 }
 0x314   :  { %v344_v53 = vmul.f32 %v339_v54, %v318_v46 }
 0x34f   :  { %v351_v35 = vpop.permute.xlu2 %350 }
 0x350   :  { %v355_v38 = vmul.f32 %v351_v35, %v333_v36  ;;  %v1511_v35 = vpop.f32.mrf.mxu3 }
 0x352   :  { %360 = vrot.lane.b32.xlu1 %v355_v38, %s1365_s26  ;;  %v115_v38 = vpop.f32.mrf.mxu0 }
 0x353   :  { %v116_v39 = vadd.f32 %v1427_v6, %v115_v38 }
 0x35e   :  { %v349_v45 = vpop.permute.xlu1 %348 }
 0x35f   :  { %v354_v47 = vmul.f32 %v349_v45, %v318_v46 }
 0x361   :  { %358 = vrot.lane.b32.xlu0 %v354_v47, %s1365_s26 }
 0x38a   :  { %v118_v42 = vpop.f32.mrf.mxu0 }
 0x38b   :  { %v1519_v43 = vadd.f32 %v1427_v6, %v118_v42 }
 0x3c4   :  { %v361_v50 = vpop.permute.xlu1 %360 }
 0x3c5   :  { %v1469_v51 = vadd.f32 %v361_v50, %v345_v48 }
 0x3c7   :  { %1260 = vtanh.f32 %v1469_v51  ;;  %v462_v58 = vrot.slane %v1469_v51, 4 }
 0x3cd   :  { %v1261_v52 = vpop.eup %1260 }
 0x3ce   :  { %372 = vrot.lane.b32.xlu0 %v1261_v52, %s1364_s25 }
 0x3d3   :  { %v359_v55 = vpop.permute.xlu0 %358 }
 0x3d4   :  { %v364_v57 = vadd.f32 %v359_v55, %v344_v53 }
 0x3d6   :  { %1262 = vtanh.f32 %v364_v57  ;;  %v461_v59 = vrot.slane %v364_v57, 4 }
 0x3d7   :  { %1264 = vrcp.f32 %v1366_v49 }
 0x3d8   :  { %v1479_v56 = vsel %vm289_vm9, %v461_v59, %v462_v58 }
 0x3dc   :  { %v1263_v60 = vpop.eup %1262 }
 0x3dd   :  { %370 = vrot.lane.b32.xlu2 %v1263_v60, %s1364_s25  ;;  %v1265_v63 = vpop.eup %1264 }
 0x3de   :  { %v259_v8 = vmul.f32 12.0, %v1265_v63  ;;  %vm263_vm5 = vweird.f32 %v1265_v63 }
 0x3e0   :  { %v260_v16 = vsub.f32 1.0, %v259_v8 }
 0x3e2   :  { %v261_v20 = vmul.f32 %v1265_v63, %v260_v16 }
 0x3e4   :  { %v262_v23 = vadd.f32 %v1265_v63, %v261_v20 }
 0x3e6   :  { %v1498_v27 = vsel %vm263_vm5, %v1265_v63, %v262_v23 }
 0x3e7   :  { %v265_v29 = vmul.f32 %v1498_v27, %v257_v25 }
 0x437   :  { %v371_v54 = vpop.permute.xlu2 %370 }
 0x438   :  { %v376_v0 = vmul.f32 %v371_v54, %v318_v46 }
 0x43a   :  { %v380_v9 = vrot.slane %v376_v0, 4 }
 0x440   :  { %v373_v4 = vpop.permute.xlu0 %372 }
 0x441   :  { %v377_v7 = vmul.f32 %v373_v4, %v333_v36  ;;  %v1513_v36 = vpop.f32.mrf.mxu3 }
 0x443   :  { %v381_v10 = vrot.slane %v377_v7, 4  ;;  %v395_v11 = vpack.c.bf16 %v377_v7, %v376_v0 }
 0x445   :  { %v382_v14 = vsel %vm289_vm9, %v380_v9, %v381_v10  ;;  %v386_v3 = vsel %vm249_vm11, %v381_v10, 0.0  ;;  %v397_v15 = vrot.slane %v395_v11, 2 }
 0x446   :  { %v385_v17 = vsel %vm247_vm10, %v382_v14, 0.0 }
 0x447   :  { %v387_v18 = vadd.f32 %v386_v3, %v385_v17  ;;  %398 = vrot.lane.b32.xlu1 %v397_v15, %s1365_s26 }
 0x449   :  { %v388_v19 = vrot.slane %v387_v18, 4  ;;  %v1515_v37 = vpop.f32.mrf.mxu3 }
 0x44b   :  { %v389_v12 = vadd.f32 %v388_v19, %v387_v18 }
 0x44d   :  { %v390_v22 = vrot.slane %v389_v12, 2 }
 0x44f   :  { %v391_v24 = vadd.f32 %v390_v22, %v389_v12 }
 0x451   :  { %v392_v26 = vrot.slane %v391_v24, 1 }
 0x453   :  { %v393_v28 = vadd.f32 %v392_v26, %v391_v24 }
 0x455   :  { %v394_v30 = vmul.f32 %v393_v28, %v1498_v27 }
 0x457   :  { %v1502_v31 = vsel %vm1124_vm6, %v265_v29, %v394_v30 }
 0x4b9   :  { %v399_v33 = vpop.permute.xlu1 %398 }
 0x4ba   :  { %1197 = vmatmul.msk.bf16.vlgmr.msrb.gmra.mxu3 %vm80_vm0, %v399_v33 }
 0x53d   :  { %v412_v40 = vpop.f32.mrf.mxu3 }
 0x53e   :  { %v417_v41 = vadd.f32 %v412_v40, %v116_v39 }
 0x540   :  { %1266 = vtanh.f32 %v417_v41  ;;  %v1198_v48 = vmul.f32 -1.442695, %v417_v41 }
 0x545   :  { %v414_v44 = vpop.f32.mrf.mxu3 }
 0x546   :  { %v1267_v45 = vpop.eup %1266  ;;  %v418_v46 = vadd.f32 %v414_v44, %v1519_v43 }
 0x547   :  { %470 = vrot.lane.b32.xlu2 %v1267_v45, %s1364_s25 }
 0x548   :  { %1268 = vtanh.f32 %v418_v46  ;;  %v1199_v59 = vmul.f32 -1.442695, %v418_v46 }
 0x549   :  { %1270 = vpow2.f32 %v1198_v48 }
 0x54e   :  { %v1269_v47 = vpop.eup %1268 }
 0x54f   :  { %472 = vrot.lane.b32.xlu0 %v1269_v47, %s1364_s25  ;;  %v1271_v50 = vpop.eup %1270 }
 0x550   :  { %v425_v52 = vadd.f32 1.0, %v1271_v50 }
 0x552   :  { %1272 = vrcp.f32 %v425_v52  ;;  %v438_v49 = vand.u32 2147483648, %v425_v52  ;;  %vm432_vm8 = vweird.f32 %v425_v52  ;;  %v436_v54 = vand.u32 2147483647, %v425_v52 }
 0x553   :  { %1274 = vpow2.f32 %v1199_v59 }
 0x554   :  { %v439_v0 = vor.u32 1.1754944e-38, %v438_v49  ;;  %vm437_vm13 = vcmp.eq.f32.partialorder %v436_v54, 8.507059e+37 }
 0x558   :  { %v1273_v53 = vpop.eup %1272 }
 0x559   :  { %v428_v55 = vmul.f32 %v1273_v53, %v425_v52  ;;  %vm433_vm7 = vweird.f32 %v1273_v53  ;;  %v1275_v62 = vpop.eup %1274 }
 0x55a   :  { %vm434_vm12 = vmor %vm432_vm8, %vm433_vm7  ;;  %v426_v4 = vadd.f32 1.0, %v1275_v62 }
 0x55b   :  { %v429_v57 = vsub.f32 1.0, %v428_v55 }
 0x55c   :  { %1276 = vrcp.f32 %v426_v4  ;;  %v453_v14 = vand.u32 2147483648, %v426_v4  ;;  %vm447_vm15 = vweird.f32 %v426_v4  ;;  %v451_v3 = vand.u32 2147483647, %v426_v4 }
 0x55d   :  { %v430_v60 = vmul.f32 %v1273_v53, %v429_v57  ;;  %v120_v57 = vpop.f32.mrf.mxu0 }
 0x55e   :  { %v454_v16 = vor.u32 1.1754944e-38, %v453_v14  ;;  %vm452_vm2 = vcmp.eq.f32.partialorder %v451_v3, 8.507059e+37 }
 0x55f   :  { %v431_v61 = vadd.f32 %v1273_v53, %v430_v60 }
 0x561   :  { %v435_v63 = vsel %vm434_vm12, %v1273_v53, %v431_v61  ;;  %v121_v61 = vadd.f32 %v1427_v6, %v120_v57 }
 0x562   :  { %v440_v7 = vsel %vm437_vm13, %v439_v0, %v435_v63  ;;  %v1277_v9 = vpop.eup %1276 }
 0x563   :  { %v443_v10 = vmul.f32 %v1277_v9, %v426_v4  ;;  %vm448_vm14 = vweird.f32 %v1277_v9  ;;  %v466_v19 = vmul.f32 %v1479_v56, %v440_v7 }
 0x564   :  { %vm449_vm1 = vmor %vm447_vm15, %vm448_vm14  ;;  %vm1128_vm15 = vcmask 1042432  }
 0x565   :  { %v444_v11 = vsub.f32 1.0, %v443_v10 }
 0x567   :  { %v445_v1 = vmul.f32 %v1277_v9, %v444_v11 }
 0x569   :  { %v446_v13 = vadd.f32 %v1277_v9, %v445_v1 }
 0x56b   :  { %v450_v15 = vsel %vm449_vm1, %v1277_v9, %v446_v13 }
 0x56c   :  { %v455_v18 = vsel %vm452_vm2, %v454_v16, %v450_v15 }
 0x56d   :  { %v467_v21 = vmul.f32 %v462_v58, %v455_v18 }
 0x5a1   :  { %v471_v5 = vpop.permute.xlu2 %470 }
 0x5a2   :  { %v476_v8 = vmul.f32 %v471_v5, %v440_v7 }
 0x5a4   :  { %480 = vrot.lane.b32.xlu1 %v476_v8, %s1365_s26 }
 0x5c1   :  { %v473_v17 = vpop.permute.xlu0 %472 }
 0x5c2   :  { %v477_v2 = vmul.f32 %v473_v17, %v455_v18 }
 0x5c4   :  { %482 = vrot.lane.b32.xlu2 %v477_v2, %s1365_s26 }
 0x616   :  { %v481_v20 = vpop.permute.xlu1 %480 }
 0x617   :  { %v1527_v12 = vadd.f32 %v481_v20, %v466_v19 }
 0x619   :  { %1278 = vtanh.f32 %v1527_v12  ;;  %v582_v25 = vrot.slane %v1527_v12, 4 }
 0x61e   :  { %v483_v22 = vpop.permute.xlu2 %482 }
 0x61f   :  { %v1279_v23 = vpop.eup %1278  ;;  %v487_v24 = vadd.f32 %v483_v22, %v467_v21 }
 0x620   :  { %492 = vrot.lane.b32.xlu0 %v1279_v23, %s1364_s25 }
 0x621   :  { %1280 = vtanh.f32 %v487_v24  ;;  %v583_v26 = vrot.slane %v487_v24, 4 }
 0x623   :  { %v1537_v56 = vsel %vm289_vm9, %v582_v25, %v583_v26 }
 0x627   :  { %v1281_v28 = vpop.eup %1280 }
 0x628   :  { %494 = vrot.lane.b32.xlu1 %v1281_v28, %s1364_s25 }
 0x692   :  { %v493_v29 = vpop.permute.xlu0 %492 }
 0x693   :  { %v498_v51 = vmul.f32 %v493_v29, %v440_v7 }
 0x695   :  { %v500_v32 = vsel %vm247_vm10, %v498_v51, 0.0 }
 0x69a   :  { %v495_v58 = vpop.permute.xlu1 %494 }
 0x69b   :  { %v499_v30 = vmul.f32 %v495_v58, %v455_v18 }
 0x69d   :  { %v501_v33 = vsel %vm249_vm11, %v499_v30, 0.0  ;;  %v510_v38 = vpack.c.bf16 %v499_v30, %v498_v51 }
 0x69e   :  { %v502_v39 = vadd.f32 %v501_v33, %v500_v32 }
 0x69f   :  { %512 = vrot.lane.b32.xlu2 %v510_v38, %s1365_s26 }
 0x6a0   :  { %v503_v40 = vrot.slane %v502_v39, 4 }
 0x6a2   :  { %v504_v41 = vadd.f32 %v503_v40, %v502_v39 }
 0x6a4   :  { %v505_v42 = vrot.slane %v504_v41, 2 }
 0x6a6   :  { %v506_v44 = vadd.f32 %v505_v42, %v504_v41 }
 0x6a8   :  { %v507_v45 = vrot.slane %v506_v44, 1 }
 0x6aa   :  { %v508_v46 = vadd.f32 %v507_v45, %v506_v44 }
 0x6ac   :  { %v509_v47 = vmul.f32 %v508_v46, %v1498_v27 }
 0x6ae   :  { %v1545_v48 = vsel %vm1126_vm3, %v1502_v31, %v509_v47 }
 0x6f9   :  { %v513_v50 = vpop.permute.xlu2 %512 }
 0x6fa   :  { %1200 = vmatmul.msk.bf16.vlgmr.msrb.gmra.mxu1 %vm80_vm0, %v513_v50 }
 0x777   :  { %v526_v52 = vpop.f32.mrf.mxu1 }
 0x778   :  { %v533_v53 = vrot.slane %v526_v52, 4 }
 0x77a   :  { %v538_v55 = vadd.f32 %v533_v53, %v1519_v43 }
 0x77c   :  { %1282 = vtanh.f32 %v538_v55  ;;  %v1201_v63 = vmul.f32 -1.442695, %v538_v55 }
 0x77f   :  { %v528_v59 = vpop.f32.mrf.mxu1 }
 0x780   :  { %v534_v60 = vrot.slane %v528_v59, 4 }
 0x782   :  { %v1283_v49 = vpop.eup %1282  ;;  %v535_v54 = vsel %vm289_vm9, %v533_v53, %v534_v60 }
 0x783   :  { %v539_v62 = vadd.f32 %v535_v54, %v121_v61  ;;  %591 = vrot.lane.b32.xlu0 %v1283_v49, %s1364_s25 }
 0x785   :  { %1284 = vtanh.f32 %v539_v62  ;;  %v1202_v0 = vmul.f32 -1.442695, %v539_v62 }
 0x786   :  { %1286 = vpow2.f32 %v1201_v63 }
 0x787   :  { %1288 = vpow2.f32 %v1202_v0 }
 0x78b   :  { %v1285_v31 = vpop.eup %1284 }
 0x78c   :  { %593 = vrot.lane.b32.xlu1 %v1285_v31, %s1364_s25  ;;  %v1287_v43 = vpop.eup %1286 }
 0x78d   :  { %v546_v4 = vadd.f32 1.0, %v1287_v43  ;;  %v1289_v5 = vpop.eup %1288 }
 0x78e   :  { %v547_v7 = vadd.f32 1.0, %v1289_v5 }
 0x78f   :  { %1290 = vrcp.f32 %v546_v4  ;;  %v559_v3 = vand.u32 2147483648, %v546_v4  ;;  %vm553_vm5 = vweird.f32 %v546_v4  ;;  %v557_v16 = vand.u32 2147483647, %v546_v4 }
 0x790   :  { %1292 = vrcp.f32 %v547_v7  ;;  %v574_v23 = vand.u32 2147483648, %v547_v7  ;;  %vm568_vm12 = vweird.f32 %v547_v7  ;;  %v572_v24 = vand.u32 2147483647, %v547_v7 }
 0x791   :  { %v560_v18 = vor.u32 1.1754944e-38, %v559_v3  ;;  %vm558_vm7 = vcmp.eq.f32.partialorder %v557_v16, 8.507059e+37 }
 0x792   :  { %v575_v28 = vor.u32 1.1754944e-38, %v574_v23  ;;  %vm573_vm14 = vcmp.eq.f32.partialorder %v572_v24, 8.507059e+37 }
 0x795   :  { %v1291_v8 = vpop.eup %1290 }
 0x796   :  { %v549_v9 = vmul.f32 %v1291_v8, %v546_v4  ;;  %v1293_v11 = vpop.eup %1292  ;;  %vm554_vm4 = vweird.f32 %v1291_v8 }
 0x797   :  { %v564_v13 = vmul.f32 %v1293_v11, %v547_v7  ;;  %vm555_vm6 = vmor %vm553_vm5, %vm554_vm4  ;;  %vm569_vm8 = vweird.f32 %v1293_v11 }
 0x798   :  { %v550_v10 = vsub.f32 1.0, %v549_v9  ;;  %vm570_vm13 = vmor %vm568_vm12, %vm569_vm8 }
 0x799   :  { %v565_v15 = vsub.f32 1.0, %v564_v13 }
 0x79a   :  { %v551_v1 = vmul.f32 %v1291_v8, %v550_v10 }
 0x79b   :  { %v566_v2 = vmul.f32 %v1293_v11, %v565_v15 }
 0x79c   :  { %v552_v14 = vadd.f32 %v1291_v8, %v551_v1 }
 0x79d   :  { %v567_v22 = vadd.f32 %v1293_v11, %v566_v2 }
 0x79e   :  { %v556_v17 = vsel %vm555_vm6, %v1291_v8, %v552_v14 }
 0x79f   :  { %v561_v20 = vsel %vm558_vm7, %v560_v18, %v556_v17  ;;  %v571_v26 = vsel %vm570_vm13, %v1293_v11, %v567_v22 }
 0x7a0   :  { %v576_v51 = vsel %vm573_vm14, %v575_v28, %v571_v26  ;;  %v587_v30 = vmul.f32 %v582_v25, %v561_v20 }
 0x7a1   :  { %v588_v39 = vmul.f32 %v1537_v56, %v576_v51  ;;  %v1218_v56 = vld [vmem:[%s1709_s0 + $0x18] sm:$0xff] }
 0x7a2   :  { %1181 = vmatmul.msk.bf16.gmra.mxu0 %vm80_vm0, %v1218_v56 }
 0x7f5   :  { %v592_v19 = vpop.permute.xlu0 %591 }
 0x7f6   :  { %v597_v21 = vmul.f32 %v592_v19, %v561_v20 }
 0x7f8   :  { %601 = vrot.lane.b32.xlu2 %v597_v21, %s1365_s26 }
 0x7fe   :  { %v594_v29 = vpop.permute.xlu1 %593 }
 0x7ff   :  { %v598_v58 = vmul.f32 %v594_v29, %v576_v51 }
 0x801   :  { %603 = vrot.lane.b32.xlu0 %v598_v58, %s1365_s26 }
 0x81f   :  { %v123_v8 = vpop.f32.mrf.mxu0 }
 0x820   :  { %v124_v9 = vadd.f32 %v1427_v6, %v123_v8 }
 0x827   :  { %v125_v1 = vpop.f32.mrf.mxu0 }
 0x828   :  { %v1584_v13 = vadd.f32 %v1427_v6, %v125_v1 }
 0x852   :  { %v602_v32 = vpop.permute.xlu2 %601 }
 0x853   :  { %v607_v33 = vadd.f32 %v602_v32, %v587_v30 }
 0x855   :  { %1294 = vtanh.f32 %v607_v33  ;;  %v704_v42 = vrot.slane %v607_v33, 4 }
 0x85b   :  { %v1295_v38 = vpop.eup %1294 }
 0x85c   :  { %613 = vrot.lane.b32.xlu1 %v1295_v38, %s1364_s25 }
 0x873   :  { %v604_v40 = vpop.permute.xlu0 %603 }
 0x874   :  { %v1559_v41 = vadd.f32 %v604_v40, %v588_v39 }
 0x876   :  { %1296 = vtanh.f32 %v1559_v41  ;;  %v705_v44 = vrot.slane %v1559_v41, 4 }
 0x878   :  { %v1566_v12 = vsel %vm289_vm9, %v704_v42, %v705_v44 }
 0x87c   :  { %v1297_v25 = vpop.eup %1296 }
 0x87d   :  { %615 = vrot.lane.b32.xlu2 %v1297_v25, %s1364_s25 }
 0x8ce   :  { %v614_v45 = vpop.permute.xlu1 %613 }
 0x8cf   :  { %v619_v46 = vmul.f32 %v614_v45, %v561_v20 }
 0x8d1   :  { %v623_v52 = vrot.slane %v619_v46, 4 }
 0x8d7   :  { %v616_v47 = vpop.permute.xlu2 %615 }
 0x8d8   :  { %v620_v50 = vmul.f32 %v616_v47, %v576_v51 }
 0x8da   :  { %v624_v53 = vrot.slane %v620_v50, 4  ;;  %v638_v55 = vpack.c.bf16 %v620_v50, %v619_v46 }
 0x8dc   :  { %v625_v57 = vsel %vm289_vm9, %v623_v52, %v624_v53  ;;  %v629_v59 = vsel %vm249_vm11, %v624_v53, 0.0  ;;  %v640_v60 = vrot.slane %v638_v55, 2 }
 0x8dd   :  { %v628_v61 = vsel %vm247_vm10, %v625_v57, 0.0 }
 0x8de   :  { %v630_v49 = vadd.f32 %v629_v59, %v628_v61  ;;  %641 = vrot.lane.b32.xlu0 %v640_v60, %s1365_s26 }
 0x8e0   :  { %v631_v54 = vrot.slane %v630_v49, 4 }
 0x8e2   :  { %v632_v62 = vadd.f32 %v631_v54, %v630_v49 }
 0x8e4   :  { %v633_v31 = vrot.slane %v632_v62, 2 }
 0x8e6   :  { %v634_v63 = vadd.f32 %v633_v31, %v632_v62 }
 0x8e8   :  { %v635_v0 = vrot.slane %v634_v63, 1 }
 0x8ea   :  { %v636_v43 = vadd.f32 %v635_v0, %v634_v63 }
 0x8ec   :  { %v637_v4 = vmul.f32 %v636_v43, %v1498_v27 }
 0x8ee   :  { %v1579_v5 = vsel %vm1128_vm15, %v1545_v48, %v637_v4 }
 0x950   :  { %v642_v7 = vpop.permute.xlu0 %641 }
 0x951   :  { %1203 = vmatmul.msk.bf16.vlgmr.msrb.gmra.mxu2 %vm80_vm0, %v642_v7 }
 0x9d4   :  { %v655_v10 = vpop.f32.mrf.mxu2 }
 0x9d5   :  { %v660_v11 = vadd.f32 %v655_v10, %v124_v9 }
 0x9d7   :  { %1298 = vtanh.f32 %v660_v11  ;;  %v1204_v2 = vmul.f32 -1.442695, %v660_v11 }
 0x9dc   :  { %v657_v14 = vpop.f32.mrf.mxu2 }
 0x9dd   :  { %v1299_v3 = vpop.eup %1298  ;;  %v661_v15 = vadd.f32 %v657_v14, %v1584_v13 }
 0x9de   :  { %713 = vrot.lane.b32.xlu1 %v1299_v3, %s1364_s25 }
 0x9df   :  { %1300 = vtanh.f32 %v661_v15  ;;  %v1205_v16 = vmul.f32 -1.442695, %v661_v15 }
 0x9e1   :  { %1302 = vpow2.f32 %v1205_v16 }
 0x9e5   :  { %v1301_v48 = vpop.eup %1300 }
 0x9e6   :  { %715 = vrot.lane.b32.xlu2 %v1301_v48, %s1364_s25 }
 0x9e7   :  { %v1303_v17 = vpop.eup %1302 }
 0x9e8   :  { %v669_v18 = vadd.f32 1.0, %v1303_v17 }
 0x9ea   :  { %1304 = vrcp.f32 %v669_v18  ;;  %v696_v29 = vand.u32 2147483648, %v669_v18  ;;  %vm690_vm2 = vweird.f32 %v669_v18  ;;  %v694_v51 = vand.u32 2147483647, %v669_v18 }
 0x9eb   :  { %1306 = vpow2.f32 %v1204_v2 }
 0x9ec   :  { %v697_v32 = vor.u32 1.1754944e-38, %v696_v29  ;;  %vm695_vm4 = vcmp.eq.f32.partialorder %v694_v51, 8.507059e+37 }
 0x9f0   :  { %v1305_v19 = vpop.eup %1304 }
 0x9f1   :  { %v1307_v20 = vpop.eup %1306  ;;  %v686_v21 = vmul.f32 %v1305_v19, %v669_v18  ;;  %vm691_vm1 = vweird.f32 %v1305_v19 }
 0x9f2   :  { %v668_v22 = vadd.f32 1.0, %v1307_v20  ;;  %vm692_vm3 = vmor %vm690_vm2, %vm691_vm1 }
 0x9f3   :  { %v687_v23 = vsub.f32 1.0, %v686_v21 }
 0x9f4   :  { %1308 = vrcp.f32 %v668_v22  ;;  %v681_v56 = vand.u32 2147483648, %v668_v22  ;;  %vm675_vm6 = vweird.f32 %v668_v22  ;;  %v679_v45 = vand.u32 2147483647, %v668_v22 }
 0x9f5   :  { %v688_v24 = vmul.f32 %v1305_v19, %v687_v23 }
 0x9f6   :  { %v682_v47 = vor.u32 1.1754944e-38, %v681_v56  ;;  %vm680_vm8 = vcmp.eq.f32.partialorder %v679_v45, 8.507059e+37 }
 0x9f7   :  { %v689_v26 = vadd.f32 %v1305_v19, %v688_v24 }
 0x9f9   :  { %v693_v58 = vsel %vm692_vm3, %v1305_v19, %v689_v26 }
 0x9fa   :  { %v1309_v28 = vpop.eup %1308  ;;  %v698_v38 = vsel %vm695_vm4, %v697_v32, %v693_v58 }
 0x9fb   :  { %v671_v30 = vmul.f32 %v1309_v28, %v668_v22  ;;  %vm676_vm5 = vweird.f32 %v1309_v28  ;;  %v710_v55 = vmul.f32 %v705_v44, %v698_v38  ;;  %v129_v22 = vadd.f32 %v1427_v6, %v1509_v34 }
 0x9fc   :  { %vm677_vm7 = vmor %vm675_vm6, %vm676_vm5  ;;  %vm1131_vm5 = vcmask 1044480  }
 0x9fd   :  { %v672_v40 = vsub.f32 1.0, %v671_v30 }
 0x9ff   :  { %v673_v42 = vmul.f32 %v1309_v28, %v672_v40 }
 0xa01   :  { %v674_v25 = vadd.f32 %v1309_v28, %v673_v42 }
 0xa03   :  { %v678_v46 = vsel %vm677_vm7, %v1309_v28, %v674_v25 }
 0xa04   :  { %v683_v52 = vsel %vm680_vm8, %v682_v47, %v678_v46 }
 0xa05   :  { %v709_v61 = vmul.f32 %v1566_v12, %v683_v52 }
 0xa40   :  { %v716_v33 = vpop.permute.xlu2 %715 }
 0xa41   :  { %v720_v39 = vmul.f32 %v716_v33, %v698_v38 }
 0xa43   :  { %725 = vrot.lane.b32.xlu1 %v720_v39, %s1365_s26 }
 0xa50   :  { %v714_v50 = vpop.permute.xlu1 %713 }
 0xa51   :  { %v719_v53 = vmul.f32 %v714_v50, %v683_v52 }
 0xa53   :  { %723 = vrot.lane.b32.xlu0 %v719_v53, %s1365_s26 }
 0xab5   :  { %v726_v57 = vpop.permute.xlu1 %725 }
 0xab6   :  { %v730_v59 = vadd.f32 %v726_v57, %v710_v55 }
 0xab8   :  { %1310 = vtanh.f32 %v730_v59  ;;  %v826_v62 = vrot.slane %v730_v59, 4 }
 0xabe   :  { %v1311_v60 = vpop.eup %1310 }
 0xabf   :  { %737 = vrot.lane.b32.xlu0 %v1311_v60, %s1364_s25 }
 0xac5   :  { %v724_v49 = vpop.permute.xlu0 %723 }
 0xac6   :  { %v1595_v54 = vadd.f32 %v724_v49, %v709_v61 }
 0xac8   :  { %1312 = vtanh.f32 %v1595_v54  ;;  %v825_v31 = vrot.slane %v1595_v54, 4 }
 0xaca   :  { %v1602_v41 = vsel %vm289_vm9, %v825_v31, %v826_v62 }
 0xace   :  { %v1313_v44 = vpop.eup %1312 }
 0xacf   :  { %735 = vrot.lane.b32.xlu2 %v1313_v44, %s1364_s25 }
 0xb29   :  { %v736_v63 = vpop.permute.xlu2 %735 }
 0xb2a   :  { %v741_v0 = vmul.f32 %v736_v63, %v683_v52 }
 0xb2c   :  { %v743_v4 = vsel %vm247_vm10, %v741_v0, 0.0 }
 0xb31   :  { %v738_v43 = vpop.permute.xlu0 %737 }
 0xb32   :  { %v742_v12 = vmul.f32 %v738_v43, %v698_v38 }
 0xb34   :  { %v744_v7 = vsel %vm249_vm11, %v742_v12, 0.0  ;;  %v753_v8 = vpack.c.bf16 %v742_v12, %v741_v0 }
 0xb35   :  { %v745_v9 = vadd.f32 %v744_v7, %v743_v4 }
 0xb36   :  { %755 = vrot.lane.b32.xlu1 %v753_v8, %s1365_s26 }
 0xb37   :  { %v746_v10 = vrot.slane %v745_v9, 4 }
 0xb39   :  { %v747_v11 = vadd.f32 %v746_v10, %v745_v9 }
 0xb3b   :  { %v748_v1 = vrot.slane %v747_v11, 2 }
 0xb3d   :  { %v749_v14 = vadd.f32 %v748_v1, %v747_v11 }
 0xb3f   :  { %v750_v3 = vrot.slane %v749_v14, 1 }
 0xb41   :  { %v751_v15 = vadd.f32 %v750_v3, %v749_v14 }
 0xb43   :  { %v752_v48 = vmul.f32 %v751_v15, %v1498_v27 }
 0xb45   :  { %v1611_v16 = vsel %vm289_vm9, %v1579_v5, %v752_v48 }
 0xba8   :  { %v756_v17 = vpop.permute.xlu1 %755 }
 0xba9   :  { %1206 = vmatmul.msk.bf16.vlgmr.msra.gmra.mxu3 %vm80_vm0, %v756_v17 }
 0xc2c   :  { %v769_v18 = vpop.f32.mrf.mxu3 }
 0xc2d   :  { %v776_v2 = vrot.slane %v769_v18, 4 }
 0xc2f   :  { %v781_v19 = vadd.f32 %v776_v2, %v1584_v13 }
 0xc31   :  { %1314 = vtanh.f32 %v781_v19  ;;  %v1207_v28 = vmul.f32 -1.442695, %v781_v19 }
 0xc34   :  { %v771_v20 = vpop.f32.mrf.mxu3 }
 0xc35   :  { %v777_v21 = vrot.slane %v771_v20, 4 }
 0xc37   :  { %v1315_v23 = vpop.eup %1314  ;;  %v778_v24 = vsel %vm289_vm9, %v776_v2, %v777_v21 }
 0xc38   :  { %v782_v26 = vadd.f32 %v778_v24, %v129_v22  ;;  %834 = vrot.lane.b32.xlu2 %v1315_v23, %s1364_s25 }
 0xc3a   :  { %1316 = vtanh.f32 %v782_v26  ;;  %v1208_v32 = vmul.f32 -1.442695, %v782_v26 }
 0xc3b   :  { %1318 = vpow2.f32 %v1207_v28 }
 0xc40   :  { %v1317_v5 = vpop.eup %1316 }
 0xc41   :  { %836 = vrot.lane.b32.xlu0 %v1317_v5, %s1364_s25  ;;  %v1319_v29 = vpop.eup %1318 }
 0xc42   :  { %v789_v13 = vadd.f32 1.0, %v1319_v29 }
 0xc44   :  { %1320 = vrcp.f32 %v789_v13  ;;  %v802_v33 = vand.u32 2147483648, %v789_v13  ;;  %vm796_vm13 = vweird.f32 %v789_v13  ;;  %v800_v38 = vand.u32 2147483647, %v789_v13 }
 0xc45   :  { %1322 = vpow2.f32 %v1208_v32 }
 0xc46   :  { %v803_v42 = vor.u32 1.1754944e-38, %v802_v33  ;;  %vm801_vm15 = vcmp.eq.f32.partialorder %v800_v38, 8.507059e+37 }
 0xc4a   :  { %v1321_v51 = vpop.eup %1320 }
 0xc4b   :  { %v792_v58 = vmul.f32 %v1321_v51, %v789_v13  ;;  %vm797_vm12 = vweird.f32 %v1321_v51  ;;  %v1323_v40 = vpop.eup %1322 }
 0xc4c   :  { %vm798_vm14 = vmor %vm796_vm13, %vm797_vm12  ;;  %v790_v45 = vadd.f32 1.0, %v1323_v40 }
 0xc4d   :  { %v793_v30 = vsub.f32 1.0, %v792_v58 }
 0xc4e   :  { %1324 = vrcp.f32 %v790_v45  ;;  %v817_v57 = vand.u32 2147483648, %v790_v45  ;;  %vm811_vm2 = vweird.f32 %v790_v45  ;;  %v815_v59 = vand.u32 2147483647, %v790_v45 }
 0xc4f   :  { %v794_v6 = vmul.f32 %v1321_v51, %v793_v30 }
 0xc50   :  { %v818_v61 = vor.u32 1.1754944e-38, %v817_v57  ;;  %vm816_vm4 = vcmp.eq.f32.partialorder %v815_v59, 8.507059e+37 }
 0xc51   :  { %v795_v34 = vadd.f32 %v1321_v51, %v794_v6 }
 0xc53   :  { %v799_v39 = vsel %vm798_vm14, %v1321_v51, %v795_v34  ;;  %v1648_v51 = vld [vmem:[%s1708_s3] ss:$0 sm:$0xff] }
 0xc54   :  { %v804_v56 = vsel %vm801_vm15, %v803_v42, %v799_v39  ;;  %v1325_v47 = vpop.eup %1324  ;;  %v131_v58 = vadd.f32 %v1648_v51, %v1511_v35  ;;  %v1654_v6 = vadd.f32 %v1648_v51, %v1513_v36 }
 0xc55   :  { %v807_v50 = vmul.f32 %v1325_v47, %v790_v45  ;;  %vm812_vm1 = vweird.f32 %v1325_v47  ;;  %v830_v63 = vmul.f32 %v825_v31, %v804_v56 }
 0xc56   :  { %vm813_vm3 = vmor %vm811_vm2, %vm812_vm1  ;;  %vm1133_vm2 = vcmask 1045504  }
 0xc57   :  { %v808_v52 = vsub.f32 1.0, %v807_v50 }
 0xc59   :  { %v809_v53 = vmul.f32 %v1325_v47, %v808_v52 }
 0xc5b   :  { %v810_v55 = vadd.f32 %v1325_v47, %v809_v53 }
 0xc5d   :  { %v814_v60 = vsel %vm813_vm3, %v1325_v47, %v810_v55 }
 0xc5e   :  { %v819_v62 = vsel %vm816_vm4, %v818_v61, %v814_v60 }
 0xc5f   :  { %v831_v12 = vmul.f32 %v1602_v41, %v819_v62 }
 0xc92   :  { %v835_v25 = vpop.permute.xlu2 %834 }
 0xc93   :  { %v840_v46 = vmul.f32 %v835_v25, %v804_v56 }
 0xc95   :  { %844 = vrot.lane.b32.xlu1 %v840_v46, %s1365_s26 }
 0xcb3   :  { %v837_v49 = vpop.permute.xlu0 %836 }
 0xcb4   :  { %v841_v44 = vmul.f32 %v837_v49, %v819_v62 }
 0xcb6   :  { %846 = vrot.lane.b32.xlu2 %v841_v44, %s1365_s26 }
 0xd07   :  { %v845_v0 = vpop.permute.xlu1 %844 }
 0xd08   :  { %v850_v43 = vadd.f32 %v845_v0, %v830_v63 }
 0xd0a   :  { %1326 = vtanh.f32 %v850_v43  ;;  %v947_v9 = vrot.slane %v850_v43, 4 }
 0xd10   :  { %v1327_v4 = vpop.eup %1326  ;;  %v847_v7 = vpop.permute.xlu2 %846 }
 0xd11   :  { %v1625_v8 = vadd.f32 %v847_v7, %v831_v12  ;;  %856 = vrot.lane.b32.xlu0 %v1327_v4, %s1364_s25 }
 0xd13   :  { %1328 = vtanh.f32 %v1625_v8  ;;  %v948_v10 = vrot.slane %v1625_v8, 4 }
 0xd15   :  { %v1633_v54 = vsel %vm289_vm9, %v947_v9, %v948_v10 }
 0xd19   :  { %v1329_v31 = vpop.eup %1328 }
 0xd1a   :  { %858 = vrot.lane.b32.xlu1 %v1329_v31, %s1364_s25 }
 0xd83   :  { %v857_v41 = vpop.permute.xlu0 %856 }
 0xd84   :  { %v862_v11 = vmul.f32 %v857_v41, %v804_v56 }
 0xd86   :  { %v866_v3 = vrot.slane %v862_v11, 4 }
 0xd8c   :  { %v859_v1 = vpop.permute.xlu1 %858 }
 0xd8d   :  { %v863_v14 = vmul.f32 %v859_v1, %v819_v62 }
 0xd8f   :  { %v867_v15 = vrot.slane %v863_v14, 4  ;;  %v881_v48 = vpack.c.bf16 %v863_v14, %v862_v11 }
 0xd91   :  { %v868_v17 = vsel %vm289_vm9, %v866_v3, %v867_v15  ;;  %v872_v18 = vsel %vm249_vm11, %v867_v15, 0.0  ;;  %v883_v2 = vrot.slane %v881_v48, 2 }
 0xd92   :  { %v871_v19 = vsel %vm247_vm10, %v868_v17, 0.0 }
 0xd93   :  { %v873_v20 = vadd.f32 %v872_v18, %v871_v19  ;;  %884 = vrot.lane.b32.xlu2 %v883_v2, %s1365_s26 }
 0xd95   :  { %v874_v21 = vrot.slane %v873_v20, 4 }
 0xd97   :  { %v875_v22 = vadd.f32 %v874_v21, %v873_v20 }
 0xd99   :  { %v876_v23 = vrot.slane %v875_v22, 2 }
 0xd9b   :  { %v877_v24 = vadd.f32 %v876_v23, %v875_v22 }
 0xd9d   :  { %v878_v26 = vrot.slane %v877_v24, 1 }
 0xd9f   :  { %v879_v5 = vadd.f32 %v878_v26, %v877_v24 }
 0xda1   :  { %v880_v28 = vmul.f32 %v879_v5, %v1498_v27 }
 0xda3   :  { %v1642_v29 = vsel %vm1131_vm5, %v1611_v16, %v880_v28 }
 0xded   :  { %v885_v13 = vpop.permute.xlu2 %884 }
 0xdee   :  { %1209 = vmatmul.msk.bf16.vlgmr.msra.gmra.mxu1 %vm80_vm0, %v885_v13 }
 0xe6b   :  { %v898_v30 = vpop.f32.mrf.mxu1 }
 0xe6c   :  { %v903_v32 = vadd.f32 %v898_v30, %v131_v58 }
 0xe6e   :  { %1330 = vtanh.f32 %v903_v32  ;;  %v1210_v39 = vmul.f32 -1.442695, %v903_v32 }
 0xe73   :  { %v900_v16 = vpop.f32.mrf.mxu1 }
 0xe74   :  { %v1331_v34 = vpop.eup %1330  ;;  %v904_v33 = vadd.f32 %v900_v16, %v1654_v6 }
 0xe75   :  { %956 = vrot.lane.b32.xlu0 %v1331_v34, %s1364_s25 }
 0xe76   :  { %1332 = vtanh.f32 %v904_v33  ;;  %v1211_v35 = vmul.f32 -1.442695, %v904_v33 }
 0xe77   :  { %1334 = vpow2.f32 %v1210_v39 }
 0xe78   :  { %1336 = vpow2.f32 %v1211_v35 }
 0xe7c   :  { %v1333_v38 = vpop.eup %1332 }
 0xe7d   :  { %958 = vrot.lane.b32.xlu1 %v1333_v38, %s1364_s25  ;;  %v1335_v40 = vpop.eup %1334 }
 0xe7e   :  { %v911_v42 = vadd.f32 1.0, %v1335_v40  ;;  %v1337_v25 = vpop.eup %1336 }
 0xe7f   :  { %v912_v36 = vadd.f32 1.0, %v1337_v25  ;;  %v136_v25 = vadd.f32 %v1648_v51, %v1515_v37 }
 0xe80   :  { %1338 = vrcp.f32 %v911_v42  ;;  %v924_v57 = vand.u32 2147483648, %v911_v42  ;;  %vm918_vm7 = vweird.f32 %v911_v42  ;;  %v922_v59 = vand.u32 2147483647, %v911_v42 }
 0xe81   :  { %1340 = vrcp.f32 %v912_v36  ;;  %v939_v43 = vand.u32 2147483648, %v912_v36  ;;  %vm933_vm14 = vweird.f32 %v912_v36  ;;  %v937_v12 = vand.u32 2147483647, %v912_v36 }
 0xe82   :  { %v925_v49 = vor.u32 1.1754944e-38, %v924_v57  ;;  %vm923_vm12 = vcmp.eq.f32.partialorder %v922_v59, 8.507059e+37 }
 0xe83   :  { %v940_v7 = vor.u32 1.1754944e-38, %v939_v43  ;;  %vm938_vm1 = vcmp.eq.f32.partialorder %v937_v12, 8.507059e+37 }
 0xe86   :  { %v1339_v56 = vpop.eup %1338 }
 0xe87   :  { %v914_v45 = vmul.f32 %v1339_v56, %v911_v42  ;;  %v1341_v47 = vpop.eup %1340  ;;  %vm919_vm6 = vweird.f32 %v1339_v56 }
 0xe88   :  { %v929_v52 = vmul.f32 %v1341_v47, %v912_v36  ;;  %vm920_vm8 = vmor %vm918_vm7, %vm919_vm6  ;;  %vm934_vm13 = vweird.f32 %v1341_v47 }
 0xe89   :  { %v915_v46 = vsub.f32 1.0, %v914_v45  ;;  %vm935_vm15 = vmor %vm933_vm14, %vm934_vm13  ;;  %vm1135_vm14 = vcmask 1046528  }
 0xe8a   :  { %v930_v55 = vsub.f32 1.0, %v929_v52 }
 0xe8b   :  { %v916_v50 = vmul.f32 %v1339_v56, %v915_v46 }
 0xe8c   :  { %v931_v61 = vmul.f32 %v1341_v47, %v930_v55 }
 0xe8d   :  { %v917_v53 = vadd.f32 %v1339_v56, %v916_v50 }
 0xe8e   :  { %v932_v0 = vadd.f32 %v1341_v47, %v931_v61 }
 0xe8f   :  { %v921_v60 = vsel %vm920_vm8, %v1339_v56, %v917_v53 }
 0xe90   :  { %v926_v44 = vsel %vm923_vm12, %v925_v49, %v921_v60  ;;  %v936_v4 = vsel %vm935_vm15, %v1341_v47, %v932_v0 }
 0xe91   :  { %v941_v31 = vsel %vm938_vm1, %v940_v7, %v936_v4  ;;  %v952_v11 = vmul.f32 %v1633_v54, %v926_v44 }
 0xe92   :  { %v953_v15 = vmul.f32 %v948_v10, %v941_v31 }
 0xee7   :  { %v957_v62 = vpop.permute.xlu0 %956 }
 0xee8   :  { %v962_v63 = vmul.f32 %v957_v62, %v926_v44 }
 0xeea   :  { %966 = vrot.lane.b32.xlu2 %v962_v63, %s1365_s26 }
 0xeef   :  { %v959_v9 = vpop.permute.xlu1 %958 }
 0xef0   :  { %v963_v41 = vmul.f32 %v959_v9, %v941_v31 }
 0xef2   :  { %968 = vrot.lane.b32.xlu0 %v963_v41, %s1365_s26 }
 0xf44   :  { %v967_v1 = vpop.permute.xlu2 %966 }
 0xf45   :  { %v1662_v14 = vadd.f32 %v967_v1, %v952_v11 }
 0xf47   :  { %1342 = vtanh.f32 %v1662_v14  ;;  %v1068_v18 = vrot.slane %v1662_v14, 4 }
 0xf4d   :  { %v1343_v3 = vpop.eup %1342 }
 0xf4e   :  { %978 = vrot.lane.b32.xlu1 %v1343_v3, %s1364_s25 }
 0xf64   :  { %v969_v48 = vpop.permute.xlu0 %968 }
 0xf65   :  { %v973_v17 = vadd.f32 %v969_v48, %v953_v15 }
 0xf67   :  { %1344 = vtanh.f32 %v973_v17  ;;  %v1069_v2 = vrot.slane %v973_v17, 4 }
 0xf69   :  { %v1672_v54 = vsel %vm289_vm9, %v1068_v18, %v1069_v2 }
 0xf6d   :  { %v1345_v19 = vpop.eup %1344 }
 0xf6e   :  { %980 = vrot.lane.b32.xlu2 %v1345_v19, %s1364_s25 }
 0xfc0   :  { %v979_v20 = vpop.permute.xlu1 %978 }
 0xfc1   :  { %v984_v21 = vmul.f32 %v979_v20, %v926_v44 }
 0xfc3   :  { %v986_v8 = vsel %vm247_vm10, %v984_v21, 0.0 }
 0xfc8   :  { %v981_v22 = vpop.permute.xlu2 %980 }
 0xfc9   :  { %v985_v23 = vmul.f32 %v981_v22, %v941_v31 }
 0xfcb   :  { %v987_v10 = vsel %vm249_vm11, %v985_v23, 0.0  ;;  %v996_v24 = vpack.c.bf16 %v985_v23, %v984_v21 }
 0xfcc   :  { %v988_v26 = vadd.f32 %v987_v10, %v986_v8 }
 0xfcd   :  { %998 = vrot.lane.b32.xlu0 %v996_v24, %s1365_s26 }
 0xfce   :  { %v989_v5 = vrot.slane %v988_v26, 4 }
 0xfd0   :  { %v990_v28 = vadd.f32 %v989_v5, %v988_v26 }
 0xfd2   :  { %v991_v13 = vrot.slane %v990_v28, 2 }
 0xfd4   :  { %v992_v58 = vadd.f32 %v991_v13, %v990_v28 }
 0xfd6   :  { %v993_v30 = vrot.slane %v992_v58, 1 }
 0xfd8   :  { %v994_v32 = vadd.f32 %v993_v30, %v992_v58 }
 0xfda   :  { %v995_v16 = vmul.f32 %v994_v32, %v1498_v27 }
 0xfdc   :  { %v1680_v34 = vsel %vm1133_vm2, %v1642_v29, %v995_v16 }
0x103f   :  { %v999_v33 = vpop.permute.xlu0 %998 }
0x1040   :  { %1212 = vmatmul.msk.bf16.vlgmr.msra.gmra.mxu2 %vm80_vm0, %v999_v33 }
0x10c3   :  { %v1012_v38 = vpop.f32.mrf.mxu2 }
0x10c4   :  { %v1019_v39 = vrot.slane %v1012_v38, 4 }
0x10c6   :  { %v1024_v35 = vadd.f32 %v1019_v39, %v1654_v6 }
0x10c8   :  { %1346 = vtanh.f32 %v1024_v35  ;;  %v1213_v50 = vmul.f32 -1.442695, %v1024_v35 }
0x10cb   :  { %v1014_v40 = vpop.f32.mrf.mxu2 }
0x10cc   :  { %v1020_v42 = vrot.slane %v1014_v40, 4 }
0x10ce   :  { %v1347_v36 = vpop.eup %1346  ;;  %v1021_v56 = vsel %vm289_vm9, %v1019_v39, %v1020_v42 }
0x10cf   :  { %v1025_v45 = vadd.f32 %v1021_v56, %v136_v25  ;;  %1077 = vrot.lane.b32.xlu1 %v1347_v36, %s1364_s25 }
0x10d1   :  { %1348 = vtanh.f32 %v1025_v45  ;;  %v1214_v46 = vmul.f32 -1.442695, %v1025_v45 }
0x10d3   :  { %1350 = vpow2.f32 %v1214_v46 }
0x10d7   :  { %v1349_v29 = vpop.eup %1348 }
0x10d8   :  { %1079 = vrot.lane.b32.xlu2 %v1349_v29, %s1364_s25 }
0x10d9   :  { %v1351_v47 = vpop.eup %1350 }
0x10da   :  { %v1033_v6 = vadd.f32 1.0, %v1351_v47 }
0x10dc   :  { %1352 = vrcp.f32 %v1033_v6  ;;  %v1060_v61 = vand.u32 2147483648, %v1033_v6  ;;  %vm1054_vm4 = vweird.f32 %v1033_v6  ;;  %v1058_v49 = vand.u32 2147483647, %v1033_v6 }
0x10dd   :  { %1354 = vpow2.f32 %v1213_v50 }
0x10de   :  { %v1061_v63 = vor.u32 1.1754944e-38, %v1060_v61  ;;  %vm1059_vm6 = vcmp.eq.f32.partialorder %v1058_v49, 8.507059e+37 }
0x10e2   :  { %v1353_v52 = vpop.eup %1352 }
0x10e3   :  { %v1355_v53 = vpop.eup %1354  ;;  %v1050_v37 = vmul.f32 %v1353_v52, %v1033_v6  ;;  %vm1055_vm3 = vweird.f32 %v1353_v52 }
0x10e4   :  { %v1032_v51 = vadd.f32 1.0, %v1355_v53  ;;  %vm1056_vm5 = vmor %vm1054_vm4, %vm1055_vm3 }
0x10e5   :  { %v1051_v55 = vsub.f32 1.0, %v1050_v37 }
0x10e6   :  { %1356 = vrcp.f32 %v1032_v51  ;;  %v1045_v31 = vand.u32 2147483648, %v1032_v51  ;;  %vm1039_vm8 = vweird.f32 %v1032_v51  ;;  %v1043_v41 = vand.u32 2147483647, %v1032_v51 }
0x10e7   :  { %v1052_v57 = vmul.f32 %v1353_v52, %v1051_v55 }
0x10e8   :  { %v1046_v1 = vor.u32 1.1754944e-38, %v1045_v31  ;;  %vm1044_vm13 = vcmp.eq.f32.partialorder %v1043_v41, 8.507059e+37 }
0x10e9   :  { %v1053_v60 = vadd.f32 %v1353_v52, %v1052_v57 }
0x10eb   :  { %v1057_v44 = vsel %vm1056_vm5, %v1353_v52, %v1053_v60 }
0x10ec   :  { %v1357_v59 = vpop.eup %1356  ;;  %v1062_v43 = vsel %vm1059_vm6, %v1061_v63, %v1057_v44 }
0x10ed   :  { %v1035_v62 = vmul.f32 %v1357_v59, %v1032_v51  ;;  %vm1040_vm7 = vweird.f32 %v1357_v59  ;;  %v1074_v17 = vmul.f32 %v1672_v54, %v1062_v43 }
0x10ee   :  { %vm1041_vm12 = vmor %vm1039_vm8, %vm1040_vm7 }
0x10ef   :  { %v1036_v12 = vsub.f32 1.0, %v1035_v62 }
0x10f1   :  { %v1037_v7 = vmul.f32 %v1357_v59, %v1036_v12 }
0x10f3   :  { %v1038_v9 = vadd.f32 %v1357_v59, %v1037_v7 }
0x10f5   :  { %v1042_v11 = vsel %vm1041_vm12, %v1357_v59, %v1038_v9 }
0x10f6   :  { %v1047_v15 = vsel %vm1044_vm13, %v1046_v1, %v1042_v11 }
0x10f7   :  { %v1073_v21 = vmul.f32 %v1068_v18, %v1047_v15 }
0x1132   :  { %v1080_v0 = vpop.permute.xlu2 %1079 }
0x1133   :  { %v1084_v4 = vmul.f32 %v1080_v0, %v1062_v43 }
0x1135   :  { %1089 = vrot.lane.b32.xlu1 %v1084_v4, %s1365_s26 }
0x1141   :  { %v1078_v3 = vpop.permute.xlu1 %1077 }
0x1142   :  { %v1083_v48 = vmul.f32 %v1078_v3, %v1047_v15 }
0x1144   :  { %1087 = vrot.lane.b32.xlu0 %v1083_v48, %s1365_s26 }
0x11a7   :  { %v1090_v2 = vpop.permute.xlu1 %1089 }
0x11a8   :  { %v1094_v19 = vadd.f32 %v1090_v2, %v1074_v17 }
0x11aa   :  { %1358 = vtanh.f32 %v1094_v19 }
0x11b0   :  { %v1359_v20 = vpop.eup %1358 }
0x11b1   :  { %1101 = vrot.lane.b32.xlu0 %v1359_v20, %s1364_s25 }
0x11b6   :  { %v1088_v22 = vpop.permute.xlu0 %1087 }
0x11b7   :  { %v1093_v23 = vadd.f32 %v1088_v22, %v1073_v21 }
0x11b9   :  { %1360 = vtanh.f32 %v1093_v23 }
0x11bf   :  { %v1361_v8 = vpop.eup %1360 }
0x11c0   :  { %1099 = vrot.lane.b32.xlu2 %v1361_v8, %s1364_s25 }
0x121a   :  { %v1100_v10 = vpop.permute.xlu2 %1099 }
0x121b   :  { %v1105_v24 = vmul.f32 %v1100_v10, %v1047_v15 }
0x121d   :  { %v1109_v54 = vrot.slane %v1105_v24, 4 }
0x1223   :  { %v1102_v26 = vpop.permute.xlu0 %1101 }
0x1224   :  { %v1106_v5 = vmul.f32 %v1102_v26, %v1062_v43 }
0x1226   :  { %v1110_v28 = vrot.slane %v1106_v5, 4 }
0x1228   :  { %v1111_v13 = vsel %vm289_vm9, %v1109_v54, %v1110_v28  ;;  %v1115_v58 = vsel %vm249_vm11, %v1110_v28, 0.0 }
0x1229   :  { %v1114_v30 = vsel %vm247_vm10, %v1111_v13, 0.0 }
0x122a   :  { %v1116_v14 = vadd.f32 %v1115_v58, %v1114_v30 }
0x122c   :  { %v1117_v18 = vrot.slane %v1116_v14, 4 }
0x122e   :  { %v1118_v32 = vadd.f32 %v1117_v18, %v1116_v14 }
0x1230   :  { %v1119_v16 = vrot.slane %v1118_v32, 2 }
0x1232   :  { %v1120_v33 = vadd.f32 %v1119_v16, %v1118_v32 }
0x1234   :  { %v1121_v38 = vrot.slane %v1120_v33, 1 }
0x1236   :  { %v1122_v39 = vadd.f32 %v1121_v38, %v1120_v33 }
0x1238   :  { %v1123_v35 = vmul.f32 %v1122_v39, %v1498_v27 }
0x123a   :  { %v1136_v40 = vsel %vm1135_vm14, %v1680_v34, %v1123_v35 }
0x123b   :  { %1138 = vrot.lane.b32.xlu1 %v1136_v40, %s1365_s26 }
0x12ad   :  { %v1139_v42 = vpop.permute.xlu1 %1138 }
0x12ae   :  { %1141 = vst.msk [vmem:[%s1710_s4] sm:$0xff] %vm80_vm0, %v1139_v42 }

// kernel: tapnet_forward.9
= control target key start
LH: loop header
LB: loop body
LE: loop exit
PB: predicated region body
PF: predicated region fallthrough
CT: control target
= control target key end

     0   :  { %vm80_vm0 = vcmask 1043456   ;;  %vm76_vm1 = vcmask 457728   ;;  %v677_v13 = vmov 8.0   ;;  %vm97_vm2 = vcmask 523264   ;;  %s680_s29 = smov 2   ;;  %s881_s1 = inlined_call_operand.vmem [shape: bf16[56,64], index: 1, kind: input, shape index: {}]   ;;  %s882_s2 = inlined_call_operand.vmem [shape: f32[1,64], index: 2, kind: input, shape index: {}]   ;;  %s883_s0 = inlined_call_operand.vmem [shape: f32[8,56], index: 0, kind: input, shape index: {}]   ;;  %s884_s3 = inlined_call_operand.vmem [shape: f32[1,64], index: 3, kind: input, shape index: {}]   ;;  %s885_s4 = inlined_call_operand.vmem [shape: f32[1,64], index: 4, kind: input, shape index: {}]   ;;  %s886_s6 = inlined_call_operand.vmem [shape: f32[1,32], index: 6, kind: input, shape index: {}]   ;;  %s887_s5 = inlined_call_operand.vmem [shape: bf16[64,32], index: 5, kind: input, shape index: {}]   ;;  %s888_s8 = inlined_call_operand.vmem [shape: bf16[3,32,128], index: 8, kind: input, shape index: {}]   ;;  %s889_s9 = inlined_call_operand.vmem [shape: f32[3,1,128], index: 9, kind: input, shape index: {}]   ;;  %s890_s10 = inlined_call_operand.vmem [shape: f32[3,1,128], index: 10, kind: input, shape index: {}]   ;;  %s891_s11 = inlined_call_operand.vmem [shape: f32[3,1,1], index: 11, kind: input, shape index: {}]   ;;  %s892_s7 = inlined_call_operand.vmem [shape: f32[8,3], index: 7, kind: input, shape index: {}]   ;;  %s893_s12 = inlined_call_operand.vmem [shape: f32[8,3], index: 12, kind: output, shape index: {}]  }
   0x1   :  { %v50_v0 = vld [vmem:[%s881_s1 + $0x18] sm:$0xf]  ;;  %v615_v4 = vld [vmem:[%s881_s1 + $0x10] sm:$0xff]  ;;  %v614_v5 = vld [vmem:[%s881_s1 + $0x8] sm:$0xff]  ;;  %649 = vrcp.f32 %v677_v13  ;;  %vm222_vm8 = vcmask 261120   ;;  %vm255_vm10 = vcmask 7168  }
   0x2   :  { %v68_v1 = vunpack.c.l.b16 %v50_v0  ;;  %v613_v6 = vld [vmem:[%s881_s1] sm:$0xff]  ;;  %v619_v9 = vld [vmem:[%s887_s5 + $0x18] sm:$0xff]  ;;  %v618_v10 = vld [vmem:[%s887_s5 + $0x10] sm:$0xff]  ;;  %vm477_vm15 = vcmask 23568  }
   0x3   :  { %v42_v7 = vld [vmem:[%s883_s0] sm:$0xff]  ;;  %192 = vmatpush.bf16.msra.mxu1 %v619_v9  ;;  %v617_v11 = vld [vmem:[%s887_s5 + $0x8] sm:$0xff]  ;;  %v623_v43 = vld [vmem:[%s888_s8 + $0x18] sm:$0xff] }
   0x4   :  { %v72_v2 = vpack.c.b16 %v68_v1, %v68_v1  ;;  %v43_v8 = vpack.c.bf16 %v42_v7, %v42_v7  ;;  %v616_v12 = vld [vmem:[%s887_s5] sm:$0xff]  ;;  %v621_v42 = vld [vmem:[%s888_s8 + $0x8] sm:$0xff]  ;;  %339 = vmatpush.bf16.msra.mxu3 %v623_v43  ;;  %v622_v61 = vld [vmem:[%s888_s8 + $0x10] sm:$0xff] }
   0x5   :  { %v636_v15 = vld [vmem:[%s882_s2] ss:$0 sm:$0xff]  ;;  %232 = vmatpush.bf16.msra.mxu2 %v621_v42  ;;  %v625_v62 = vld [vmem:[%s888_s8 + $0x28] sm:$0xff] }
   0x6   :  { %v82_v3 = vsel %vm80_vm0, %v72_v2, 0  ;;  %v637_v51 = vld [vmem:[%s884_s3] ss:$0 sm:$0xff]  ;;  %vm366_vm0 = vcmask 15368  }
   0x7   :  { %88 = vmatpush.bf16.msra.mxu0 %v82_v3  ;;  %193 = vmatpush.bf16.msra.mxu1 %v618_v10  ;;  %v650_v14 = vpop.eup %649  ;;  %v638_v54 = vld [vmem:[%s885_s4] ss:$0 sm:$0xff] }
   0x8   :  { %v106_v16 = vmul.f32 8.0, %v650_v14  ;;  %vm110_vm3 = vweird.f32 %v650_v14  ;;  %v620_v60 = vld [vmem:[%s888_s8] sm:$0xff]  ;;  %340 = vmatpush.bf16.msra.mxu3 %v622_v61 }
   0x9   :  { %233 = vmatpush.bf16.msra.mxu2 %v620_v60  ;;  %v624_v63 = vld [vmem:[%s888_s8 + $0x20] sm:$0xff] }
   0xa   :  { %v107_v19 = vsub.f32 1.0, %v106_v16  ;;  %v639_v0 = vld [vmem:[%s886_s6] ss:$0 sm:$0xff] }
   0xb   :  { %89 = vmatpush.bf16.msra.mxu0 %v615_v4  ;;  %194 = vmatpush.bf16.msra.mxu1 %v617_v11  ;;  %v643_v11 = vld [vmem:[%s890_s10] ss:$0 sm:$0xff] }
   0xc   :  { %v108_v22 = vmul.f32 %v650_v14, %v107_v19  ;;  %v644_v19 = vld [vmem:[%s889_s9 + $0x2] ss:$0 sm:$0xff] }
   0xd   :  { %450 = vmatpush.bf16.msrb.mxu2 %v625_v62 }
   0xe   :  { %v109_v26 = vadd.f32 %v650_v14, %v108_v22  ;;  %v645_v22 = vld [vmem:[%s890_s10 + $0x2] ss:$0 sm:$0xff] }
   0xf   :  { %90 = vmatpush.bf16.msra.mxu0 %v614_v5  ;;  %195 = vmatpush.bf16.msra.mxu1 %v616_v12  ;;  %v640_v5 = vld [vmem:[%s889_s9] ss:$0 sm:$0xff]  ;;  %v642_v12 = vld [vmem:[%s890_s10 + $0x1] ss:$0 sm:$0xff]  ;;  %s679_s10 = smov 1  }
  0x10   :  { %v111_v29 = vsel %vm110_vm3, %v650_v14, %v109_v26  ;;  %v678_v26 = vmov 0  }
  0x11   :  { %451 = vmatpush.bf16.msrb.mxu2 %v624_v63  ;;  %632 = vset.pattern.permute.xlu2 %v678_v26  ;;  %v681_v26 = vmov 2  }
  0x13   :  { %91 = vmatpush.bf16.msra.mxu0 %v613_v6  ;;  %v641_v6 = vld [vmem:[%s889_s9 + $0x1] ss:$0 sm:$0xff] }
  0x16   :  { %554 = vmatmul.msk.bf16.vlgmr.msra.gmra.mxu0 %vm76_vm1, %v43_v8 }
  0x93   :  { %v93_v17 = vpop.f32.mrf.mxu0 }
  0x94   :  { %v94_v18 = vadd.f32 %v636_v15, %v93_v17 }
  0x96   :  { %v98_v20 = vsel %vm97_vm2, %v94_v18, 0.0 }
  0x97   :  { %v99_v21 = vrot.slane %v98_v20, 4 }
  0x99   :  { %v100_v23 = vadd.f32 %v99_v21, %v98_v20 }
  0x9b   :  { %v95_v24 = vpop.f32.mrf.mxu0  ;;  %v101_v25 = vrot.slane %v100_v23, 2 }
  0x9d   :  { %v102_v27 = vadd.f32 %v101_v25, %v100_v23 }
  0x9f   :  { %v103_v28 = vrot.slane %v102_v27, 1 }
  0xa1   :  { %v104_v30 = vadd.f32 %v103_v28, %v102_v27  ;;  %v647_v27 = vld [vmem:[%s891_s11] ss:$0 sm:$0xff] }
  0xa2   :  { %v839_v28 = vld [vmem:[%s892_s7] sm:$0xff] }
  0xa3   :  { %v112_v31 = vmul.f32 %v111_v29, %v104_v30  ;;  %vm253_vm9 = vcmp.gt.f32.partialorder %v839_v28, 0.0 }
  0xa5   :  { %v113_v32 = vsub.f32 %v94_v18, %v112_v31 }
  0xa7   :  { %v114_v33 = vmul.f32 %v113_v32, %v113_v32 }
  0xa9   :  { %v115_v34 = vsel %vm97_vm2, %v114_v33, 0.0 }
  0xaa   :  { %v116_v35 = vrot.slane %v115_v34, 4 }
  0xac   :  { %v117_v36 = vadd.f32 %v116_v35, %v115_v34 }
  0xae   :  { %v118_v37 = vrot.slane %v117_v36, 2 }
  0xb0   :  { %v119_v38 = vadd.f32 %v118_v37, %v117_v36 }
  0xb2   :  { %v120_v39 = vrot.slane %v119_v38, 1 }
  0xb4   :  { %v121_v40 = vadd.f32 %v120_v39, %v119_v38 }
  0xb6   :  { %v122_v41 = vmul.f32 %v121_v40, %v111_v29  ;;  %v646_v29 = vld [vmem:[%s891_s11 + $0x1] ss:$0 sm:$0xff] }
  0xb8   :  { %v123_v44 = vadd.f32 1e-05, %v122_v41  ;;  %v648_v41 = vld [vmem:[%s891_s11 + $0x2] ss:$0 sm:$0xff] }
  0xba   :  { %651 = vrsqrt.f32 %v123_v44  ;;  %vm130_vm5 = vweird.f32 %v123_v44 }
  0xc0   :  { %v652_v45 = vpop.eup %651 }
  0xc1   :  { %v125_v46 = vmul.f32 %v652_v45, %v123_v44  ;;  %vm131_vm4 = vweird.f32 %v652_v45 }
  0xc2   :  { %vm132_vm6 = vmor %vm130_vm5, %vm131_vm4 }
  0xc3   :  { %v126_v47 = vmul.f32 %v652_v45, %v125_v46 }
  0xc5   :  { %v127_v48 = vmul.f32 0.5, %v126_v47 }
  0xc7   :  { %v128_v49 = vsub.f32 1.5, %v127_v48 }
  0xc9   :  { %v129_v50 = vmul.f32 %v652_v45, %v128_v49 }
  0xcb   :  { %v133_v52 = vsel %vm132_vm6, %v652_v45, %v129_v50 }
  0xcc   :  { %v134_v53 = vmul.f32 %v133_v52, %v113_v32 }
  0xce   :  { %v139_v55 = vmul.f32 %v637_v51, %v134_v53 }
  0xd0   :  { %v144_v56 = vadd.f32 %v638_v54, %v139_v55 }
  0xd2   :  { %vm145_vm7 = vcmp.ge.f32.partialorder %v144_v56, 0.0  ;;  %v146_v57 = vmul.f32 0.01, %v144_v56 }
  0xd4   :  { %v147_v58 = vsel %vm145_vm7, %v144_v56, %v146_v57 }
  0xd5   :  { %v148_v59 = vpack.c.bf16 %v147_v58, %v147_v58 }
  0xd7   :  { %571 = vmatmul.msk.bf16.vlgmr.msra.gmra.mxu1 %vm97_vm2, %v148_v59 }
 0x154   :  { %v197_v1 = vpop.f32.mrf.mxu1 }
 0x155   :  { %v808_v2 = vadd.f32 %v639_v0, %v197_v1 }
 0x157   :  { %v201_v3 = vpack.c.bf16 %v808_v2, %v808_v2 }
 0x159   :  { %580 = vmatmul.msk.bf16.vlgmr.msra.gmra.mxu2 %vm222_vm8, %v201_v3  ;;  %594 = vmatmul.msk.bf16.vlgmr.msra.gmra.mxu3 %vm222_vm8, %v201_v3 }
 0x15c   :  { %v199_v4 = vpop.f32.mrf.mxu1 }
 0x169   :  { %610 = vmatmul.msk.bf16.vlgmr.msrb.gmra.mxu2 %vm222_vm8, %v201_v3 }
 0x1dc   :  { %v235_v7 = vpop.f32.mrf.mxu2  ;;  %v342_v8 = vpop.f32.mrf.mxu3 }
 0x1dd   :  { %v236_v9 = vadd.f32 %v640_v5, %v235_v7  ;;  %v343_v10 = vadd.f32 %v641_v6, %v342_v8 }
 0x1df   :  { %653 = vtanh.f32 %v236_v9 }
 0x1e0   :  { %655 = vtanh.f32 %v343_v10 }
 0x1e4   :  { %v237_v13 = vpop.f32.mrf.mxu2  ;;  %v344_v14 = vpop.f32.mrf.mxu3 }
 0x1e5   :  { %v654_v15 = vpop.eup %653 }
 0x1e6   :  { %v656_v16 = vpop.eup %655  ;;  %v244_v17 = vmul.f32 %v654_v15, %v643_v11 }
 0x1e7   :  { %v352_v18 = vmul.f32 %v656_v16, %v642_v12 }
 0x1e8   :  { %245 = vadd.xlane.f32.xlu1 %v244_v17 }
 0x1e9   :  { %353 = vadd.xlane.f32.xlu0 %v352_v18 }
 0x1ec   :  { %v453_v20 = vpop.f32.mrf.mxu2 }
 0x1ed   :  { %v454_v21 = vadd.f32 %v644_v19, %v453_v20 }
 0x1ef   :  { %657 = vtanh.f32 %v454_v21 }
 0x1f4   :  { %v455_v23 = vpop.f32.mrf.mxu2 }
 0x1f5   :  { %v658_v24 = vpop.eup %657 }
 0x1f6   :  { %v463_v25 = vmul.f32 %v658_v24, %v645_v22 }
 0x1f8   :  { %464 = vadd.xlane.f32.xlu0 %v463_v25 }
 0x25b   :  { %v246_v30 = vpop.xlane.xlu1 %245 }
 0x25c   :  { %v354_v31 = vpop.xlane.xlu0 %353  ;;  %v251_v32 = vadd.f32 %v647_v27, %v246_v30 }
 0x25d   :  { %v360_v33 = vadd.f32 %v646_v29, %v354_v31 }
 0x25e   :  { %v254_v34 = vsel %vm253_vm9, %v251_v32, -1e+30 }
 0x25f   :  { %v256_v35 = vsel %vm255_vm10, %v254_v34, -inf  ;;  %362 = vrot.lane.b32.xlu1 %v360_v33, %s679_s10 }
 0x260   :  { %v257_v36 = vrot.slane %v256_v35, 4 }
 0x262   :  { %v258_v37 = vmax.f32 %v256_v35, %v257_v36 }
 0x264   :  { %v259_v38 = vrot.slane %v258_v37, 2 }
 0x266   :  { %v260_v39 = vmax.f32 %v258_v37, %v259_v38 }
 0x268   :  { %v261_v40 = vrot.slane %v260_v39, 1 }
 0x26a   :  { %v262_v42 = vmax.f32 %v260_v39, %v261_v40 }
 0x26b   :  { %v465_v43 = vpop.xlane.xlu0 %464 }
 0x26c   :  { %v263_v44 = vsub.f32 %v254_v34, %v262_v42  ;;  %v471_v45 = vadd.f32 %v648_v41, %v465_v43  ;;  %v682_v34 = vmov 1  }
 0x26d   :  { %633 = vset.pattern.permute.xlu0 %v682_v34 }
 0x26e   :  { %v264_v46 = vmul.f32 1.442695, %v263_v44  ;;  %473 = vrot.lane.b32.xlu2 %v471_v45, %s680_s29 }
 0x270   :  { %659 = vpow2.f32 %v264_v46 }
 0x276   :  { %v660_v47 = vpop.eup %659 }
 0x277   :  { %v266_v48 = vmul.f32 %v660_v47, %v839_v28 }
 0x279   :  { %v267_v49 = vsel %vm255_vm10, %v266_v48, 0.0 }
 0x27a   :  { %v268_v50 = vrot.slane %v267_v49, 4 }
 0x27c   :  { %v269_v51 = vadd.f32 %v268_v50, %v267_v49 }
 0x27e   :  { %v270_v52 = vrot.slane %v269_v51, 2 }
 0x280   :  { %v271_v53 = vadd.f32 %v270_v52, %v269_v51 }
 0x282   :  { %v272_v54 = vrot.slane %v271_v53, 1 }
 0x284   :  { %v273_v55 = vadd.f32 %v272_v54, %v271_v53 }
 0x286   :  { %v274_v56 = vmax.f32 %v273_v55, 1e-30 }
 0x288   :  { %661 = vrcp.f32 %v274_v56  ;;  %v286_v60 = vand.u32 2147483648, %v274_v56  ;;  %v284_v62 = vand.u32 2147483647, %v274_v56  ;;  %vm280_vm12 = vweird.f32 %v274_v56 }
 0x28a   :  { %v287_v0 = vor.u32 1.1754944e-38, %v286_v60  ;;  %vm285_vm14 = vcmp.eq.f32.partialorder %v284_v62, 8.507059e+37 }
 0x28e   :  { %v662_v57 = vpop.eup %661 }
 0x28f   :  { %v276_v58 = vmul.f32 %v662_v57, %v274_v56  ;;  %vm281_vm11 = vweird.f32 %v662_v57 }
 0x290   :  { %vm282_vm13 = vmor %vm280_vm12, %vm281_vm11  ;;  %vm534_vm11 = vcmask 15360   ;;  %vm536_vm12 = vcmask 23552  }
 0x291   :  { %v277_v59 = vsub.f32 1.0, %v276_v58 }
 0x293   :  { %v278_v61 = vmul.f32 %v662_v57, %v277_v59 }
 0x295   :  { %v279_v63 = vadd.f32 %v662_v57, %v278_v61 }
 0x297   :  { %v283_v1 = vsel %vm282_vm13, %v662_v57, %v279_v63 }
 0x298   :  { %v288_v3 = vsel %vm285_vm14, %v287_v0, %v283_v1 }
 0x299   :  { %v289_v4 = vmul.f32 %v288_v3, %v266_v48 }
 0x29b   :  { %292 = vperm.xlu2 %632, %v289_v4  }
 0x2a3   :  { %634 = vset.pattern.permute.xlu2 %v681_v26 }
 0x2c8   :  { %v474_v5 = vpop.permute.xlu2 %473 }
 0x2c9   :  { %v476_v6 = vsel %vm253_vm9, %v474_v5, -1e+30 }
 0x2ca   :  { %v478_v7 = vsel %vm477_vm15, %v476_v6, -inf }
 0x2cb   :  { %v479_v8 = vrot.slane %v478_v7, 4 }
 0x2cd   :  { %v480_v9 = vmax.f32 %v478_v7, %v479_v8 }
 0x2cf   :  { %v481_v10 = vrot.slane %v480_v9, 2 }
 0x2d1   :  { %v482_v11 = vmax.f32 %v480_v9, %v481_v10  ;;  %v363_v12 = vpop.permute.xlu1 %362 }
 0x2d2   :  { %v365_v13 = vsel %vm253_vm9, %v363_v12, -1e+30 }
 0x2d3   :  { %v483_v14 = vrot.slane %v482_v11, 1  ;;  %v367_v15 = vsel %vm366_vm0, %v365_v13, -inf }
 0x2d4   :  { %v368_v16 = vrot.slane %v367_v15, 4 }
 0x2d5   :  { %v484_v17 = vmax.f32 %v482_v11, %v483_v14 }
 0x2d6   :  { %v369_v18 = vmax.f32 %v367_v15, %v368_v16 }
 0x2d7   :  { %v485_v19 = vsub.f32 %v476_v6, %v484_v17 }
 0x2d8   :  { %v370_v20 = vrot.slane %v369_v18, 2 }
 0x2d9   :  { %v486_v21 = vmul.f32 1.442695, %v485_v19 }
 0x2da   :  { %v371_v22 = vmax.f32 %v369_v18, %v370_v20 }
 0x2db   :  { %663 = vpow2.f32 %v486_v21 }
 0x2dc   :  { %v372_v23 = vrot.slane %v371_v22, 1 }
 0x2de   :  { %v373_v24 = vmax.f32 %v371_v22, %v372_v23 }
 0x2e0   :  { %v374_v25 = vsub.f32 %v365_v13, %v373_v24 }
 0x2e1   :  { %v664_v27 = vpop.eup %663 }
 0x2e2   :  { %v488_v29 = vmul.f32 %v664_v27, %v839_v28  ;;  %v375_v30 = vmul.f32 1.442695, %v374_v25 }
 0x2e4   :  { %v489_v31 = vsel %vm477_vm15, %v488_v29, 0.0  ;;  %665 = vpow2.f32 %v375_v30 }
 0x2e5   :  { %v490_v32 = vrot.slane %v489_v31, 4 }
 0x2e7   :  { %v491_v33 = vadd.f32 %v490_v32, %v489_v31 }
 0x2e9   :  { %v492_v35 = vrot.slane %v491_v33, 2 }
 0x2ea   :  { %v666_v36 = vpop.eup %665 }
 0x2eb   :  { %v493_v37 = vadd.f32 %v492_v35, %v491_v33  ;;  %v377_v38 = vmul.f32 %v666_v36, %v839_v28 }
 0x2ed   :  { %v494_v39 = vrot.slane %v493_v37, 1  ;;  %v378_v40 = vsel %vm366_vm0, %v377_v38, 0.0 }
 0x2ee   :  { %v379_v41 = vrot.slane %v378_v40, 4 }
 0x2ef   :  { %v495_v42 = vadd.f32 %v494_v39, %v493_v37 }
 0x2f0   :  { %v380_v43 = vadd.f32 %v379_v41, %v378_v40 }
 0x2f1   :  { %v496_v44 = vmax.f32 %v495_v42, 1e-30 }
 0x2f2   :  { %v381_v45 = vrot.slane %v380_v43, 2 }
 0x2f3   :  { %667 = vrcp.f32 %v496_v44  ;;  %v508_v53 = vand.u32 2147483648, %v496_v44  ;;  %v506_v28 = vand.u32 2147483647, %v496_v44  ;;  %vm502_vm2 = vweird.f32 %v496_v44 }
 0x2f4   :  { %v382_v46 = vadd.f32 %v381_v45, %v380_v43 }
 0x2f5   :  { %v509_v56 = vor.u32 1.1754944e-38, %v508_v53  ;;  %vm507_vm4 = vcmp.eq.f32.partialorder %v506_v28, 8.507059e+37  ;;  %v293_v61 = vpop.permute.xlu2 %292 }
 0x2f6   :  { %v383_v47 = vrot.slane %v382_v46, 1  ;;  %v295_v1 = vmul.f32 %v293_v61, %v808_v2 }
 0x2f8   :  { %v384_v48 = vadd.f32 %v383_v47, %v382_v46  ;;  %v296_v7 = vsel %vm222_vm8, %v295_v1, 0.0 }
 0x2f9   :  { %v668_v49 = vpop.eup %667  ;;  %v297_v11 = vrot.slane %v296_v7, 4 }
 0x2fa   :  { %v385_v50 = vmax.f32 %v384_v48, 1e-30  ;;  %v498_v51 = vmul.f32 %v668_v49, %v496_v44  ;;  %vm503_vm1 = vweird.f32 %v668_v49 }
 0x2fb   :  { %vm504_vm3 = vmor %vm502_vm2, %vm503_vm1  ;;  %v298_v12 = vadd.f32 %v297_v11, %v296_v7 }
 0x2fc   :  { %669 = vrcp.f32 %v385_v50  ;;  %v499_v52 = vsub.f32 1.0, %v498_v51  ;;  %v397_v0 = vand.u32 2147483648, %v385_v50  ;;  %v395_v4 = vand.u32 2147483647, %v385_v50 }
 0x2fd   :  { %vm391_vm6 = vweird.f32 %v385_v50  ;;  %v299_v13 = vrot.slane %v298_v12, 2 }
 0x2fe   :  { %v500_v54 = vmul.f32 %v668_v49, %v499_v52  ;;  %v398_v6 = vor.u32 1.1754944e-38, %v397_v0  ;;  %vm396_vm9 = vcmp.eq.f32.partialorder %v395_v4, 8.507059e+37 }
 0x2ff   :  { %v300_v14 = vadd.f32 %v299_v13, %v298_v12 }
 0x300   :  { %v501_v55 = vadd.f32 %v668_v49, %v500_v54 }
 0x301   :  { %v301_v15 = vrot.slane %v300_v14, 1 }
 0x302   :  { %v670_v57 = vpop.eup %669  ;;  %v505_v58 = vsel %vm504_vm3, %v668_v49, %v501_v55 }
 0x303   :  { %v510_v59 = vsel %vm507_vm4, %v509_v56, %v505_v58  ;;  %v387_v60 = vmul.f32 %v670_v57, %v385_v50  ;;  %vm392_vm5 = vweird.f32 %v670_v57  ;;  %v302_v16 = vadd.f32 %v301_v15, %v300_v14 }
 0x304   :  { %v511_v62 = vmul.f32 %v510_v59, %v488_v29  ;;  %vm393_vm7 = vmor %vm391_vm6, %vm392_vm5 }
 0x305   :  { %v388_v63 = vsub.f32 1.0, %v387_v60  ;;  %v303_v17 = vsub.f32 %v808_v2, %v302_v16 }
 0x306   :  { %514 = vperm.xlu2 %634, %v511_v62  }
 0x307   :  { %v389_v3 = vmul.f32 %v670_v57, %v388_v63  ;;  %v304_v18 = vmul.f32 %v303_v17, %v303_v17 }
 0x309   :  { %v390_v5 = vadd.f32 %v670_v57, %v389_v3  ;;  %v305_v19 = vsel %vm222_vm8, %v304_v18, 0.0 }
 0x30b   :  { %v394_v8 = vsel %vm393_vm7, %v670_v57, %v390_v5 }
 0x30c   :  { %v399_v9 = vsel %vm396_vm9, %v398_v6, %v394_v8 }
 0x30d   :  { %v400_v10 = vmul.f32 %v399_v9, %v377_v38 }
 0x30f   :  { %403 = vperm.xlu0 %633, %v400_v10  }
 0x317   :  { %635 = vset.pattern.permute.xlu0 %v681_v26 }
 0x32f   :  { %306 = vadd.xlane.f32.xlu2 %v305_v19 }
 0x360   :  { %v515_v20 = vpop.permute.xlu2 %514 }
 0x361   :  { %v517_v21 = vmul.f32 %v515_v20, %v808_v2 }
 0x363   :  { %v518_v22 = vsel %vm222_vm8, %v517_v21, 0.0 }
 0x364   :  { %v519_v23 = vrot.slane %v518_v22, 4 }
 0x366   :  { %v520_v24 = vadd.f32 %v519_v23, %v518_v22 }
 0x368   :  { %v521_v25 = vrot.slane %v520_v24, 2 }
 0x36a   :  { %v522_v27 = vadd.f32 %v521_v25, %v520_v24 }
 0x36c   :  { %v523_v29 = vrot.slane %v522_v27, 1 }
 0x36e   :  { %v524_v26 = vadd.f32 %v523_v29, %v522_v27 }
 0x370   :  { %v525_v30 = vsub.f32 %v808_v2, %v524_v26 }
 0x372   :  { %v526_v31 = vmul.f32 %v525_v30, %v525_v30 }
 0x374   :  { %v527_v32 = vsel %vm222_vm8, %v526_v31, 0.0 }
 0x375   :  { %528 = vadd.xlane.f32.xlu0 %v527_v32 }
 0x381   :  { %v404_v33 = vpop.permute.xlu0 %403 }
 0x382   :  { %v406_v34 = vmul.f32 %v404_v33, %v808_v2 }
 0x384   :  { %v407_v35 = vsel %vm222_vm8, %v406_v34, 0.0 }
 0x385   :  { %v408_v36 = vrot.slane %v407_v35, 4 }
 0x387   :  { %v409_v37 = vadd.f32 %v408_v36, %v407_v35 }
 0x389   :  { %v410_v38 = vrot.slane %v409_v37, 2 }
 0x38b   :  { %v411_v39 = vadd.f32 %v410_v38, %v409_v37 }
 0x38d   :  { %v412_v40 = vrot.slane %v411_v39, 1 }
 0x38f   :  { %v413_v41 = vadd.f32 %v412_v40, %v411_v39 }
 0x391   :  { %v414_v42 = vsub.f32 %v808_v2, %v413_v41 }
 0x393   :  { %v415_v43 = vmul.f32 %v414_v42, %v414_v42 }
 0x395   :  { %v416_v44 = vsel %vm222_vm8, %v415_v43, 0.0 }
 0x396   :  { %417 = vadd.xlane.f32.xlu1 %v416_v44 }
 0x3a2   :  { %v307_v45 = vpop.xlane.xlu2 %306 }
 0x3a3   :  { %v308_v47 = vmul.f32 -0.5, %v307_v45 }
 0x3a5   :  { %v309_v49 = vmul.f32 1.442695, %v308_v47 }
 0x3a7   :  { %671 = vpow2.f32 %v309_v49 }
 0x3ad   :  { %v672_v54 = vpop.eup %671 }
 0x3e8   :  { %v529_v46 = vpop.xlane.xlu0 %528 }
 0x3e9   :  { %v530_v48 = vmul.f32 -0.5, %v529_v46 }
 0x3eb   :  { %v531_v52 = vmul.f32 1.442695, %v530_v48 }
 0x409   :  { %v418_v50 = vpop.xlane.xlu1 %417 }
 0x40a   :  { %v419_v51 = vmul.f32 -0.5, %v418_v50 }
 0x40c   :  { %v420_v53 = vmul.f32 1.442695, %v419_v51 }
 0x40e   :  { %673 = vpow2.f32 %v420_v53 }
 0x40f   :  { %675 = vpow2.f32 %v531_v52 }
 0x414   :  { %v674_v28 = vpop.eup %673 }
 0x415   :  { %v676_v2 = vpop.eup %675  ;;  %v533_v55 = vsel %vm255_vm10, %v672_v54, %v674_v28 }
 0x416   :  { %v535_v56 = vsel %vm534_vm11, %v533_v55, %v676_v2 }
 0x417   :  { %537 = vst.msk [vmem:[%s893_s12] sm:$0xff] %vm536_vm12, %v535_v56 }

</bundles_post_ra>
